<compile_context>
chip_gen: v7x
topology: tpu7x:2x2x1
jax: 0.10.0
libtpu: 0.0.40
codegen_flags: <defaults>
</compile_context>

<pallas_src>
import functools
import math

import jax
import jax.numpy as jnp
from jax.experimental import pallas as pl
from jax.experimental.pallas import tpu as pltpu

_LANE = 128                      # every channel axis is zero-padded to 128 lanes
_MAX_TILE = 512                  # node tile cap (safe under v7x 64 MiB VMEM, bf16)
_VMEM_LIMIT = 48 * 1024 * 1024   # explicit scoped-VMEM budget with headroom


# ---------------------------------------------------------------------------
# small helpers
# ---------------------------------------------------------------------------
def _round_up(v, m):
    return ((v + m - 1) // m) * m


def _choose_tile(n_pad):
    for t in (_MAX_TILE, 256, 128):
        if n_pad % t == 0:
            return t
    return 128


def _pad2d(x, rows, cols, dtype):
    out = jnp.zeros((rows, cols), dtype)
    return out.at[: x.shape[0], : x.shape[1]].set(x.astype(dtype))


# ---------------------------------------------------------------------------
# Pallas kernel: tiled GCN convolution with fused epilogue
# ---------------------------------------------------------------------------
def _gcn_conv_kernel(a_ref, x_ref, w_ref, b_ref, *rest,
                     apply_relu, add_residual, post_relu, has_mask):
    pos = 0
    mask_ref = rest[pos] if has_mask else None
    pos += int(has_mask)
    res_ref = rest[pos] if add_residual else None
    pos += int(add_residual)
    o_ref = rest[pos]
    acc_ref = rest[pos + 1]

    k = pl.program_id(1)
    nk = pl.num_programs(1)

    @pl.when(k == 0)
    def _init():
        acc_ref[...] = jnp.zeros_like(acc_ref)

    x = x_ref[...]
    if has_mask:                        # fused dropout on the conv input
        x = x * mask_ref[...]
    # small matmul (bf16 x bf16 -> f32), then the big A_hat tile matmul
    xw = jnp.dot(x, w_ref[...], preferred_element_type=jnp.float32)
    acc_ref[...] += jnp.dot(a_ref[...], xw.astype(jnp.bfloat16),
                            preferred_element_type=jnp.float32)

    @pl.when(k == nk - 1)
    def _finalize():
        out = acc_ref[...] + b_ref[...]
        if apply_relu:                  # per-layer activation
            out = jnp.maximum(out, 0.0)
        if add_residual:                # GCNBlock sum_res
            out = out + res_ref[...].astype(jnp.float32)
        if post_relu:                   # block-level activation
            out = jnp.maximum(out, 0.0)
        o_ref[...] = out.astype(o_ref.dtype)


def gcn_conv(a_hat, x, w, b, *, residual=None, mask=None,
             apply_relu=False, post_relu=False, out_dtype=jnp.bfloat16):
    """A_hat: [Np, Np] bf16 (normalized, padded); x: [Np, 128] bf16;
    w: [128, 128] bf16 (zero-padded); b: [1, 128] f32."""
    n_pad = a_hat.shape[0]
    c_in = x.shape[1]
    c_out = w.shape[1]
    tm = _choose_tile(n_pad)
    tk = _choose_tile(n_pad)
    grid = (n_pad // tm, n_pad // tk)

    kernel = functools.partial(
        _gcn_conv_kernel,
        apply_relu=apply_relu,
        add_residual=residual is not None,
        post_relu=post_relu,
        has_mask=mask is not None,
    )

    in_specs = [
        pl.BlockSpec((tm, tk), lambda i, k: (i, k)),       # A_hat tile
        pl.BlockSpec((tk, c_in), lambda i, k: (k, 0)),     # X k-tile
        pl.BlockSpec((c_in, c_out), lambda i, k: (0, 0)),  # W (resident)
        pl.BlockSpec((1, c_out), lambda i, k: (0, 0)),     # bias (resident)
    ]
    inputs = [a_hat, x, w, b]
    if mask is not None:
        in_specs.append(pl.BlockSpec((tk, c_in), lambda i, k: (k, 0)))
        inputs.append(mask)
    if residual is not None:
        in_specs.append(pl.BlockSpec((tm, c_out), lambda i, k: (i, 0)))
        inputs.append(residual)

    return pl.pallas_call(
        kernel,
        out_shape=jax.ShapeDtypeStruct((n_pad, c_out), out_dtype),
        grid=grid,
        in_specs=in_specs,
        out_specs=pl.BlockSpec((tm, c_out), lambda i, k: (i, 0)),
        scratch_shapes=[pltpu.VMEM((tm, c_out), jnp.float32)],
        compiler_params=pltpu.CompilerParams(
            dimension_semantics=("parallel", "arbitrary"),
            vmem_limit_bytes=_VMEM_LIMIT,
        ),
    )(*inputs)


# ---------------------------------------------------------------------------
# Pallas kernel: fused input_fields MLP (Linear + LayerNorm + ReLU) x 2
# ---------------------------------------------------------------------------
def _masked_layer_norm(h, gamma, beta, h_real):
    # TODO(synk): PyG graph-mode LayerNorm (whole-graph stats) would need a
    #             cross-tile reduction; node-wise (torch-style) LN used here.
    c = h.shape[-1]
    col = jax.lax.broadcasted_iota(jnp.int32, (1, c), 1)
    valid = col < h_real
    mean = jnp.sum(h, axis=-1, keepdims=True) * (1.0 / h_real)
    hc = jnp.where(valid, h - mean, 0.0)
    var = jnp.sum(hc * hc, axis=-1, keepdims=True) * (1.0 / h_real)
    y = hc * jax.lax.rsqrt(var + 1e-5)
    return y * gamma + beta


def _input_fields_kernel(x_ref, w1_ref, b1_ref, g1_ref, bt1_ref,
                         w2_ref, b2_ref, g2_ref, bt2_ref, o_ref, *, h_real):
    h = jnp.dot(x_ref[...], w1_ref[...],
                preferred_element_type=jnp.float32) + b1_ref[...]
    h = _masked_layer_norm(h, g1_ref[...], bt1_ref[...], h_real)
    h = jnp.maximum(h, 0.0)
    h = jnp.dot(h.astype(jnp.bfloat16), w2_ref[...],
                preferred_element_type=jnp.float32) + b2_ref[...]
    h = _masked_layer_norm(h, g2_ref[...], bt2_ref[...], h_real)
    h = jnp.maximum(h, 0.0)
    o_ref[...] = h.astype(o_ref.dtype)


def input_fields_forward(p, x, h_real):
    n = x.shape[0]
    n_pad = _round_up(n, _LANE)
    x_pad = _pad2d(x, n_pad, _LANE, jnp.bfloat16)
    tm = _choose_tile(n_pad)
    weights = (p["W1"], p["b1"], p["g1"], p["bt1"],
               p["W2"], p["b2"], p["g2"], p["bt2"])
    w_specs = [pl.BlockSpec(w.shape, lambda i: (0, 0)) for w in weights]
    return pl.pallas_call(
        functools.partial(_input_fields_kernel, h_real=h_real),
        out_shape=jax.ShapeDtypeStruct((n_pad, _LANE), jnp.bfloat16),
        grid=(n_pad // tm,),
        in_specs=[pl.BlockSpec((tm, _LANE), lambda i: (i, 0))] + w_specs,
        out_specs=pl.BlockSpec((tm, _LANE), lambda i: (i, 0)),
        compiler_params=pltpu.CompilerParams(
            dimension_semantics=("parallel",),
            vmem_limit_bytes=_VMEM_LIMIT,
        ),
    )(x_pad, *weights)


# ---------------------------------------------------------------------------
# Graph glue (built once per forward, not per conv)
# ---------------------------------------------------------------------------
def dense_adjacency(edge_index, num_nodes):
    src, dst = edge_index[0], edge_index[1]
    a = jnp.zeros((num_nodes, num_nodes), jnp.float32)
    return a.at[dst, src].add(1.0)         # scatter-add: duplicates accumulate


def gcn_norm_dense(adj, *, improved=False):
    n = adj.shape[0]
    fill = 2.0 if improved else 1.0
    a = adj + fill * jnp.eye(n, dtype=jnp.float32)
    deg = jnp.sum(a, axis=1)
    d_inv_sqrt = jnp.where(deg > 0.0, jax.lax.rsqrt(deg), 0.0)
    return a * d_inv_sqrt[:, None] * d_inv_sqrt[None, :]


def augment_adj_dense(adj):
    n = adj.shape[0]
    eye = jnp.eye(n, dtype=adj.dtype)
    a = adj * (1.0 - eye) + eye
    a2 = a @ a                              # graph-structure glue (A+I)^2
    return a2 * (1.0 - eye)


def topk_pool_dense(x, adj_aug, w_pool, k):
    score = jnp.tanh(x @ w_pool / jnp.linalg.norm(w_pool))
    top_vals, perm = jax.lax.top_k(score, k)
    x_p = x[perm] * top_vals[:, None]
    adj_p = adj_aug[perm][:, perm]
    return x_p, adj_p, perm


# ---------------------------------------------------------------------------
# parameter init (glorot weights / zero biases, channels pre-padded to 128)
# ---------------------------------------------------------------------------
def _glorot(key, shape):
    s = jnp.sqrt(6.0 / (shape[0] + shape[1]))
    return jax.random.uniform(key, shape, jnp.float32, -s, s)


def init_gcn_layer(key, c_in, c_out):
    assert c_in <= _LANE and c_out <= _LANE
    return {"W": _pad2d(_glorot(key, (c_in, c_out)), _LANE, _LANE, jnp.bfloat16),
            "b": jnp.zeros((1, _LANE), jnp.float32)}


def init_gcn_block(key, c_in, c_out, n_layers=3):
    keys = jax.random.split(key, n_layers)
    layers = [init_gcn_layer(keys[0], c_in, c_out)]
    for i in range(1, n_layers):
        layers.append(init_gcn_layer(keys[i], c_out, c_out))
    return layers


def init_solver(key, c_in, c_hidden, c_out):
    k1, k2, k3, k4 = jax.random.split(key, 4)
    return {"block1": init_gcn_block(k1, c_in, c_hidden, 3),
            "block2": init_gcn_block(k2, c_hidden, c_hidden, 3),
            "block3": init_gcn_block(k3, c_hidden, c_hidden, 3),
            "head": init_gcn_layer(k4, c_hidden, c_out)}


def init_input_fields(key, c_in, c_hidden):
    k1, k2 = jax.random.split(key)
    ones_pad = _pad2d(jnp.ones((1, c_hidden), jnp.float32), 1, _LANE, jnp.float32)
    return {"W1": _pad2d(_glorot(k1, (c_in, c_hidden)), _LANE, _LANE, jnp.bfloat16),
            "b1": jnp.zeros((1, _LANE), jnp.float32),
            "g1": ones_pad, "bt1": jnp.zeros((1, _LANE), jnp.float32),
            "W2": _pad2d(_glorot(k2, (c_hidden, c_hidden)), _LANE, _LANE, jnp.bfloat16),
            "b2": jnp.zeros((1, _LANE), jnp.float32),
            "g2": ones_pad, "bt2": jnp.zeros((1, _LANE), jnp.float32)}


def init_graph_unet(key, c_in, c_hidden, c_out, depth=3):
    keys = jax.random.split(key, 3 * depth + 1)
    ki = iter(range(3 * depth + 1))
    down = [init_gcn_layer(keys[next(ki)], c_in, c_hidden)]
    for _ in range(depth):
        down.append(init_gcn_layer(keys[next(ki)], c_hidden, c_hidden))
    pools = []
    for _ in range(depth):
        bound = 1.0 / math.sqrt(c_hidden)
        pools.append(jax.random.uniform(keys[next(ki)], (c_hidden,),
                                        jnp.float32, -bound, bound))
    up = []
    for _ in range(depth - 1):
        up.append(init_gcn_layer(keys[next(ki)], c_hidden, c_hidden))
    up.append(init_gcn_layer(keys[next(ki)], c_hidden, c_out))
    return {"down": down, "pool": pools, "up": up}


def init_parc_params(key, cfg):
    k1, k2, k3, k4 = jax.random.split(key, 4)
    h = cfg["n_hiddenfields"]
    return {
        "input_fields": init_input_fields(k1, cfg["n_fields"] + cfg["n_bcfields"], h),
        "derivative_solver": init_solver(k2, 2 * h, h, cfg["n_fields"]),
        "integral_solver": init_solver(k3, cfg["n_fields"], h, cfg["n_fields"]),
        "shape_descriptor": init_graph_unet(k4, cfg["n_meshfields"], h, h),
    }


# ---------------------------------------------------------------------------
# forward passes (composition is glue; every conv / MLP runs in Pallas)
# ---------------------------------------------------------------------------
def gcn_block_forward(a_hat, x, layers, *, sum_res, post_relu):
    x_temp = gcn_conv(a_hat, x, layers[0]["W"], layers[0]["b"])
    x = x_temp
    last = len(layers) - 1
    for li in range(1, len(layers)):
        is_last = li == last
        x = gcn_conv(a_hat, x, layers[li]["W"], layers[li]["b"],
                     apply_relu=True,
                     residual=x_temp if (sum_res and is_last) else None,
                     post_relu=post_relu and is_last)
    return x


def solver_forward(p, a_hat, x_pad, *, mask=None):
    h = gcn_block_forward(a_hat, x_pad, p["block1"], sum_res=True, post_relu=True)
    h = gcn_block_forward(a_hat, h, p["block2"], sum_res=True, post_relu=True)
    h = gcn_block_forward(a_hat, h, p["block3"], sum_res=False, post_relu=True)
    return gcn_conv(a_hat, h, p["head"]["W"], p["head"]["b"],
                    mask=mask, out_dtype=jnp.float32)


def graph_unet_forward(p, x, adj, *, c_hidden, depth=3, ratio=0.2):
    def run_conv(adj_mat, feat, layer, act):
        n_lvl = feat.shape[0]
        n_pad = _round_up(n_lvl, _LANE)
        a_hat = _pad2d(gcn_norm_dense(adj_mat, improved=True),
                       n_pad, n_pad, jnp.bfloat16)
        xp = _pad2d(feat, n_pad, _LANE, jnp.bfloat16)
        h = gcn_conv(a_hat, xp, layer["W"], layer["b"],
                     apply_relu=act, out_dtype=jnp.float32)
        return h[:n_lvl, :c_hidden]

    x_cur = run_conv(adj, x, p["down"][0], True)
    xs, adjs, perms = [x_cur], [adj], []
    adj_cur = adj
    for i in range(1, depth + 1):
        adj_aug = augment_adj_dense(adj_cur)
        k = int(math.ceil(ratio * x_cur.shape[0]))
        x_cur, adj_cur, perm = topk_pool_dense(x_cur, adj_aug, p["pool"][i - 1], k)
        x_cur = run_conv(adj_cur, x_cur, p["down"][i], True)
        if i < depth:
            xs.append(x_cur)
            adjs.append(adj_cur)
        perms.append(perm)
    for i in range(depth):
        j = depth - 1 - i
        res, adj_j, perm = xs[j], adjs[j], perms[j]
        up = jnp.zeros_like(res).at[perm].set(x_cur)
        x_cur = run_conv(adj_j, res + up, p["up"][i], i < depth - 1)
    return x_cur


def make_parc_forward(cfg):
    n_fields = cfg["n_fields"]
    n_ts = cfg["n_timesteps"]
    h = cfg["n_hiddenfields"]
    n_bc = cfg["n_bcfields"]

    def forward(params, f_initial, mesh_features, edge_index, f_bc, dropout_key):
        n = f_initial.shape[0]
        n_pad = _round_up(n, _LANE)
        adj = dense_adjacency(edge_index, n)
        a_hat = _pad2d(gcn_norm_dense(adj, improved=False),
                       n_pad, n_pad, jnp.bfloat16)

        feature_map = graph_unet_forward(params["shape_descriptor"],
                                         mesh_features, adj, c_hidden=h)

        f_current = f_initial
        fs, f_dots = [], []
        for t in range(n_ts):
            if n_bc > 0:
                f_temp = jnp.concatenate([f_current, f_bc[:, t + 1:t + 2]], axis=1)
            else:
                f_temp = f_current
            hid = input_fields_forward(params["input_fields"], f_temp, h)
            hid = hid[:n, :h].astype(jnp.float32)
            f_temp = jnp.concatenate([feature_map, hid], axis=-1)
            x_pad = _pad2d(f_temp, n_pad, _LANE, jnp.bfloat16)

            # F.dropout(p=0.2, training=True): fresh mask per timestep, fused
            # into the F_dot conv input inside the Pallas kernel.
            keep = jax.random.bernoulli(jax.random.fold_in(dropout_key, t),
                                        0.8, (n_pad, _LANE))
            mask = (keep.astype(jnp.float32) * (1.0 / 0.8)).astype(jnp.bfloat16)

            f_dot = solver_forward(params["derivative_solver"], a_hat, x_pad,
                                   mask=mask)[:n, :n_fields]
            f_int = solver_forward(params["integral_solver"], a_hat,
                                   _pad2d(f_dot, n_pad, _LANE, jnp.bfloat16)
                                   )[:n, :n_fields]
            f_current = f_current + f_int
            f_dots.append(f_dot[:, None, :])
            fs.append(f_current[:, None, :])
        return jnp.concatenate(fs, axis=1), jnp.concatenate(f_dots, axis=1)

    return forward


# ---------------------------------------------------------------------------
if __name__ == "__main__":
    cfg = dict(n_fields=4, n_timesteps=2, n_hiddenfields=32,
               n_meshfields=3, n_bcfields=1)

    key = jax.random.PRNGKey(0)
    k_param, k_f, k_mesh, k_bc, k_drop = jax.random.split(key, 5)

    num_nodes = 16
    f_initial = jax.random.normal(k_f, (num_nodes, cfg["n_fields"]), jnp.float32)
    mesh_features = jax.random.normal(k_mesh, (num_nodes, cfg["n_meshfields"]),
                                      jnp.float32)
    f_bc = jax.random.normal(k_bc, (num_nodes, cfg["n_timesteps"] + 1),
                             jnp.float32)

    # bidirectional ring graph, edge_index [2, E]
    idx = jnp.arange(num_nodes)
    src = jnp.concatenate([idx, (idx + 1) % num_nodes])
    dst = jnp.concatenate([(idx + 1) % num_nodes, idx])
    edge_index = jnp.stack([src, dst]).astype(jnp.int32)

    params = init_parc_params(k_param, cfg)
    forward = jax.jit(make_parc_forward(cfg))

    fs, f_dots = forward(params, f_initial, mesh_features, edge_index, f_bc, k_drop)
    fs, f_dots = jax.block_until_ready((fs, f_dots))

    assert fs.shape == (num_nodes, cfg["n_timesteps"], cfg["n_fields"])
    assert f_dots.shape == (num_nodes, cfg["n_timesteps"], cfg["n_fields"])
    assert bool(jnp.all(jnp.isfinite(fs))) and bool(jnp.all(jnp.isfinite(f_dots)))
    print("KERNEL_OK")
</pallas_src>

<mosaic_0001>
module attributes {stable_mosaic.version = 11 : i64} {
  func.func private @main(%arg0: i32) attributes {dimension_semantics = [#tpu.dimension_semantics<core_parallel>], iteration_bounds = array<i64: 2>, tpu.core_type = #tpu.core_type<sc_scalar_subcore>, window_params = []} {
    return
  }
}

module attributes {stable_mosaic.version = 11 : i64} {
  func.func private @main(%arg0: i32) attributes {dimension_semantics = [#tpu.dimension_semantics<core_parallel>], iteration_bounds = array<i64: 2>, tpu.core_type = #tpu.core_type<sc_scalar_subcore>, window_params = []} {
    return
  }
}

module attributes {stable_mosaic.version = 11 : i64} {
  func.func @_input_fields_kernel(%arg0: i32, %arg1: memref<128x128xbf16, #tpu.memory_space<vmem>>, %arg2: memref<128x128xbf16, #tpu.memory_space<vmem>>, %arg3: memref<1x128xf32, #tpu.memory_space<vmem>>, %arg4: memref<1x128xf32, #tpu.memory_space<vmem>>, %arg5: memref<1x128xf32, #tpu.memory_space<vmem>>, %arg6: memref<128x128xbf16, #tpu.memory_space<vmem>>, %arg7: memref<1x128xf32, #tpu.memory_space<vmem>>, %arg8: memref<1x128xf32, #tpu.memory_space<vmem>>, %arg9: memref<1x128xf32, #tpu.memory_space<vmem>>, %arg10: memref<128x128xbf16, #tpu.memory_space<vmem>>) attributes {dimension_semantics = [#tpu.dimension_semantics<parallel>], iteration_bounds = array<i64: 1>, scalar_prefetch = 0 : i64, scratch_operands = 0 : i64, tpu.core_type = #tpu.core_type<tc>, window_params = [{transform_indices = @transform_0, window_bounds = array<i64: 128, 128>}, {pipeline_mode = #tpu.pipeline_mode<synchronous>, transform_indices = @transform_1, window_bounds = array<i64: 128, 128>}, {pipeline_mode = #tpu.pipeline_mode<synchronous>, transform_indices = @transform_2, window_bounds = array<i64: 1, 128>}, {pipeline_mode = #tpu.pipeline_mode<synchronous>, transform_indices = @transform_3, window_bounds = array<i64: 1, 128>}, {pipeline_mode = #tpu.pipeline_mode<synchronous>, transform_indices = @transform_4, window_bounds = array<i64: 1, 128>}, {pipeline_mode = #tpu.pipeline_mode<synchronous>, transform_indices = @transform_5, window_bounds = array<i64: 128, 128>}, {pipeline_mode = #tpu.pipeline_mode<synchronous>, transform_indices = @transform_6, window_bounds = array<i64: 1, 128>}, {pipeline_mode = #tpu.pipeline_mode<synchronous>, transform_indices = @transform_7, window_bounds = array<i64: 1, 128>}, {pipeline_mode = #tpu.pipeline_mode<synchronous>, transform_indices = @transform_8, window_bounds = array<i64: 1, 128>}, {transform_indices = @transform_9, window_bounds = array<i64: 128, 128>}]} {
    %c0 = arith.constant 0 : index
    %c0_0 = arith.constant 0 : index
    %0 = vector.load %arg1[%c0, %c0_0] : memref<128x128xbf16, #tpu.memory_space<vmem>>, vector<128x128xbf16>
    %c0_1 = arith.constant 0 : index
    %c0_2 = arith.constant 0 : index
    %1 = vector.load %arg2[%c0_1, %c0_2] : memref<128x128xbf16, #tpu.memory_space<vmem>>, vector<128x128xbf16>
    %cst = arith.constant dense<0.000000e+00> : vector<128x128xf32>
    %2 = tpu.matmul %0, %1, %cst {dimension_numbers = #tpu.dot_dimension_numbers<[1], [0], [0], [1], [0, 0, 1, 1], [], []>} : vector<128x128xbf16>, vector<128x128xbf16>, vector<128x128xf32> -> vector<128x128xf32>
    %c0_3 = arith.constant 0 : index
    %c0_4 = arith.constant 0 : index
    %3 = vector.load %arg3[%c0_3, %c0_4] : memref<1x128xf32, #tpu.memory_space<vmem>>, vector<1x128xf32>
    %4 = vector.broadcast %3 : vector<1x128xf32> to vector<128x128xf32>
    %5 = arith.addf %2, %4 : vector<128x128xf32>
    %c0_5 = arith.constant 0 : index
    %c0_6 = arith.constant 0 : index
    %6 = vector.load %arg4[%c0_5, %c0_6] : memref<1x128xf32, #tpu.memory_space<vmem>>, vector<1x128xf32>
    %c0_7 = arith.constant 0 : index
    %c0_8 = arith.constant 0 : index
    %7 = vector.load %arg5[%c0_7, %c0_8] : memref<1x128xf32, #tpu.memory_space<vmem>>, vector<1x128xf32>
    %8 = tpu.iota {dimensions = array<i32: 1>} : vector<1x128xi32>
    %c32_i32 = arith.constant 32 : i32
    %9 = vector.broadcast %c32_i32 : i32 to vector<1x128xi32>
    %10 = arith.cmpi slt, %8, %9 : vector<1x128xi32>
    %cst_9 = arith.constant dense<0.000000e+00> : vector<128xf32>
    %11 = vector.multi_reduction <add>, %5, %cst_9 [1] : vector<128x128xf32> to vector<128xf32>
    %12 = vector.shape_cast %11 : vector<128xf32> to vector<128x1xf32>
    %cst_10 = arith.constant 3.125000e-02 : f32
    %13 = vector.broadcast %cst_10 : f32 to vector<128x1xf32>
    %14 = arith.mulf %12, %13 : vector<128x1xf32>
    %15 = vector.broadcast %14 : vector<128x1xf32> to vector<128x128xf32>
    %16 = arith.subf %5, %15 : vector<128x128xf32>
    %cst_11 = arith.constant 0.000000e+00 : f32
    %17 = vector.shape_cast %10 : vector<1x128xi1> to vector<1x128xi1>
    %18 = vector.broadcast %17 : vector<1x128xi1> to vector<128x128xi1>
    %19 = vector.broadcast %cst_11 : f32 to vector<128x128xf32>
    %20 = arith.select %18, %16, %19 : vector<128x128xi1>, vector<128x128xf32>
    %21 = arith.mulf %20, %20 : vector<128x128xf32>
    %cst_12 = arith.constant dense<0.000000e+00> : vector<128xf32>
    %22 = vector.multi_reduction <add>, %21, %cst_12 [1] : vector<128x128xf32> to vector<128xf32>
    %23 = vector.shape_cast %22 : vector<128xf32> to vector<128x1xf32>
    %cst_13 = arith.constant 3.125000e-02 : f32
    %24 = vector.broadcast %cst_13 : f32 to vector<128x1xf32>
    %25 = arith.mulf %23, %24 : vector<128x1xf32>
    %cst_14 = arith.constant 9.99999974E-6 : f32
    %26 = vector.broadcast %cst_14 : f32 to vector<128x1xf32>
    %27 = arith.addf %25, %26 : vector<128x1xf32>
    %28 = math.rsqrt %27 : vector<128x1xf32>
    %29 = vector.broadcast %28 : vector<128x1xf32> to vector<128x128xf32>
    %30 = arith.mulf %20, %29 : vector<128x128xf32>
    %31 = vector.broadcast %6 : vector<1x128xf32> to vector<128x128xf32>
    %32 = arith.mulf %30, %31 : vector<128x128xf32>
    %33 = vector.broadcast %7 : vector<1x128xf32> to vector<128x128xf32>
    %34 = arith.addf %32, %33 : vector<128x128xf32>
    %cst_15 = arith.constant 0.000000e+00 : f32
    %35 = vector.broadcast %cst_15 : f32 to vector<128x128xf32>
    %36 = arith.maximumf %34, %35 : vector<128x128xf32>
    %37 = arith.truncf %36 : vector<128x128xf32> to vector<128x128xbf16>
    %c0_16 = arith.constant 0 : index
    %c0_17 = arith.constant 0 : index
    %38 = vector.load %arg6[%c0_16, %c0_17] : memref<128x128xbf16, #tpu.memory_space<vmem>>, vector<128x128xbf16>
    %cst_18 = arith.constant dense<0.000000e+00> : vector<128x128xf32>
    %39 = tpu.matmul %37, %38, %cst_18 {dimension_numbers = #tpu.dot_dimension_numbers<[1], [0], [0], [1], [0, 0, 1, 1], [], []>} : vector<128x128xbf16>, vector<128x128xbf16>, vector<128x128xf32> -> vector<128x128xf32>
    %c0_19 = arith.constant 0 : index
    %c0_20 = arith.constant 0 : index
    %40 = vector.load %arg7[%c0_19, %c0_20] : memref<1x128xf32, #tpu.memory_space<vmem>>, vector<1x128xf32>
    %41 = vector.broadcast %40 : vector<1x128xf32> to vector<128x128xf32>
    %42 = arith.addf %39, %41 : vector<128x128xf32>
    %c0_21 = arith.constant 0 : index
    %c0_22 = arith.constant 0 : index
    %43 = vector.load %arg8[%c0_21, %c0_22] : memref<1x128xf32, #tpu.memory_space<vmem>>, vector<1x128xf32>
    %c0_23 = arith.constant 0 : index
    %c0_24 = arith.constant 0 : index
    %44 = vector.load %arg9[%c0_23, %c0_24] : memref<1x128xf32, #tpu.memory_space<vmem>>, vector<1x128xf32>
    %45 = tpu.iota {dimensions = array<i32: 1>} : vector<1x128xi32>
    %c32_i32_25 = arith.constant 32 : i32
    %46 = vector.broadcast %c32_i32_25 : i32 to vector<1x128xi32>
    %47 = arith.cmpi slt, %45, %46 : vector<1x128xi32>
    %cst_26 = arith.constant dense<0.000000e+00> : vector<128xf32>
    %48 = vector.multi_reduction <add>, %42, %cst_26 [1] : vector<128x128xf32> to vector<128xf32>
    %49 = vector.shape_cast %48 : vector<128xf32> to vector<128x1xf32>
    %cst_27 = arith.constant 3.125000e-02 : f32
    %50 = vector.broadcast %cst_27 : f32 to vector<128x1xf32>
    %51 = arith.mulf %49, %50 : vector<128x1xf32>
    %52 = vector.broadcast %51 : vector<128x1xf32> to vector<128x128xf32>
    %53 = arith.subf %42, %52 : vector<128x128xf32>
    %cst_28 = arith.constant 0.000000e+00 : f32
    %54 = vector.shape_cast %47 : vector<1x128xi1> to vector<1x128xi1>
    %55 = vector.broadcast %54 : vector<1x128xi1> to vector<128x128xi1>
    %56 = vector.broadcast %cst_28 : f32 to vector<128x128xf32>
    %57 = arith.select %55, %53, %56 : vector<128x128xi1>, vector<128x128xf32>
    %58 = arith.mulf %57, %57 : vector<128x128xf32>
    %cst_29 = arith.constant dense<0.000000e+00> : vector<128xf32>
    %59 = vector.multi_reduction <add>, %58, %cst_29 [1] : vector<128x128xf32> to vector<128xf32>
    %60 = vector.shape_cast %59 : vector<128xf32> to vector<128x1xf32>
    %cst_30 = arith.constant 3.125000e-02 : f32
    %61 = vector.broadcast %cst_30 : f32 to vector<128x1xf32>
    %62 = arith.mulf %60, %61 : vector<128x1xf32>
    %cst_31 = arith.constant 9.99999974E-6 : f32
    %63 = vector.broadcast %cst_31 : f32 to vector<128x1xf32>
    %64 = arith.addf %62, %63 : vector<128x1xf32>
    %65 = math.rsqrt %64 : vector<128x1xf32>
    %66 = vector.broadcast %65 : vector<128x1xf32> to vector<128x128xf32>
    %67 = arith.mulf %57, %66 : vector<128x128xf32>
    %68 = vector.broadcast %43 : vector<1x128xf32> to vector<128x128xf32>
    %69 = arith.mulf %67, %68 : vector<128x128xf32>
    %70 = vector.broadcast %44 : vector<1x128xf32> to vector<128x128xf32>
    %71 = arith.addf %69, %70 : vector<128x128xf32>
    %cst_32 = arith.constant 0.000000e+00 : f32
    %72 = vector.broadcast %cst_32 : f32 to vector<128x128xf32>
    %73 = arith.maximumf %71, %72 : vector<128x128xf32>
    %74 = arith.truncf %73 : vector<128x128xf32> to vector<128x128xbf16>
    %c0_33 = arith.constant 0 : index
    %c0_34 = arith.constant 0 : index
    %75 = vector.load %arg10[%c0_33, %c0_34] : memref<128x128xbf16, #tpu.memory_space<vmem>>, vector<128x128xbf16>
    tpu.vector_store %arg10[%c0_33, %c0_34], %74 {strides = array<i32>} : memref<128x128xbf16, #tpu.memory_space<vmem>>, vector<128x128xbf16>,
    return
  }
  func.func @transform_0(%arg0: i32) -> (i32, i32) {
    %c0_i32 = arith.constant 0 : i32
    %c0_i32_0 = arith.constant 0 : i32
    return %arg0, %c0_i32 : i32, i32
  }
  func.func @transform_1(%arg0: i32) -> (i32, i32) {
    %c0_i32 = arith.constant 0 : i32
    %c0_i32_0 = arith.constant 0 : i32
    %c0_i32_1 = arith.constant 0 : i32
    return %c0_i32, %c0_i32_0 : i32, i32
  }
  func.func @transform_2(%arg0: i32) -> (i32, i32) {
    %c0_i32 = arith.constant 0 : i32
    %c0_i32_0 = arith.constant 0 : i32
    %c0_i32_1 = arith.constant 0 : i32
    return %c0_i32, %c0_i32_0 : i32, i32
  }
  func.func @transform_3(%arg0: i32) -> (i32, i32) {
    %c0_i32 = arith.constant 0 : i32
    %c0_i32_0 = arith.constant 0 : i32
    %c0_i32_1 = arith.constant 0 : i32
    return %c0_i32, %c0_i32_0 : i32, i32
  }
  func.func @transform_4(%arg0: i32) -> (i32, i32) {
    %c0_i32 = arith.constant 0 : i32
    %c0_i32_0 = arith.constant 0 : i32
    %c0_i32_1 = arith.constant 0 : i32
    return %c0_i32, %c0_i32_0 : i32, i32
  }
  func.func @transform_5(%arg0: i32) -> (i32, i32) {
    %c0_i32 = arith.constant 0 : i32
    %c0_i32_0 = arith.constant 0 : i32
    %c0_i32_1 = arith.constant 0 : i32
    return %c0_i32, %c0_i32_0 : i32, i32
  }
  func.func @transform_6(%arg0: i32) -> (i32, i32) {
    %c0_i32 = arith.constant 0 : i32
    %c0_i32_0 = arith.constant 0 : i32
    %c0_i32_1 = arith.constant 0 : i32
    return %c0_i32, %c0_i32_0 : i32, i32
  }
  func.func @transform_7(%arg0: i32) -> (i32, i32) {
    %c0_i32 = arith.constant 0 : i32
    %c0_i32_0 = arith.constant 0 : i32
    %c0_i32_1 = arith.constant 0 : i32
    return %c0_i32, %c0_i32_0 : i32, i32
  }
  func.func @transform_8(%arg0: i32) -> (i32, i32) {
    %c0_i32 = arith.constant 0 : i32
    %c0_i32_0 = arith.constant 0 : i32
    %c0_i32_1 = arith.constant 0 : i32
    return %c0_i32, %c0_i32_0 : i32, i32
  }
  func.func @transform_9(%arg0: i32) -> (i32, i32) {
    %c0_i32 = arith.constant 0 : i32
    %c0_i32_0 = arith.constant 0 : i32
    return %arg0, %c0_i32 : i32, i32
  }
}

module attributes {stable_mosaic.version = 11 : i64} {
  func.func @_gcn_conv_kernel(%arg0: i32, %arg1: i32, %arg2: memref<128x128xbf16, #tpu.memory_space<vmem>>, %arg3: memref<128x128xbf16, #tpu.memory_space<vmem>>, %arg4: memref<128x128xbf16, #tpu.memory_space<vmem>>, %arg5: memref<1x128xf32, #tpu.memory_space<vmem>>, %arg6: memref<128x128xf32, #tpu.memory_space<vmem>>, %arg7: memref<128x128xf32, #tpu.memory_space<vmem>>) attributes {dimension_semantics = [#tpu.dimension_semantics<parallel>, #tpu.dimension_semantics<arbitrary>], iteration_bounds = array<i64: 1, 1>, scalar_prefetch = 0 : i64, scratch_operands = 1 : i64, tpu.core_type = #tpu.core_type<tc>, window_params = [{transform_indices = @transform_0, window_bounds = array<i64: 128, 128>}, {transform_indices = @transform_1, window_bounds = array<i64: 128, 128>}, {pipeline_mode = #tpu.pipeline_mode<synchronous>, transform_indices = @transform_2, window_bounds = array<i64: 128, 128>}, {pipeline_mode = #tpu.pipeline_mode<synchronous>, transform_indices = @transform_3, window_bounds = array<i64: 1, 128>}, {transform_indices = @transform_4, window_bounds = array<i64: 128, 128>}]} {
    %c0_i32 = arith.constant 0 : i32
    %0 = arith.cmpi eq, %arg1, %c0_i32 : i32
    %1 = arith.extui %0 : i1 to i32
    %c0_i32_0 = arith.constant 0 : i32
    %2 = arith.cmpi ne, %1, %c0_i32_0 : i32
    scf.if %2 {
      %cst_13 = arith.constant 0.000000e+00 : f32
      %15 = vector.broadcast %cst_13 : f32 to vector<128x128xf32>
      %c0_14 = arith.constant 0 : index
      %c0_15 = arith.constant 0 : index
      %16 = vector.load %arg7[%c0_14, %c0_15] : memref<128x128xf32, #tpu.memory_space<vmem>>, vector<128x128xf32>
      tpu.vector_store %arg7[%c0_14, %c0_15], %15 {strides = array<i32>} : memref<128x128xf32, #tpu.memory_space<vmem>>, vector<128x128xf32>,
    } else {
    }
    %c0 = arith.constant 0 : index
    %c0_1 = arith.constant 0 : index
    %3 = vector.load %arg3[%c0, %c0_1] : memref<128x128xbf16, #tpu.memory_space<vmem>>, vector<128x128xbf16>
    %c0_2 = arith.constant 0 : index
    %c0_3 = arith.constant 0 : index
    %4 = vector.load %arg4[%c0_2, %c0_3] : memref<128x128xbf16, #tpu.memory_space<vmem>>, vector<128x128xbf16>
    %cst = arith.constant dense<0.000000e+00> : vector<128x128xf32>
    %5 = tpu.matmul %3, %4, %cst {dimension_numbers = #tpu.dot_dimension_numbers<[1], [0], [0], [1], [0, 0, 1, 1], [], []>} : vector<128x128xbf16>, vector<128x128xbf16>, vector<128x128xf32> -> vector<128x128xf32>
    %c0_4 = arith.constant 0 : index
    %c0_5 = arith.constant 0 : index
    %6 = vector.load %arg7[%c0_4, %c0_5] : memref<128x128xf32, #tpu.memory_space<vmem>>, vector<128x128xf32>
    %c0_6 = arith.constant 0 : index
    %c0_7 = arith.constant 0 : index
    %7 = vector.load %arg2[%c0_6, %c0_7] : memref<128x128xbf16, #tpu.memory_space<vmem>>, vector<128x128xbf16>
    %8 = arith.truncf %5 : vector<128x128xf32> to vector<128x128xbf16>
    %cst_8 = arith.constant dense<0.000000e+00> : vector<128x128xf32>
    %9 = tpu.matmul %7, %8, %cst_8 {dimension_numbers = #tpu.dot_dimension_numbers<[1], [0], [0], [1], [0, 0, 1, 1], [], []>} : vector<128x128xbf16>, vector<128x128xbf16>, vector<128x128xf32> -> vector<128x128xf32>
    %10 = arith.addf %6, %9 : vector<128x128xf32>
    %c0_9 = arith.constant 0 : index
    %c0_10 = arith.constant 0 : index
    %11 = vector.load %arg7[%c0_9, %c0_10] : memref<128x128xf32, #tpu.memory_space<vmem>>, vector<128x128xf32>
    tpu.vector_store %arg7[%c0_9, %c0_10], %10 {strides = array<i32>} : memref<128x128xf32, #tpu.memory_space<vmem>>, vector<128x128xf32>,
    %c0_i32_11 = arith.constant 0 : i32
    %12 = arith.cmpi eq, %arg1, %c0_i32_11 : i32
    %13 = arith.extui %12 : i1 to i32
    %c0_i32_12 = arith.constant 0 : i32
    %14 = arith.cmpi ne, %13, %c0_i32_12 : i32
    scf.if %14 {
      %c0_13 = arith.constant 0 : index
      %c0_14 = arith.constant 0 : index
      %15 = vector.load %arg7[%c0_13, %c0_14] : memref<128x128xf32, #tpu.memory_space<vmem>>, vector<128x128xf32>
      %c0_15 = arith.constant 0 : index
      %c0_16 = arith.constant 0 : index
      %16 = vector.load %arg5[%c0_15, %c0_16] : memref<1x128xf32, #tpu.memory_space<vmem>>, vector<1x128xf32>
      %17 = vector.broadcast %16 : vector<1x128xf32> to vector<128x128xf32>
      %18 = arith.addf %15, %17 : vector<128x128xf32>
      %cst_17 = arith.constant 0.000000e+00 : f32
      %19 = vector.broadcast %cst_17 : f32 to vector<128x128xf32>
      %20 = arith.maximumf %18, %19 : vector<128x128xf32>
      %c0_18 = arith.constant 0 : index
      %c0_19 = arith.constant 0 : index
      %21 = vector.load %arg6[%c0_18, %c0_19] : memref<128x128xf32, #tpu.memory_space<vmem>>, vector<128x128xf32>
      tpu.vector_store %arg6[%c0_18, %c0_19], %20 {strides = array<i32>} : memref<128x128xf32, #tpu.memory_space<vmem>>, vector<128x128xf32>,
    } else {
    }
    return
  }
  func.func @transform_0(%arg0: i32, %arg1: i32) -> (i32, i32) {
    %c0_i32 = arith.constant 0 : i32
    return %arg0, %arg1 : i32, i32
  }
  func.func @transform_1(%arg0: i32, %arg1: i32) -> (i32, i32) {
    %c0_i32 = arith.constant 0 : i32
    %c0_i32_0 = arith.constant 0 : i32
    return %arg1, %c0_i32 : i32, i32
  }
  func.func @transform_2(%arg0: i32, %arg1: i32) -> (i32, i32) {
    %c0_i32 = arith.constant 0 : i32
    %c0_i32_0 = arith.constant 0 : i32
    %c0_i32_1 = arith.constant 0 : i32
    return %c0_i32, %c0_i32_0 : i32, i32
  }
  func.func @transform_3(%arg0: i32, %arg1: i32) -> (i32, i32) {
    %c0_i32 = arith.constant 0 : i32
    %c0_i32_0 = arith.constant 0 : i32
    %c0_i32_1 = arith.constant 0 : i32
    return %c0_i32, %c0_i32_0 : i32, i32
  }
  func.func @transform_4(%arg0: i32, %arg1: i32) -> (i32, i32) {
    %c0_i32 = arith.constant 0 : i32
    %c0_i32_0 = arith.constant 0 : i32
    return %arg0, %c0_i32 : i32, i32
  }
}

module attributes {stable_mosaic.version = 11 : i64} {
  func.func @_gcn_conv_kernel(%arg0: i32, %arg1: i32, %arg2: memref<128x128xbf16, #tpu.memory_space<vmem>>, %arg3: memref<128x128xbf16, #tpu.memory_space<vmem>>, %arg4: memref<128x128xbf16, #tpu.memory_space<vmem>>, %arg5: memref<1x128xf32, #tpu.memory_space<vmem>>, %arg6: memref<128x128xbf16, #tpu.memory_space<vmem>>, %arg7: memref<128x128xf32, #tpu.memory_space<vmem>>) attributes {dimension_semantics = [#tpu.dimension_semantics<parallel>, #tpu.dimension_semantics<arbitrary>], iteration_bounds = array<i64: 1, 1>, scalar_prefetch = 0 : i64, scratch_operands = 1 : i64, tpu.core_type = #tpu.core_type<tc>, window_params = [{transform_indices = @transform_0, window_bounds = array<i64: 128, 128>}, {transform_indices = @transform_1, window_bounds = array<i64: 128, 128>}, {pipeline_mode = #tpu.pipeline_mode<synchronous>, transform_indices = @transform_2, window_bounds = array<i64: 128, 128>}, {pipeline_mode = #tpu.pipeline_mode<synchronous>, transform_indices = @transform_3, window_bounds = array<i64: 1, 128>}, {transform_indices = @transform_4, window_bounds = array<i64: 128, 128>}]} {
    %c0_i32 = arith.constant 0 : i32
    %0 = arith.cmpi eq, %arg1, %c0_i32 : i32
    %1 = arith.extui %0 : i1 to i32
    %c0_i32_0 = arith.constant 0 : i32
    %2 = arith.cmpi ne, %1, %c0_i32_0 : i32
    scf.if %2 {
      %cst_13 = arith.constant 0.000000e+00 : f32
      %15 = vector.broadcast %cst_13 : f32 to vector<128x128xf32>
      %c0_14 = arith.constant 0 : index
      %c0_15 = arith.constant 0 : index
      %16 = vector.load %arg7[%c0_14, %c0_15] : memref<128x128xf32, #tpu.memory_space<vmem>>, vector<128x128xf32>
      tpu.vector_store %arg7[%c0_14, %c0_15], %15 {strides = array<i32>} : memref<128x128xf32, #tpu.memory_space<vmem>>, vector<128x128xf32>,
    } else {
    }
    %c0 = arith.constant 0 : index
    %c0_1 = arith.constant 0 : index
    %3 = vector.load %arg3[%c0, %c0_1] : memref<128x128xbf16, #tpu.memory_space<vmem>>, vector<128x128xbf16>
    %c0_2 = arith.constant 0 : index
    %c0_3 = arith.constant 0 : index
    %4 = vector.load %arg4[%c0_2, %c0_3] : memref<128x128xbf16, #tpu.memory_space<vmem>>, vector<128x128xbf16>
    %cst = arith.constant dense<0.000000e+00> : vector<128x128xf32>
    %5 = tpu.matmul %3, %4, %cst {dimension_numbers = #tpu.dot_dimension_numbers<[1], [0], [0], [1], [0, 0, 1, 1], [], []>} : vector<128x128xbf16>, vector<128x128xbf16>, vector<128x128xf32> -> vector<128x128xf32>
    %c0_4 = arith.constant 0 : index
    %c0_5 = arith.constant 0 : index
    %6 = vector.load %arg7[%c0_4, %c0_5] : memref<128x128xf32, #tpu.memory_space<vmem>>, vector<128x128xf32>
    %c0_6 = arith.constant 0 : index
    %c0_7 = arith.constant 0 : index
    %7 = vector.load %arg2[%c0_6, %c0_7] : memref<128x128xbf16, #tpu.memory_space<vmem>>, vector<128x128xbf16>
    %8 = arith.truncf %5 : vector<128x128xf32> to vector<128x128xbf16>
    %cst_8 = arith.constant dense<0.000000e+00> : vector<128x128xf32>
    %9 = tpu.matmul %7, %8, %cst_8 {dimension_numbers = #tpu.dot_dimension_numbers<[1], [0], [0], [1], [0, 0, 1, 1], [], []>} : vector<128x128xbf16>, vector<128x128xbf16>, vector<128x128xf32> -> vector<128x128xf32>
    %10 = arith.addf %6, %9 : vector<128x128xf32>
    %c0_9 = arith.constant 0 : index
    %c0_10 = arith.constant 0 : index
    %11 = vector.load %arg7[%c0_9, %c0_10] : memref<128x128xf32, #tpu.memory_space<vmem>>, vector<128x128xf32>
    tpu.vector_store %arg7[%c0_9, %c0_10], %10 {strides = array<i32>} : memref<128x128xf32, #tpu.memory_space<vmem>>, vector<128x128xf32>,
    %c0_i32_11 = arith.constant 0 : i32
    %12 = arith.cmpi eq, %arg1, %c0_i32_11 : i32
    %13 = arith.extui %12 : i1 to i32
    %c0_i32_12 = arith.constant 0 : i32
    %14 = arith.cmpi ne, %13, %c0_i32_12 : i32
    scf.if %14 {
      %c0_13 = arith.constant 0 : index
      %c0_14 = arith.constant 0 : index
      %15 = vector.load %arg7[%c0_13, %c0_14] : memref<128x128xf32, #tpu.memory_space<vmem>>, vector<128x128xf32>
      %c0_15 = arith.constant 0 : index
      %c0_16 = arith.constant 0 : index
      %16 = vector.load %arg5[%c0_15, %c0_16] : memref<1x128xf32, #tpu.memory_space<vmem>>, vector<1x128xf32>
      %17 = vector.broadcast %16 : vector<1x128xf32> to vector<128x128xf32>
      %18 = arith.addf %15, %17 : vector<128x128xf32>
      %cst_17 = arith.constant 0.000000e+00 : f32
      %19 = vector.broadcast %cst_17 : f32 to vector<128x128xf32>
      %20 = arith.maximumf %18, %19 : vector<128x128xf32>
      %21 = arith.truncf %20 : vector<128x128xf32> to vector<128x128xbf16>
      %c0_18 = arith.constant 0 : index
      %c0_19 = arith.constant 0 : index
      %22 = vector.load %arg6[%c0_18, %c0_19] : memref<128x128xbf16, #tpu.memory_space<vmem>>, vector<128x128xbf16>
      tpu.vector_store %arg6[%c0_18, %c0_19], %21 {strides = array<i32>} : memref<128x128xbf16, #tpu.memory_space<vmem>>, vector<128x128xbf16>,
    } else {
    }
    return
  }
  func.func @transform_0(%arg0: i32, %arg1: i32) -> (i32, i32) {
    %c0_i32 = arith.constant 0 : i32
    return %arg0, %arg1 : i32, i32
  }
  func.func @transform_1(%arg0: i32, %arg1: i32) -> (i32, i32) {
    %c0_i32 = arith.constant 0 : i32
    %c0_i32_0 = arith.constant 0 : i32
    return %arg1, %c0_i32 : i32, i32
  }
  func.func @transform_2(%arg0: i32, %arg1: i32) -> (i32, i32) {
    %c0_i32 = arith.constant 0 : i32
    %c0_i32_0 = arith.constant 0 : i32
    %c0_i32_1 = arith.constant 0 : i32
    return %c0_i32, %c0_i32_0 : i32, i32
  }
  func.func @transform_3(%arg0: i32, %arg1: i32) -> (i32, i32) {
    %c0_i32 = arith.constant 0 : i32
    %c0_i32_0 = arith.constant 0 : i32
    %c0_i32_1 = arith.constant 0 : i32
    return %c0_i32, %c0_i32_0 : i32, i32
  }
  func.func @transform_4(%arg0: i32, %arg1: i32) -> (i32, i32) {
    %c0_i32 = arith.constant 0 : i32
    %c0_i32_0 = arith.constant 0 : i32
    return %arg0, %c0_i32 : i32, i32
  }
}

module attributes {stable_mosaic.version = 11 : i64} {
  func.func @_gcn_conv_kernel(%arg0: i32, %arg1: i32, %arg2: memref<128x128xbf16, #tpu.memory_space<vmem>>, %arg3: memref<128x128xbf16, #tpu.memory_space<vmem>>, %arg4: memref<128x128xbf16, #tpu.memory_space<vmem>>, %arg5: memref<1x128xf32, #tpu.memory_space<vmem>>, %arg6: memref<128x128xbf16, #tpu.memory_space<vmem>>, %arg7: memref<128x128xf32, #tpu.memory_space<vmem>>) attributes {dimension_semantics = [#tpu.dimension_semantics<parallel>, #tpu.dimension_semantics<arbitrary>], iteration_bounds = array<i64: 1, 1>, scalar_prefetch = 0 : i64, scratch_operands = 1 : i64, tpu.core_type = #tpu.core_type<tc>, window_params = [{transform_indices = @transform_0, window_bounds = array<i64: 128, 128>}, {transform_indices = @transform_1, window_bounds = array<i64: 128, 128>}, {pipeline_mode = #tpu.pipeline_mode<synchronous>, transform_indices = @transform_2, window_bounds = array<i64: 128, 128>}, {pipeline_mode = #tpu.pipeline_mode<synchronous>, transform_indices = @transform_3, window_bounds = array<i64: 1, 128>}, {transform_indices = @transform_4, window_bounds = array<i64: 128, 128>}]} {
    %c0_i32 = arith.constant 0 : i32
    %0 = arith.cmpi eq, %arg1, %c0_i32 : i32
    %1 = arith.extui %0 : i1 to i32
    %c0_i32_0 = arith.constant 0 : i32
    %2 = arith.cmpi ne, %1, %c0_i32_0 : i32
    scf.if %2 {
      %cst_13 = arith.constant 0.000000e+00 : f32
      %15 = vector.broadcast %cst_13 : f32 to vector<128x128xf32>
      %c0_14 = arith.constant 0 : index
      %c0_15 = arith.constant 0 : index
      %16 = vector.load %arg7[%c0_14, %c0_15] : memref<128x128xf32, #tpu.memory_space<vmem>>, vector<128x128xf32>
      tpu.vector_store %arg7[%c0_14, %c0_15], %15 {strides = array<i32>} : memref<128x128xf32, #tpu.memory_space<vmem>>, vector<128x128xf32>,
    } else {
    }
    %c0 = arith.constant 0 : index
    %c0_1 = arith.constant 0 : index
    %3 = vector.load %arg3[%c0, %c0_1] : memref<128x128xbf16, #tpu.memory_space<vmem>>, vector<128x128xbf16>
    %c0_2 = arith.constant 0 : index
    %c0_3 = arith.constant 0 : index
    %4 = vector.load %arg4[%c0_2, %c0_3] : memref<128x128xbf16, #tpu.memory_space<vmem>>, vector<128x128xbf16>
    %cst = arith.constant dense<0.000000e+00> : vector<128x128xf32>
    %5 = tpu.matmul %3, %4, %cst {dimension_numbers = #tpu.dot_dimension_numbers<[1], [0], [0], [1], [0, 0, 1, 1], [], []>} : vector<128x128xbf16>, vector<128x128xbf16>, vector<128x128xf32> -> vector<128x128xf32>
    %c0_4 = arith.constant 0 : index
    %c0_5 = arith.constant 0 : index
    %6 = vector.load %arg7[%c0_4, %c0_5] : memref<128x128xf32, #tpu.memory_space<vmem>>, vector<128x128xf32>
    %c0_6 = arith.constant 0 : index
    %c0_7 = arith.constant 0 : index
    %7 = vector.load %arg2[%c0_6, %c0_7] : memref<128x128xbf16, #tpu.memory_space<vmem>>, vector<128x128xbf16>
    %8 = arith.truncf %5 : vector<128x128xf32> to vector<128x128xbf16>
    %cst_8 = arith.constant dense<0.000000e+00> : vector<128x128xf32>
    %9 = tpu.matmul %7, %8, %cst_8 {dimension_numbers = #tpu.dot_dimension_numbers<[1], [0], [0], [1], [0, 0, 1, 1], [], []>} : vector<128x128xbf16>, vector<128x128xbf16>, vector<128x128xf32> -> vector<128x128xf32>
    %10 = arith.addf %6, %9 : vector<128x128xf32>
    %c0_9 = arith.constant 0 : index
    %c0_10 = arith.constant 0 : index
    %11 = vector.load %arg7[%c0_9, %c0_10] : memref<128x128xf32, #tpu.memory_space<vmem>>, vector<128x128xf32>
    tpu.vector_store %arg7[%c0_9, %c0_10], %10 {strides = array<i32>} : memref<128x128xf32, #tpu.memory_space<vmem>>, vector<128x128xf32>,
    %c0_i32_11 = arith.constant 0 : i32
    %12 = arith.cmpi eq, %arg1, %c0_i32_11 : i32
    %13 = arith.extui %12 : i1 to i32
    %c0_i32_12 = arith.constant 0 : i32
    %14 = arith.cmpi ne, %13, %c0_i32_12 : i32
    scf.if %14 {
      %c0_13 = arith.constant 0 : index
      %c0_14 = arith.constant 0 : index
      %15 = vector.load %arg7[%c0_13, %c0_14] : memref<128x128xf32, #tpu.memory_space<vmem>>, vector<128x128xf32>
      %c0_15 = arith.constant 0 : index
      %c0_16 = arith.constant 0 : index
      %16 = vector.load %arg5[%c0_15, %c0_16] : memref<1x128xf32, #tpu.memory_space<vmem>>, vector<1x128xf32>
      %17 = vector.broadcast %16 : vector<1x128xf32> to vector<128x128xf32>
      %18 = arith.addf %15, %17 : vector<128x128xf32>
      %19 = arith.truncf %18 : vector<128x128xf32> to vector<128x128xbf16>
      %c0_17 = arith.constant 0 : index
      %c0_18 = arith.constant 0 : index
      %20 = vector.load %arg6[%c0_17, %c0_18] : memref<128x128xbf16, #tpu.memory_space<vmem>>, vector<128x128xbf16>
      tpu.vector_store %arg6[%c0_17, %c0_18], %19 {strides = array<i32>} : memref<128x128xbf16, #tpu.memory_space<vmem>>, vector<128x128xbf16>,
    } else {
    }
    return
  }
  func.func @transform_0(%arg0: i32, %arg1: i32) -> (i32, i32) {
    %c0_i32 = arith.constant 0 : i32
    return %arg0, %arg1 : i32, i32
  }
  func.func @transform_1(%arg0: i32, %arg1: i32) -> (i32, i32) {
    %c0_i32 = arith.constant 0 : i32
    %c0_i32_0 = arith.constant 0 : i32
    return %arg1, %c0_i32 : i32, i32
  }
  func.func @transform_2(%arg0: i32, %arg1: i32) -> (i32, i32) {
    %c0_i32 = arith.constant 0 : i32
    %c0_i32_0 = arith.constant 0 : i32
    %c0_i32_1 = arith.constant 0 : i32
    return %c0_i32, %c0_i32_0 : i32, i32
  }
  func.func @transform_3(%arg0: i32, %arg1: i32) -> (i32, i32) {
    %c0_i32 = arith.constant 0 : i32
    %c0_i32_0 = arith.constant 0 : i32
    %c0_i32_1 = arith.constant 0 : i32
    return %c0_i32, %c0_i32_0 : i32, i32
  }
  func.func @transform_4(%arg0: i32, %arg1: i32) -> (i32, i32) {
    %c0_i32 = arith.constant 0 : i32
    %c0_i32_0 = arith.constant 0 : i32
    return %arg0, %c0_i32 : i32, i32
  }
}

module attributes {stable_mosaic.version = 11 : i64} {
  func.func @_gcn_conv_kernel(%arg0: i32, %arg1: i32, %arg2: memref<128x128xbf16, #tpu.memory_space<vmem>>, %arg3: memref<128x128xbf16, #tpu.memory_space<vmem>>, %arg4: memref<128x128xbf16, #tpu.memory_space<vmem>>, %arg5: memref<1x128xf32, #tpu.memory_space<vmem>>, %arg6: memref<128x128xbf16, #tpu.memory_space<vmem>>, %arg7: memref<128x128xbf16, #tpu.memory_space<vmem>>, %arg8: memref<128x128xf32, #tpu.memory_space<vmem>>) attributes {dimension_semantics = [#tpu.dimension_semantics<parallel>, #tpu.dimension_semantics<arbitrary>], iteration_bounds = array<i64: 1, 1>, scalar_prefetch = 0 : i64, scratch_operands = 1 : i64, tpu.core_type = #tpu.core_type<tc>, window_params = [{transform_indices = @transform_0, window_bounds = array<i64: 128, 128>}, {transform_indices = @transform_1, window_bounds = array<i64: 128, 128>}, {pipeline_mode = #tpu.pipeline_mode<synchronous>, transform_indices = @transform_2, window_bounds = array<i64: 128, 128>}, {pipeline_mode = #tpu.pipeline_mode<synchronous>, transform_indices = @transform_3, window_bounds = array<i64: 1, 128>}, {transform_indices = @transform_4, window_bounds = array<i64: 128, 128>}, {transform_indices = @transform_5, window_bounds = array<i64: 128, 128>}]} {
    %c0_i32 = arith.constant 0 : i32
    %0 = arith.cmpi eq, %arg1, %c0_i32 : i32
    %1 = arith.extui %0 : i1 to i32
    %c0_i32_0 = arith.constant 0 : i32
    %2 = arith.cmpi ne, %1, %c0_i32_0 : i32
    scf.if %2 {
      %cst_13 = arith.constant 0.000000e+00 : f32
      %15 = vector.broadcast %cst_13 : f32 to vector<128x128xf32>
      %c0_14 = arith.constant 0 : index
      %c0_15 = arith.constant 0 : index
      %16 = vector.load %arg8[%c0_14, %c0_15] : memref<128x128xf32, #tpu.memory_space<vmem>>, vector<128x128xf32>
      tpu.vector_store %arg8[%c0_14, %c0_15], %15 {strides = array<i32>} : memref<128x128xf32, #tpu.memory_space<vmem>>, vector<128x128xf32>,
    } else {
    }
    %c0 = arith.constant 0 : index
    %c0_1 = arith.constant 0 : index
    %3 = vector.load %arg3[%c0, %c0_1] : memref<128x128xbf16, #tpu.memory_space<vmem>>, vector<128x128xbf16>
    %c0_2 = arith.constant 0 : index
    %c0_3 = arith.constant 0 : index
    %4 = vector.load %arg4[%c0_2, %c0_3] : memref<128x128xbf16, #tpu.memory_space<vmem>>, vector<128x128xbf16>
    %cst = arith.constant dense<0.000000e+00> : vector<128x128xf32>
    %5 = tpu.matmul %3, %4, %cst {dimension_numbers = #tpu.dot_dimension_numbers<[1], [0], [0], [1], [0, 0, 1, 1], [], []>} : vector<128x128xbf16>, vector<128x128xbf16>, vector<128x128xf32> -> vector<128x128xf32>
    %c0_4 = arith.constant 0 : index
    %c0_5 = arith.constant 0 : index
    %6 = vector.load %arg8[%c0_4, %c0_5] : memref<128x128xf32, #tpu.memory_space<vmem>>, vector<128x128xf32>
    %c0_6 = arith.constant 0 : index
    %c0_7 = arith.constant 0 : index
    %7 = vector.load %arg2[%c0_6, %c0_7] : memref<128x128xbf16, #tpu.memory_space<vmem>>, vector<128x128xbf16>
    %8 = arith.truncf %5 : vector<128x128xf32> to vector<128x128xbf16>
    %cst_8 = arith.constant dense<0.000000e+00> : vector<128x128xf32>
    %9 = tpu.matmul %7, %8, %cst_8 {dimension_numbers = #tpu.dot_dimension_numbers<[1], [0], [0], [1], [0, 0, 1, 1], [], []>} : vector<128x128xbf16>, vector<128x128xbf16>, vector<128x128xf32> -> vector<128x128xf32>
    %10 = arith.addf %6, %9 : vector<128x128xf32>
    %c0_9 = arith.constant 0 : index
    %c0_10 = arith.constant 0 : index
    %11 = vector.load %arg8[%c0_9, %c0_10] : memref<128x128xf32, #tpu.memory_space<vmem>>, vector<128x128xf32>
    tpu.vector_store %arg8[%c0_9, %c0_10], %10 {strides = array<i32>} : memref<128x128xf32, #tpu.memory_space<vmem>>, vector<128x128xf32>,
    %c0_i32_11 = arith.constant 0 : i32
    %12 = arith.cmpi eq, %arg1, %c0_i32_11 : i32
    %13 = arith.extui %12 : i1 to i32
    %c0_i32_12 = arith.constant 0 : i32
    %14 = arith.cmpi ne, %13, %c0_i32_12 : i32
    scf.if %14 {
      %c0_13 = arith.constant 0 : index
      %c0_14 = arith.constant 0 : index
      %15 = vector.load %arg8[%c0_13, %c0_14] : memref<128x128xf32, #tpu.memory_space<vmem>>, vector<128x128xf32>
      %c0_15 = arith.constant 0 : index
      %c0_16 = arith.constant 0 : index
      %16 = vector.load %arg5[%c0_15, %c0_16] : memref<1x128xf32, #tpu.memory_space<vmem>>, vector<1x128xf32>
      %17 = vector.broadcast %16 : vector<1x128xf32> to vector<128x128xf32>
      %18 = arith.addf %15, %17 : vector<128x128xf32>
      %cst_17 = arith.constant 0.000000e+00 : f32
      %19 = vector.broadcast %cst_17 : f32 to vector<128x128xf32>
      %20 = arith.maximumf %18, %19 : vector<128x128xf32>
      %c0_18 = arith.constant 0 : index
      %c0_19 = arith.constant 0 : index
      %21 = vector.load %arg6[%c0_18, %c0_19] : memref<128x128xbf16, #tpu.memory_space<vmem>>, vector<128x128xbf16>
      %22 = arith.extf %21 : vector<128x128xbf16> to vector<128x128xf32>
      %23 = arith.addf %20, %22 : vector<128x128xf32>
      %cst_20 = arith.constant 0.000000e+00 : f32
      %24 = vector.broadcast %cst_20 : f32 to vector<128x128xf32>
      %25 = arith.maximumf %23, %24 : vector<128x128xf32>
      %26 = arith.truncf %25 : vector<128x128xf32> to vector<128x128xbf16>
      %c0_21 = arith.constant 0 : index
      %c0_22 = arith.constant 0 : index
      %27 = vector.load %arg7[%c0_21, %c0_22] : memref<128x128xbf16, #tpu.memory_space<vmem>>, vector<128x128xbf16>
      tpu.vector_store %arg7[%c0_21, %c0_22], %26 {strides = array<i32>} : memref<128x128xbf16, #tpu.memory_space<vmem>>, vector<128x128xbf16>,
    } else {
    }
    return
  }
  func.func @transform_0(%arg0: i32, %arg1: i32) -> (i32, i32) {
    %c0_i32 = arith.constant 0 : i32
    return %arg0, %arg1 : i32, i32
  }
  func.func @transform_1(%arg0: i32, %arg1: i32) -> (i32, i32) {
    %c0_i32 = arith.constant 0 : i32
    %c0_i32_0 = arith.constant 0 : i32
    return %arg1, %c0_i32 : i32, i32
  }
  func.func @transform_2(%arg0: i32, %arg1: i32) -> (i32, i32) {
    %c0_i32 = arith.constant 0 : i32
    %c0_i32_0 = arith.constant 0 : i32
    %c0_i32_1 = arith.constant 0 : i32
    return %c0_i32, %c0_i32_0 : i32, i32
  }
  func.func @transform_3(%arg0: i32, %arg1: i32) -> (i32, i32) {
    %c0_i32 = arith.constant 0 : i32
    %c0_i32_0 = arith.constant 0 : i32
    %c0_i32_1 = arith.constant 0 : i32
    return %c0_i32, %c0_i32_0 : i32, i32
  }
  func.func @transform_4(%arg0: i32, %arg1: i32) -> (i32, i32) {
    %c0_i32 = arith.constant 0 : i32
    %c0_i32_0 = arith.constant 0 : i32
    return %arg0, %c0_i32 : i32, i32
  }
  func.func @transform_5(%arg0: i32, %arg1: i32) -> (i32, i32) {
    %c0_i32 = arith.constant 0 : i32
    %c0_i32_0 = arith.constant 0 : i32
    return %arg0, %c0_i32 : i32, i32
  }
}

module attributes {stable_mosaic.version = 11 : i64} {
  func.func @_gcn_conv_kernel(%arg0: i32, %arg1: i32, %arg2: memref<128x128xbf16, #tpu.memory_space<vmem>>, %arg3: memref<128x128xbf16, #tpu.memory_space<vmem>>, %arg4: memref<128x128xbf16, #tpu.memory_space<vmem>>, %arg5: memref<1x128xf32, #tpu.memory_space<vmem>>, %arg6: memref<128x128xf32, #tpu.memory_space<vmem>>, %arg7: memref<128x128xf32, #tpu.memory_space<vmem>>) attributes {dimension_semantics = [#tpu.dimension_semantics<parallel>, #tpu.dimension_semantics<arbitrary>], iteration_bounds = array<i64: 1, 1>, scalar_prefetch = 0 : i64, scratch_operands = 1 : i64, tpu.core_type = #tpu.core_type<tc>, window_params = [{transform_indices = @transform_0, window_bounds = array<i64: 128, 128>}, {transform_indices = @transform_1, window_bounds = array<i64: 128, 128>}, {pipeline_mode = #tpu.pipeline_mode<synchronous>, transform_indices = @transform_2, window_bounds = array<i64: 128, 128>}, {pipeline_mode = #tpu.pipeline_mode<synchronous>, transform_indices = @transform_3, window_bounds = array<i64: 1, 128>}, {transform_indices = @transform_4, window_bounds = array<i64: 128, 128>}]} {
    %c0_i32 = arith.constant 0 : i32
    %0 = arith.cmpi eq, %arg1, %c0_i32 : i32
    %1 = arith.extui %0 : i1 to i32
    %c0_i32_0 = arith.constant 0 : i32
    %2 = arith.cmpi ne, %1, %c0_i32_0 : i32
    scf.if %2 {
      %cst_13 = arith.constant 0.000000e+00 : f32
      %15 = vector.broadcast %cst_13 : f32 to vector<128x128xf32>
      %c0_14 = arith.constant 0 : index
      %c0_15 = arith.constant 0 : index
      %16 = vector.load %arg7[%c0_14, %c0_15] : memref<128x128xf32, #tpu.memory_space<vmem>>, vector<128x128xf32>
      tpu.vector_store %arg7[%c0_14, %c0_15], %15 {strides = array<i32>} : memref<128x128xf32, #tpu.memory_space<vmem>>, vector<128x128xf32>,
    } else {
    }
    %c0 = arith.constant 0 : index
    %c0_1 = arith.constant 0 : index
    %3 = vector.load %arg3[%c0, %c0_1] : memref<128x128xbf16, #tpu.memory_space<vmem>>, vector<128x128xbf16>
    %c0_2 = arith.constant 0 : index
    %c0_3 = arith.constant 0 : index
    %4 = vector.load %arg4[%c0_2, %c0_3] : memref<128x128xbf16, #tpu.memory_space<vmem>>, vector<128x128xbf16>
    %cst = arith.constant dense<0.000000e+00> : vector<128x128xf32>
    %5 = tpu.matmul %3, %4, %cst {dimension_numbers = #tpu.dot_dimension_numbers<[1], [0], [0], [1], [0, 0, 1, 1], [], []>} : vector<128x128xbf16>, vector<128x128xbf16>, vector<128x128xf32> -> vector<128x128xf32>
    %c0_4 = arith.constant 0 : index
    %c0_5 = arith.constant 0 : index
    %6 = vector.load %arg7[%c0_4, %c0_5] : memref<128x128xf32, #tpu.memory_space<vmem>>, vector<128x128xf32>
    %c0_6 = arith.constant 0 : index
    %c0_7 = arith.constant 0 : index
    %7 = vector.load %arg2[%c0_6, %c0_7] : memref<128x128xbf16, #tpu.memory_space<vmem>>, vector<128x128xbf16>
    %8 = arith.truncf %5 : vector<128x128xf32> to vector<128x128xbf16>
    %cst_8 = arith.constant dense<0.000000e+00> : vector<128x128xf32>
    %9 = tpu.matmul %7, %8, %cst_8 {dimension_numbers = #tpu.dot_dimension_numbers<[1], [0], [0], [1], [0, 0, 1, 1], [], []>} : vector<128x128xbf16>, vector<128x128xbf16>, vector<128x128xf32> -> vector<128x128xf32>
    %10 = arith.addf %6, %9 : vector<128x128xf32>
    %c0_9 = arith.constant 0 : index
    %c0_10 = arith.constant 0 : index
    %11 = vector.load %arg7[%c0_9, %c0_10] : memref<128x128xf32, #tpu.memory_space<vmem>>, vector<128x128xf32>
    tpu.vector_store %arg7[%c0_9, %c0_10], %10 {strides = array<i32>} : memref<128x128xf32, #tpu.memory_space<vmem>>, vector<128x128xf32>,
    %c0_i32_11 = arith.constant 0 : i32
    %12 = arith.cmpi eq, %arg1, %c0_i32_11 : i32
    %13 = arith.extui %12 : i1 to i32
    %c0_i32_12 = arith.constant 0 : i32
    %14 = arith.cmpi ne, %13, %c0_i32_12 : i32
    scf.if %14 {
      %c0_13 = arith.constant 0 : index
      %c0_14 = arith.constant 0 : index
      %15 = vector.load %arg7[%c0_13, %c0_14] : memref<128x128xf32, #tpu.memory_space<vmem>>, vector<128x128xf32>
      %c0_15 = arith.constant 0 : index
      %c0_16 = arith.constant 0 : index
      %16 = vector.load %arg5[%c0_15, %c0_16] : memref<1x128xf32, #tpu.memory_space<vmem>>, vector<1x128xf32>
      %17 = vector.broadcast %16 : vector<1x128xf32> to vector<128x128xf32>
      %18 = arith.addf %15, %17 : vector<128x128xf32>
      %c0_17 = arith.constant 0 : index
      %c0_18 = arith.constant 0 : index
      %19 = vector.load %arg6[%c0_17, %c0_18] : memref<128x128xf32, #tpu.memory_space<vmem>>, vector<128x128xf32>
      tpu.vector_store %arg6[%c0_17, %c0_18], %18 {strides = array<i32>} : memref<128x128xf32, #tpu.memory_space<vmem>>, vector<128x128xf32>,
    } else {
    }
    return
  }
  func.func @transform_0(%arg0: i32, %arg1: i32) -> (i32, i32) {
    %c0_i32 = arith.constant 0 : i32
    return %arg0, %arg1 : i32, i32
  }
  func.func @transform_1(%arg0: i32, %arg1: i32) -> (i32, i32) {
    %c0_i32 = arith.constant 0 : i32
    %c0_i32_0 = arith.constant 0 : i32
    return %arg1, %c0_i32 : i32, i32
  }
  func.func @transform_2(%arg0: i32, %arg1: i32) -> (i32, i32) {
    %c0_i32 = arith.constant 0 : i32
    %c0_i32_0 = arith.constant 0 : i32
    %c0_i32_1 = arith.constant 0 : i32
    return %c0_i32, %c0_i32_0 : i32, i32
  }
  func.func @transform_3(%arg0: i32, %arg1: i32) -> (i32, i32) {
    %c0_i32 = arith.constant 0 : i32
    %c0_i32_0 = arith.constant 0 : i32
    %c0_i32_1 = arith.constant 0 : i32
    return %c0_i32, %c0_i32_0 : i32, i32
  }
  func.func @transform_4(%arg0: i32, %arg1: i32) -> (i32, i32) {
    %c0_i32 = arith.constant 0 : i32
    %c0_i32_0 = arith.constant 0 : i32
    return %arg0, %c0_i32 : i32, i32
  }
}

module attributes {stable_mosaic.version = 11 : i64} {
  func.func @_gcn_conv_kernel(%arg0: i32, %arg1: i32, %arg2: memref<128x128xbf16, #tpu.memory_space<vmem>>, %arg3: memref<128x128xbf16, #tpu.memory_space<vmem>>, %arg4: memref<128x128xbf16, #tpu.memory_space<vmem>>, %arg5: memref<1x128xf32, #tpu.memory_space<vmem>>, %arg6: memref<128x128xbf16, #tpu.memory_space<vmem>>, %arg7: memref<128x128xf32, #tpu.memory_space<vmem>>) attributes {dimension_semantics = [#tpu.dimension_semantics<parallel>, #tpu.dimension_semantics<arbitrary>], iteration_bounds = array<i64: 1, 1>, scalar_prefetch = 0 : i64, scratch_operands = 1 : i64, tpu.core_type = #tpu.core_type<tc>, window_params = [{transform_indices = @transform_0, window_bounds = array<i64: 128, 128>}, {transform_indices = @transform_1, window_bounds = array<i64: 128, 128>}, {pipeline_mode = #tpu.pipeline_mode<synchronous>, transform_indices = @transform_2, window_bounds = array<i64: 128, 128>}, {pipeline_mode = #tpu.pipeline_mode<synchronous>, transform_indices = @transform_3, window_bounds = array<i64: 1, 128>}, {transform_indices = @transform_4, window_bounds = array<i64: 128, 128>}]} {
    %c0_i32 = arith.constant 0 : i32
    %0 = arith.cmpi eq, %arg1, %c0_i32 : i32
    %1 = arith.extui %0 : i1 to i32
    %c0_i32_0 = arith.constant 0 : i32
    %2 = arith.cmpi ne, %1, %c0_i32_0 : i32
    scf.if %2 {
      %cst_13 = arith.constant 0.000000e+00 : f32
      %15 = vector.broadcast %cst_13 : f32 to vector<128x128xf32>
      %c0_14 = arith.constant 0 : index
      %c0_15 = arith.constant 0 : index
      %16 = vector.load %arg7[%c0_14, %c0_15] : memref<128x128xf32, #tpu.memory_space<vmem>>, vector<128x128xf32>
      tpu.vector_store %arg7[%c0_14, %c0_15], %15 {strides = array<i32>} : memref<128x128xf32, #tpu.memory_space<vmem>>, vector<128x128xf32>,
    } else {
    }
    %c0 = arith.constant 0 : index
    %c0_1 = arith.constant 0 : index
    %3 = vector.load %arg3[%c0, %c0_1] : memref<128x128xbf16, #tpu.memory_space<vmem>>, vector<128x128xbf16>
    %c0_2 = arith.constant 0 : index
    %c0_3 = arith.constant 0 : index
    %4 = vector.load %arg4[%c0_2, %c0_3] : memref<128x128xbf16, #tpu.memory_space<vmem>>, vector<128x128xbf16>
    %cst = arith.constant dense<0.000000e+00> : vector<128x128xf32>
    %5 = tpu.matmul %3, %4, %cst {dimension_numbers = #tpu.dot_dimension_numbers<[1], [0], [0], [1], [0, 0, 1, 1], [], []>} : vector<128x128xbf16>, vector<128x128xbf16>, vector<128x128xf32> -> vector<128x128xf32>
    %c0_4 = arith.constant 0 : index
    %c0_5 = arith.constant 0 : index
    %6 = vector.load %arg7[%c0_4, %c0_5] : memref<128x128xf32, #tpu.memory_space<vmem>>, vector<128x128xf32>
    %c0_6 = arith.constant 0 : index
    %c0_7 = arith.constant 0 : index
    %7 = vector.load %arg2[%c0_6, %c0_7] : memref<128x128xbf16, #tpu.memory_space<vmem>>, vector<128x128xbf16>
    %8 = arith.truncf %5 : vector<128x128xf32> to vector<128x128xbf16>
    %cst_8 = arith.constant dense<0.000000e+00> : vector<128x128xf32>
    %9 = tpu.matmul %7, %8, %cst_8 {dimension_numbers = #tpu.dot_dimension_numbers<[1], [0], [0], [1], [0, 0, 1, 1], [], []>} : vector<128x128xbf16>, vector<128x128xbf16>, vector<128x128xf32> -> vector<128x128xf32>
    %10 = arith.addf %6, %9 : vector<128x128xf32>
    %c0_9 = arith.constant 0 : index
    %c0_10 = arith.constant 0 : index
    %11 = vector.load %arg7[%c0_9, %c0_10] : memref<128x128xf32, #tpu.memory_space<vmem>>, vector<128x128xf32>
    tpu.vector_store %arg7[%c0_9, %c0_10], %10 {strides = array<i32>} : memref<128x128xf32, #tpu.memory_space<vmem>>, vector<128x128xf32>,
    %c0_i32_11 = arith.constant 0 : i32
    %12 = arith.cmpi eq, %arg1, %c0_i32_11 : i32
    %13 = arith.extui %12 : i1 to i32
    %c0_i32_12 = arith.constant 0 : i32
    %14 = arith.cmpi ne, %13, %c0_i32_12 : i32
    scf.if %14 {
      %c0_13 = arith.constant 0 : index
      %c0_14 = arith.constant 0 : index
      %15 = vector.load %arg7[%c0_13, %c0_14] : memref<128x128xf32, #tpu.memory_space<vmem>>, vector<128x128xf32>
      %c0_15 = arith.constant 0 : index
      %c0_16 = arith.constant 0 : index
      %16 = vector.load %arg5[%c0_15, %c0_16] : memref<1x128xf32, #tpu.memory_space<vmem>>, vector<1x128xf32>
      %17 = vector.broadcast %16 : vector<1x128xf32> to vector<128x128xf32>
      %18 = arith.addf %15, %17 : vector<128x128xf32>
      %cst_17 = arith.constant 0.000000e+00 : f32
      %19 = vector.broadcast %cst_17 : f32 to vector<128x128xf32>
      %20 = arith.maximumf %18, %19 : vector<128x128xf32>
      %cst_18 = arith.constant 0.000000e+00 : f32
      %21 = vector.broadcast %cst_18 : f32 to vector<128x128xf32>
      %22 = arith.maximumf %20, %21 : vector<128x128xf32>
      %23 = arith.truncf %22 : vector<128x128xf32> to vector<128x128xbf16>
      %c0_19 = arith.constant 0 : index
      %c0_20 = arith.constant 0 : index
      %24 = vector.load %arg6[%c0_19, %c0_20] : memref<128x128xbf16, #tpu.memory_space<vmem>>, vector<128x128xbf16>
      tpu.vector_store %arg6[%c0_19, %c0_20], %23 {strides = array<i32>} : memref<128x128xbf16, #tpu.memory_space<vmem>>, vector<128x128xbf16>,
    } else {
    }
    return
  }
  func.func @transform_0(%arg0: i32, %arg1: i32) -> (i32, i32) {
    %c0_i32 = arith.constant 0 : i32
    return %arg0, %arg1 : i32, i32
  }
  func.func @transform_1(%arg0: i32, %arg1: i32) -> (i32, i32) {
    %c0_i32 = arith.constant 0 : i32
    %c0_i32_0 = arith.constant 0 : i32
    return %arg1, %c0_i32 : i32, i32
  }
  func.func @transform_2(%arg0: i32, %arg1: i32) -> (i32, i32) {
    %c0_i32 = arith.constant 0 : i32
    %c0_i32_0 = arith.constant 0 : i32
    %c0_i32_1 = arith.constant 0 : i32
    return %c0_i32, %c0_i32_0 : i32, i32
  }
  func.func @transform_3(%arg0: i32, %arg1: i32) -> (i32, i32) {
    %c0_i32 = arith.constant 0 : i32
    %c0_i32_0 = arith.constant 0 : i32
    %c0_i32_1 = arith.constant 0 : i32
    return %c0_i32, %c0_i32_0 : i32, i32
  }
  func.func @transform_4(%arg0: i32, %arg1: i32) -> (i32, i32) {
    %c0_i32 = arith.constant 0 : i32
    %c0_i32_0 = arith.constant 0 : i32
    return %arg0, %c0_i32 : i32, i32
  }
}

module attributes {stable_mosaic.version = 11 : i64} {
  func.func @_gcn_conv_kernel(%arg0: i32, %arg1: i32, %arg2: memref<128x128xbf16, #tpu.memory_space<vmem>>, %arg3: memref<128x128xbf16, #tpu.memory_space<vmem>>, %arg4: memref<128x128xbf16, #tpu.memory_space<vmem>>, %arg5: memref<1x128xf32, #tpu.memory_space<vmem>>, %arg6: memref<128x128xbf16, #tpu.memory_space<vmem>>, %arg7: memref<128x128xf32, #tpu.memory_space<vmem>>, %arg8: memref<128x128xf32, #tpu.memory_space<vmem>>) attributes {dimension_semantics = [#tpu.dimension_semantics<parallel>, #tpu.dimension_semantics<arbitrary>], iteration_bounds = array<i64: 1, 1>, scalar_prefetch = 0 : i64, scratch_operands = 1 : i64, tpu.core_type = #tpu.core_type<tc>, window_params = [{transform_indices = @transform_0, window_bounds = array<i64: 128, 128>}, {transform_indices = @transform_1, window_bounds = array<i64: 128, 128>}, {pipeline_mode = #tpu.pipeline_mode<synchronous>, transform_indices = @transform_2, window_bounds = array<i64: 128, 128>}, {pipeline_mode = #tpu.pipeline_mode<synchronous>, transform_indices = @transform_3, window_bounds = array<i64: 1, 128>}, {transform_indices = @transform_4, window_bounds = array<i64: 128, 128>}, {transform_indices = @transform_5, window_bounds = array<i64: 128, 128>}]} {
    %c0_i32 = arith.constant 0 : i32
    %0 = arith.cmpi eq, %arg1, %c0_i32 : i32
    %1 = arith.extui %0 : i1 to i32
    %c0_i32_0 = arith.constant 0 : i32
    %2 = arith.cmpi ne, %1, %c0_i32_0 : i32
    scf.if %2 {
      %cst_15 = arith.constant 0.000000e+00 : f32
      %17 = vector.broadcast %cst_15 : f32 to vector<128x128xf32>
      %c0_16 = arith.constant 0 : index
      %c0_17 = arith.constant 0 : index
      %18 = vector.load %arg8[%c0_16, %c0_17] : memref<128x128xf32, #tpu.memory_space<vmem>>, vector<128x128xf32>
      tpu.vector_store %arg8[%c0_16, %c0_17], %17 {strides = array<i32>} : memref<128x128xf32, #tpu.memory_space<vmem>>, vector<128x128xf32>,
    } else {
    }
    %c0 = arith.constant 0 : index
    %c0_1 = arith.constant 0 : index
    %3 = vector.load %arg3[%c0, %c0_1] : memref<128x128xbf16, #tpu.memory_space<vmem>>, vector<128x128xbf16>
    %c0_2 = arith.constant 0 : index
    %c0_3 = arith.constant 0 : index
    %4 = vector.load %arg6[%c0_2, %c0_3] : memref<128x128xbf16, #tpu.memory_space<vmem>>, vector<128x128xbf16>
    %5 = arith.mulf %3, %4 : vector<128x128xbf16>
    %c0_4 = arith.constant 0 : index
    %c0_5 = arith.constant 0 : index
    %6 = vector.load %arg4[%c0_4, %c0_5] : memref<128x128xbf16, #tpu.memory_space<vmem>>, vector<128x128xbf16>
    %cst = arith.constant dense<0.000000e+00> : vector<128x128xf32>
    %7 = tpu.matmul %5, %6, %cst {dimension_numbers = #tpu.dot_dimension_numbers<[1], [0], [0], [1], [0, 0, 1, 1], [], []>} : vector<128x128xbf16>, vector<128x128xbf16>, vector<128x128xf32> -> vector<128x128xf32>
    %c0_6 = arith.constant 0 : index
    %c0_7 = arith.constant 0 : index
    %8 = vector.load %arg8[%c0_6, %c0_7] : memref<128x128xf32, #tpu.memory_space<vmem>>, vector<128x128xf32>
    %c0_8 = arith.constant 0 : index
    %c0_9 = arith.constant 0 : index
    %9 = vector.load %arg2[%c0_8, %c0_9] : memref<128x128xbf16, #tpu.memory_space<vmem>>, vector<128x128xbf16>
    %10 = arith.truncf %7 : vector<128x128xf32> to vector<128x128xbf16>
    %cst_10 = arith.constant dense<0.000000e+00> : vector<128x128xf32>
    %11 = tpu.matmul %9, %10, %cst_10 {dimension_numbers = #tpu.dot_dimension_numbers<[1], [0], [0], [1], [0, 0, 1, 1], [], []>} : vector<128x128xbf16>, vector<128x128xbf16>, vector<128x128xf32> -> vector<128x128xf32>
    %12 = arith.addf %8, %11 : vector<128x128xf32>
    %c0_11 = arith.constant 0 : index
    %c0_12 = arith.constant 0 : index
    %13 = vector.load %arg8[%c0_11, %c0_12] : memref<128x128xf32, #tpu.memory_space<vmem>>, vector<128x128xf32>
    tpu.vector_store %arg8[%c0_11, %c0_12], %12 {strides = array<i32>} : memref<128x128xf32, #tpu.memory_space<vmem>>, vector<128x128xf32>,
    %c0_i32_13 = arith.constant 0 : i32
    %14 = arith.cmpi eq, %arg1, %c0_i32_13 : i32
    %15 = arith.extui %14 : i1 to i32
    %c0_i32_14 = arith.constant 0 : i32
    %16 = arith.cmpi ne, %15, %c0_i32_14 : i32
    scf.if %16 {
      %c0_15 = arith.constant 0 : index
      %c0_16 = arith.constant 0 : index
      %17 = vector.load %arg8[%c0_15, %c0_16] : memref<128x128xf32, #tpu.memory_space<vmem>>, vector<128x128xf32>
      %c0_17 = arith.constant 0 : index
      %c0_18 = arith.constant 0 : index
      %18 = vector.load %arg5[%c0_17, %c0_18] : memref<1x128xf32, #tpu.memory_space<vmem>>, vector<1x128xf32>
      %19 = vector.broadcast %18 : vector<1x128xf32> to vector<128x128xf32>
      %20 = arith.addf %17, %19 : vector<128x128xf32>
      %c0_19 = arith.constant 0 : index
      %c0_20 = arith.constant 0 : index
      %21 = vector.load %arg7[%c0_19, %c0_20] : memref<128x128xf32, #tpu.memory_space<vmem>>, vector<128x128xf32>
      tpu.vector_store %arg7[%c0_19, %c0_20], %20 {strides = array<i32>} : memref<128x128xf32, #tpu.memory_space<vmem>>, vector<128x128xf32>,
    } else {
    }
    return
  }
  func.func @transform_0(%arg0: i32, %arg1: i32) -> (i32, i32) {
    %c0_i32 = arith.constant 0 : i32
    return %arg0, %arg1 : i32, i32
  }
  func.func @transform_1(%arg0: i32, %arg1: i32) -> (i32, i32) {
    %c0_i32 = arith.constant 0 : i32
    %c0_i32_0 = arith.constant 0 : i32
    return %arg1, %c0_i32 : i32, i32
  }
  func.func @transform_2(%arg0: i32, %arg1: i32) -> (i32, i32) {
    %c0_i32 = arith.constant 0 : i32
    %c0_i32_0 = arith.constant 0 : i32
    %c0_i32_1 = arith.constant 0 : i32
    return %c0_i32, %c0_i32_0 : i32, i32
  }
  func.func @transform_3(%arg0: i32, %arg1: i32) -> (i32, i32) {
    %c0_i32 = arith.constant 0 : i32
    %c0_i32_0 = arith.constant 0 : i32
    %c0_i32_1 = arith.constant 0 : i32
    return %c0_i32, %c0_i32_0 : i32, i32
  }
  func.func @transform_4(%arg0: i32, %arg1: i32) -> (i32, i32) {
    %c0_i32 = arith.constant 0 : i32
    %c0_i32_0 = arith.constant 0 : i32
    return %arg1, %c0_i32 : i32, i32
  }
  func.func @transform_5(%arg0: i32, %arg1: i32) -> (i32, i32) {
    %c0_i32 = arith.constant 0 : i32
    %c0_i32_0 = arith.constant 0 : i32
    return %arg0, %c0_i32 : i32, i32
  }
}

</mosaic_0001>

<bundles_post_ra>
// kernel: forward.49
= control target key start
LH: loop header
LB: loop body
LE: loop exit
PB: predicated region body
PF: predicated region fallthrough
CT: control target
= control target key end

     0   :  { %s851_s2 = inlined_call_operand.vmem [shape: bf16[128,128], index: 2, kind: input, shape index: {}]   ;;  %s852_s1 = inlined_call_operand.vmem [shape: bf16[128,128], index: 1, kind: input, shape index: {}]   ;;  %s853_s0 = inlined_call_operand.vmem [shape: bf16[128,128], index: 0, kind: input, shape index: {}]   ;;  %s854_s3 = inlined_call_operand.vmem [shape: f32[1,128], index: 3, kind: input, shape index: {}]   ;;  %s855_s4 = inlined_call_operand.vmem [shape: f32[128,128], index: 4, kind: output, shape index: {}]  }
   0x1   :  { %v679_v0 = vld [vmem:[%s851_s2] sm:$0xff]   ;;  %v680_v1 = vld [vmem:[%s851_s2 + $0x8] sm:$0xff]   ;;  %v681_v2 = vld [vmem:[%s851_s2 + $0x10] sm:$0xff]  }
   0x2   :  { %615 = vmatprep.subr.bf16.mxu0 %v679_v0  ;;  %v682_v3 = vld [vmem:[%s851_s2 + $0x18] sm:$0xff]   ;;  %v687_v4 = vld [vmem:[%s852_s1] sm:$0xff]   ;;  %v684_v6 = vld [vmem:[%s851_s2 + $0x28] sm:$0xff]  }
   0x3   :  { %616 = vmatpush3.bf16.msra.mxu0 %v679_v0  ;;  %631 = vmatprep.mubr.bf16.mxu0 %v687_v4  ;;  %v683_v5 = vld [vmem:[%s851_s2 + $0x20] sm:$0xff]   ;;  %v685_v7 = vld [vmem:[%s851_s2 + $0x30] sm:$0xff]   ;;  %v686_v8 = vld [vmem:[%s851_s2 + $0x38] sm:$0xff]  }
   0x4   :  { %617 = vmatprep.subr.bf16.mxu0 %v680_v1  ;;  %v688_v9 = vld [vmem:[%s852_s1 + $0x8] sm:$0xff]   ;;  %v689_v10 = vld [vmem:[%s852_s1 + $0x10] sm:$0xff]   ;;  %v690_v11 = vld [vmem:[%s852_s1 + $0x18] sm:$0xff]  }
   0x5   :  { %v691_v12 = vld [vmem:[%s852_s1 + $0x20] sm:$0xff]   ;;  %v692_v13 = vld [vmem:[%s852_s1 + $0x28] sm:$0xff]   ;;  %v693_v14 = vld [vmem:[%s852_s1 + $0x30] sm:$0xff]  }
   0x6   :  { %v694_v15 = vld [vmem:[%s852_s1 + $0x38] sm:$0xff]   ;;  %v695_v16 = vld [vmem:[%s853_s0] sm:$0xff]   ;;  %v696_v41 = vld [vmem:[%s853_s0 + $0x8] sm:$0xff]  }
   0x7   :  { %618 = vmatpush3.bf16.msra.mxu0 %v680_v1  ;;  %663 = vmatprep.mubr.bf16.mxu1 %v695_v16  ;;  %v697_v42 = vld [vmem:[%s853_s0 + $0x10] sm:$0xff]   ;;  %v698_v43 = vld [vmem:[%s853_s0 + $0x18] sm:$0xff]   ;;  %v699_v44 = vld [vmem:[%s853_s0 + $0x20] sm:$0xff]  }
   0x8   :  { %619 = vmatprep.subr.bf16.mxu0 %v681_v2  ;;  %v700_v45 = vld [vmem:[%s853_s0 + $0x28] sm:$0xff]   ;;  %v701_v46 = vld [vmem:[%s853_s0 + $0x30] sm:$0xff]   ;;  %v702_v47 = vld [vmem:[%s853_s0 + $0x38] sm:$0xff]  }
   0x9   :  { %v582_v48 = vld [vmem:[%s854_s3] ss:$0 sm:$0xff] }
   0xb   :  { %620 = vmatpush3.bf16.msra.mxu0 %v681_v2 }
   0xc   :  { %621 = vmatprep.subr.bf16.mxu0 %v682_v3 }
   0xf   :  { %622 = vmatpush3.bf16.msra.mxu0 %v682_v3 }
  0x10   :  { %623 = vmatprep.subr.bf16.mxu0 %v683_v5 }
  0x13   :  { %624 = vmatpush3.bf16.msra.mxu0 %v683_v5 }
  0x14   :  { %625 = vmatprep.subr.bf16.mxu0 %v684_v6 }
  0x17   :  { %626 = vmatpush3.bf16.msra.mxu0 %v684_v6 }
  0x18   :  { %627 = vmatprep.subr.bf16.mxu0 %v685_v7 }
  0x1b   :  { %628 = vmatpush3.bf16.msra.mxu0 %v685_v7 }
  0x1c   :  { %629 = vmatprep.subr.bf16.mxu0 %v686_v8 }
  0x1f   :  { %630 = vmatpush3.bf16.msra.mxu0 %v686_v8 }
  0x22   :  { %632 = vmatmul.mubr.bf16.vlgmr.msra.gmra.mrb[0].mxu0 %v688_v9 }
  0x23   :  { %635 = vmatprep.mubr.bf16.mxu0 %v689_v10 }
  0x2a   :  { %636 = vmatmul.mubr.bf16.gmra.mrb[4].mxu0 %v690_v11 }
  0x2b   :  { %639 = vmatprep.mubr.bf16.mxu0 %v691_v12 }
  0x32   :  { %640 = vmatmul.mubr.bf16.gmra.mrb[8].mxu0 %v692_v13 }
  0x33   :  { %643 = vmatprep.mubr.bf16.mxu0 %v693_v14 }
  0x3a   :  { %644 = vmatmul.mubr.bf16.gmra.mrb[12].mxu0 %v694_v15 }
  0xf5   :  { %v633_v17 = vpop.f32.mrb[0].mxu0 }
  0xf6   :  { %v200_v18 = vpop.f32.mrb[1].mxu0 }
  0xf7   :  { %v634_v19 = vpop.f32.mrb[2].mxu0 }
  0xf8   :  { %v296_v20 = vpack.c.bf16 %v634_v19, %v633_v17  ;;  %v203_v21 = vpop.f32.mrb[3].mxu0 }
  0xf9   :  { %v295_v22 = vpack.c.bf16 %v203_v21, %v200_v18 }
  0xfb   :  { %647 = vmatprep.subr.bf16.mxu1 %v295_v22 }
  0xfc   :  { %648 = vmatpush3.bf16.msra.mxu1 %v295_v22 }
  0xfd   :  { %v637_v23 = vpop.f32.mrb[4].mxu0  ;;  %649 = vmatprep.subr.bf16.mxu1 %v296_v20 }
  0xfe   :  { %v216_v24 = vpop.f32.mrb[5].mxu0 }
  0xff   :  { %v638_v25 = vpop.f32.mrb[6].mxu0 }
 0x100   :  { %v298_v26 = vpack.c.bf16 %v638_v25, %v637_v23  ;;  %v219_v27 = vpop.f32.mrb[7].mxu0  ;;  %650 = vmatpush3.bf16.msra.mxu1 %v296_v20 }
 0x101   :  { %v297_v28 = vpack.c.bf16 %v219_v27, %v216_v24 }
 0x103   :  { %651 = vmatprep.subr.bf16.mxu1 %v297_v28 }
 0x104   :  { %652 = vmatpush3.bf16.msra.mxu1 %v297_v28 }
 0x105   :  { %v641_v29 = vpop.f32.mrb[8].mxu0  ;;  %653 = vmatprep.subr.bf16.mxu1 %v298_v26 }
 0x106   :  { %v232_v30 = vpop.f32.mrb[9].mxu0 }
 0x107   :  { %v642_v31 = vpop.f32.mrb[10].mxu0 }
 0x108   :  { %v300_v32 = vpack.c.bf16 %v642_v31, %v641_v29  ;;  %v235_v33 = vpop.f32.mrb[11].mxu0  ;;  %654 = vmatpush3.bf16.msra.mxu1 %v298_v26 }
 0x109   :  { %v299_v34 = vpack.c.bf16 %v235_v33, %v232_v30 }
 0x10b   :  { %655 = vmatprep.subr.bf16.mxu1 %v299_v34 }
 0x10c   :  { %656 = vmatpush3.bf16.msra.mxu1 %v299_v34 }
 0x10d   :  { %v645_v35 = vpop.f32.mrb[12].mxu0  ;;  %657 = vmatprep.subr.bf16.mxu1 %v300_v32 }
 0x10e   :  { %v248_v36 = vpop.f32.mrb[13].mxu0 }
 0x10f   :  { %v646_v37 = vpop.f32.mrb[14].mxu0 }
 0x110   :  { %v302_v38 = vpack.c.bf16 %v646_v37, %v645_v35  ;;  %v251_v39 = vpop.f32.mrb[15].mxu0  ;;  %658 = vmatpush3.bf16.msra.mxu1 %v300_v32 }
 0x111   :  { %v301_v40 = vpack.c.bf16 %v251_v39, %v248_v36 }
 0x113   :  { %659 = vmatprep.subr.bf16.mxu1 %v301_v40 }
 0x114   :  { %660 = vmatpush3.bf16.msra.mxu1 %v301_v40 }
 0x115   :  { %661 = vmatprep.subr.bf16.mxu1 %v302_v38 }
 0x118   :  { %662 = vmatpush3.bf16.msra.mxu1 %v302_v38 }
 0x11b   :  { %664 = vmatmul.mubr.bf16.vlgmr.msra.gmra.mrb[0].mxu1 %v696_v41 }
 0x11c   :  { %667 = vmatprep.mubr.bf16.mxu1 %v697_v42 }
 0x123   :  { %668 = vmatmul.mubr.bf16.gmra.mrb[4].mxu1 %v698_v43 }
 0x124   :  { %671 = vmatprep.mubr.bf16.mxu1 %v699_v44 }
 0x12b   :  { %672 = vmatmul.mubr.bf16.gmra.mrb[8].mxu1 %v700_v45 }
 0x12c   :  { %675 = vmatprep.mubr.bf16.mxu1 %v701_v46 }
 0x133   :  { %676 = vmatmul.mubr.bf16.gmra.mrb[12].mxu1 %v702_v47 }
 0x1ee   :  { %v665_v49 = vpop.f32.mrb[0].mxu1 }
 0x1ef   :  { %v508_v50 = vadd.f32 %v665_v49, %v582_v48  ;;  %v385_v51 = vpop.f32.mrb[1].mxu1 }
 0x1f0   :  { %v506_v52 = vadd.f32 %v582_v48, %v385_v51  ;;  %v666_v53 = vpop.f32.mrb[2].mxu1 }
 0x1f1   :  { %v524_v54 = vmax.f32 %v508_v50, 0.0  ;;  %v509_v55 = vadd.f32 %v666_v53, %v582_v48  ;;  %v388_v56 = vpop.f32.mrb[3].mxu1 }
 0x1f2   :  { %v522_v57 = vmax.f32 %v506_v52, 0.0  ;;  %v507_v58 = vadd.f32 %v582_v48, %v388_v56 }
 0x1f3   :  { %540 = vst [vmem:[%s855_s4 + $0x10] sm:$0xff] %v524_v54  ;;  %v525_v59 = vmax.f32 %v509_v55, 0.0 }
 0x1f4   :  { %538 = vst [vmem:[%s855_s4] sm:$0xff] %v522_v57  ;;  %v523_v60 = vmax.f32 %v507_v58, 0.0 }
 0x1f5   :  { %541 = vst [vmem:[%s855_s4 + $0x18] sm:$0xff] %v525_v59 }
 0x1f6   :  { %539 = vst [vmem:[%s855_s4 + $0x8] sm:$0xff] %v523_v60  ;;  %v669_v61 = vpop.f32.mrb[4].mxu1 }
 0x1f7   :  { %v512_v62 = vadd.f32 %v669_v61, %v582_v48  ;;  %v401_v63 = vpop.f32.mrb[5].mxu1 }
 0x1f8   :  { %v510_v0 = vadd.f32 %v582_v48, %v401_v63  ;;  %v670_v1 = vpop.f32.mrb[6].mxu1 }
 0x1f9   :  { %v528_v2 = vmax.f32 %v512_v62, 0.0  ;;  %v513_v3 = vadd.f32 %v670_v1, %v582_v48  ;;  %v404_v4 = vpop.f32.mrb[7].mxu1 }
 0x1fa   :  { %v526_v5 = vmax.f32 %v510_v0, 0.0  ;;  %v511_v6 = vadd.f32 %v582_v48, %v404_v4 }
 0x1fb   :  { %544 = vst [vmem:[%s855_s4 + $0x30] sm:$0xff] %v528_v2  ;;  %v529_v7 = vmax.f32 %v513_v3, 0.0 }
 0x1fc   :  { %542 = vst [vmem:[%s855_s4 + $0x20] sm:$0xff] %v526_v5  ;;  %v527_v8 = vmax.f32 %v511_v6, 0.0 }
 0x1fd   :  { %545 = vst [vmem:[%s855_s4 + $0x38] sm:$0xff] %v529_v7 }
 0x1fe   :  { %543 = vst [vmem:[%s855_s4 + $0x28] sm:$0xff] %v527_v8  ;;  %v673_v9 = vpop.f32.mrb[8].mxu1 }
 0x1ff   :  { %v516_v10 = vadd.f32 %v673_v9, %v582_v48  ;;  %v417_v11 = vpop.f32.mrb[9].mxu1 }
 0x200   :  { %v514_v12 = vadd.f32 %v582_v48, %v417_v11  ;;  %v674_v13 = vpop.f32.mrb[10].mxu1 }
 0x201   :  { %v532_v14 = vmax.f32 %v516_v10, 0.0  ;;  %v517_v15 = vadd.f32 %v674_v13, %v582_v48  ;;  %v420_v16 = vpop.f32.mrb[11].mxu1 }
 0x202   :  { %v530_v17 = vmax.f32 %v514_v12, 0.0  ;;  %v515_v18 = vadd.f32 %v582_v48, %v420_v16 }
 0x203   :  { %548 = vst [vmem:[%s855_s4 + $0x50] sm:$0xff] %v532_v14  ;;  %v533_v19 = vmax.f32 %v517_v15, 0.0 }
 0x204   :  { %546 = vst [vmem:[%s855_s4 + $0x40] sm:$0xff] %v530_v17  ;;  %v531_v20 = vmax.f32 %v515_v18, 0.0 }
 0x205   :  { %549 = vst [vmem:[%s855_s4 + $0x58] sm:$0xff] %v533_v19 }
 0x206   :  { %547 = vst [vmem:[%s855_s4 + $0x48] sm:$0xff] %v531_v20  ;;  %v677_v21 = vpop.f32.mrb[12].mxu1 }
 0x207   :  { %v520_v22 = vadd.f32 %v677_v21, %v582_v48  ;;  %v433_v23 = vpop.f32.mrb[13].mxu1 }
 0x208   :  { %v518_v24 = vadd.f32 %v582_v48, %v433_v23  ;;  %v678_v25 = vpop.f32.mrb[14].mxu1 }
 0x209   :  { %v536_v26 = vmax.f32 %v520_v22, 0.0  ;;  %v521_v27 = vadd.f32 %v678_v25, %v582_v48  ;;  %v436_v28 = vpop.f32.mrb[15].mxu1 }
 0x20a   :  { %v534_v29 = vmax.f32 %v518_v24, 0.0  ;;  %v519_v30 = vadd.f32 %v582_v48, %v436_v28 }
 0x20b   :  { %552 = vst [vmem:[%s855_s4 + $0x70] sm:$0xff] %v536_v26  ;;  %v537_v31 = vmax.f32 %v521_v27, 0.0 }
 0x20c   :  { %550 = vst [vmem:[%s855_s4 + $0x60] sm:$0xff] %v534_v29  ;;  %v535_v32 = vmax.f32 %v519_v30, 0.0 }
 0x20d   :  { %553 = vst [vmem:[%s855_s4 + $0x78] sm:$0xff] %v537_v31 }
 0x20e   :  { %551 = vst [vmem:[%s855_s4 + $0x68] sm:$0xff] %v535_v32 }

// kernel: forward.56
= control target key start
LH: loop header
LB: loop body
LE: loop exit
PB: predicated region body
PF: predicated region fallthrough
CT: control target
= control target key end

     0   :  { %v267_v49 = vlaneseq  ;;  %s1902_s1 = inlined_call_operand.vmem [shape: bf16[128,128], index: 1, kind: input, shape index: {}]   ;;  %s1903_s0 = inlined_call_operand.vmem [shape: bf16[128,128], index: 0, kind: input, shape index: {}]   ;;  %s1904_s2 = inlined_call_operand.vmem [shape: f32[1,128], index: 2, kind: input, shape index: {}]   ;;  %s1905_s5 = inlined_call_operand.vmem [shape: bf16[128,128], index: 5, kind: input, shape index: {}]   ;;  %s1906_s3 = inlined_call_operand.vmem [shape: f32[1,128], index: 3, kind: input, shape index: {}]   ;;  %s1907_s4 = inlined_call_operand.vmem [shape: f32[1,128], index: 4, kind: input, shape index: {}]   ;;  %s1908_s6 = inlined_call_operand.vmem [shape: f32[1,128], index: 6, kind: input, shape index: {}]   ;;  %s1909_s7 = inlined_call_operand.vmem [shape: f32[1,128], index: 7, kind: input, shape index: {}]   ;;  %s1910_s8 = inlined_call_operand.vmem [shape: f32[1,128], index: 8, kind: input, shape index: {}]   ;;  %s1911_s9 = inlined_call_operand.vmem [shape: bf16[128,128], index: 9, kind: output, shape index: {}]  }
   0x1   :  { %v1243_v0 = vld [vmem:[%s1902_s1] sm:$0xff]   ;;  %v1244_v1 = vld [vmem:[%s1902_s1 + $0x8] sm:$0xff]   ;;  %v1245_v2 = vld [vmem:[%s1902_s1 + $0x10] sm:$0xff]  }
   0x2   :  { %1179 = vmatprep.subr.bf16.mxu0 %v1243_v0  ;;  %v1246_v3 = vld [vmem:[%s1902_s1 + $0x18] sm:$0xff]   ;;  %v1251_v4 = vld [vmem:[%s1903_s0] sm:$0xff]   ;;  %v1248_v6 = vld [vmem:[%s1902_s1 + $0x28] sm:$0xff]   ;;  %v1474_v50 = vand.u32 127, %v267_v49 }
   0x3   :  { %1180 = vmatpush3.bf16.msra.mxu0 %v1243_v0  ;;  %1195 = vmatprep.mubr.bf16.mxu0 %v1251_v4  ;;  %v1247_v5 = vld [vmem:[%s1902_s1 + $0x20] sm:$0xff]   ;;  %v1249_v7 = vld [vmem:[%s1902_s1 + $0x30] sm:$0xff]   ;;  %v1250_v8 = vld [vmem:[%s1902_s1 + $0x38] sm:$0xff]  }
   0x4   :  { %1181 = vmatprep.subr.bf16.mxu0 %v1244_v1  ;;  %v1252_v9 = vld [vmem:[%s1903_s0 + $0x8] sm:$0xff]   ;;  %v1253_v10 = vld [vmem:[%s1903_s0 + $0x10] sm:$0xff]   ;;  %v1254_v11 = vld [vmem:[%s1903_s0 + $0x18] sm:$0xff]   ;;  %vm269_vm0 = vcmp.lt.s32.totalorder %v1474_v50, 32 }
   0x5   :  { %v1255_v12 = vld [vmem:[%s1903_s0 + $0x20] sm:$0xff]   ;;  %v1256_v13 = vld [vmem:[%s1903_s0 + $0x28] sm:$0xff]   ;;  %v1257_v14 = vld [vmem:[%s1903_s0 + $0x30] sm:$0xff]  }
   0x6   :  { %v1258_v15 = vld [vmem:[%s1903_s0 + $0x38] sm:$0xff]   ;;  %v1038_v16 = vld [vmem:[%s1904_s2] ss:$0 sm:$0xff] }
   0x7   :  { %1182 = vmatpush3.bf16.msra.mxu0 %v1244_v1 }
   0x8   :  { %1183 = vmatprep.subr.bf16.mxu0 %v1245_v2 }
   0xb   :  { %1184 = vmatpush3.bf16.msra.mxu0 %v1245_v2 }
   0xc   :  { %1185 = vmatprep.subr.bf16.mxu0 %v1246_v3 }
   0xf   :  { %1186 = vmatpush3.bf16.msra.mxu0 %v1246_v3 }
  0x10   :  { %1187 = vmatprep.subr.bf16.mxu0 %v1247_v5 }
  0x13   :  { %1188 = vmatpush3.bf16.msra.mxu0 %v1247_v5 }
  0x14   :  { %1189 = vmatprep.subr.bf16.mxu0 %v1248_v6 }
  0x17   :  { %1190 = vmatpush3.bf16.msra.mxu0 %v1248_v6 }
  0x18   :  { %1191 = vmatprep.subr.bf16.mxu0 %v1249_v7 }
  0x1b   :  { %1192 = vmatpush3.bf16.msra.mxu0 %v1249_v7 }
  0x1c   :  { %1193 = vmatprep.subr.bf16.mxu0 %v1250_v8 }
  0x1f   :  { %1194 = vmatpush3.bf16.msra.mxu0 %v1250_v8 }
  0x22   :  { %1196 = vmatmul.mubr.bf16.vlgmr.msra.gmra.mrb[0].mxu0 %v1252_v9 }
  0x23   :  { %1199 = vmatprep.mubr.bf16.mxu0 %v1253_v10 }
  0x2a   :  { %1200 = vmatmul.mubr.bf16.gmra.mrb[4].mxu0 %v1254_v11 }
  0x2b   :  { %1203 = vmatprep.mubr.bf16.mxu0 %v1255_v12 }
  0x32   :  { %1204 = vmatmul.mubr.bf16.gmra.mrb[8].mxu0 %v1256_v13 }
  0x33   :  { %1207 = vmatprep.mubr.bf16.mxu0 %v1257_v14 }
  0x3a   :  { %1208 = vmatmul.mubr.bf16.gmra.mrb[12].mxu0 %v1258_v15 }
  0xf5   :  { %v1197_v17 = vpop.f32.mrb[0].mxu0 }
  0xf6   :  { %v1432_v18 = vadd.f32 %v1197_v17, %v1038_v16  ;;  %v202_v19 = vpop.f32.mrb[1].mxu0 }
  0xf7   :  { %v203_v20 = vadd.f32 %v1038_v16, %v202_v19  ;;  %v1198_v21 = vpop.f32.mrb[2].mxu0 }
  0xf8   :  { %274 = vadd.xlane.f32.xlu1 %v1432_v18  ;;  %v205_v22 = vpop.f32.mrb[3].mxu0  ;;  %v1435_v23 = vadd.f32 %v1198_v21, %v1038_v16 }
  0xf9   :  { %270 = vadd.xlane.f32.xlu0 %v203_v20  ;;  %v206_v24 = vadd.f32 %v1038_v16, %v205_v22 }
  0xfc   :  { %276 = vadd.xlane.f32.xlu1 %v1435_v23 }
  0xfd   :  { %v1201_v25 = vpop.f32.mrb[4].mxu0  ;;  %272 = vadd.xlane.f32.xlu0 %v206_v24 }
  0xfe   :  { %v218_v26 = vpop.f32.mrb[5].mxu0  ;;  %v1443_v31 = vadd.f32 %v1201_v25, %v1038_v16 }
  0xff   :  { %v1438_v27 = vadd.f32 %v1038_v16, %v218_v26  ;;  %v1202_v28 = vpop.f32.mrb[6].mxu0 }
 0x100   :  { %v221_v29 = vpop.f32.mrb[7].mxu0  ;;  %v1446_v32 = vadd.f32 %v1202_v28, %v1038_v16 }
 0x101   :  { %v1440_v30 = vadd.f32 %v1038_v16, %v221_v29  ;;  %278 = vadd.xlane.f32.xlu0 %v1438_v27 }
 0x103   :  { %280 = vadd.xlane.f32.xlu1 %v1440_v30 }
 0x105   :  { %v1205_v33 = vpop.f32.mrb[8].mxu0  ;;  %282 = vadd.xlane.f32.xlu0 %v1443_v31 }
 0x106   :  { %v234_v34 = vpop.f32.mrb[9].mxu0  ;;  %v1455_v39 = vadd.f32 %v1205_v33, %v1038_v16 }
 0x107   :  { %v1449_v35 = vadd.f32 %v1038_v16, %v234_v34  ;;  %v1206_v36 = vpop.f32.mrb[10].mxu0  ;;  %284 = vadd.xlane.f32.xlu1 %v1446_v32 }
 0x108   :  { %v237_v37 = vpop.f32.mrb[11].mxu0  ;;  %v1458_v40 = vadd.f32 %v1206_v36, %v1038_v16 }
 0x109   :  { %v1452_v38 = vadd.f32 %v1038_v16, %v237_v37  ;;  %286 = vadd.xlane.f32.xlu0 %v1449_v35 }
 0x10b   :  { %288 = vadd.xlane.f32.xlu1 %v1452_v38 }
 0x10d   :  { %v1209_v41 = vpop.f32.mrb[12].mxu0  ;;  %290 = vadd.xlane.f32.xlu0 %v1455_v39 }
 0x10e   :  { %v250_v42 = vpop.f32.mrb[13].mxu0  ;;  %v1467_v47 = vadd.f32 %v1209_v41, %v1038_v16  ;;  %v1259_v41 = vld [vmem:[%s1905_s5] sm:$0xff]  }
 0x10f   :  { %v1461_v43 = vadd.f32 %v1038_v16, %v250_v42  ;;  %v1210_v44 = vpop.f32.mrb[14].mxu0  ;;  %292 = vadd.xlane.f32.xlu1 %v1458_v40  ;;  %1211 = vmatprep.subr.bf16.mxu1 %v1259_v41 }
 0x110   :  { %v253_v45 = vpop.f32.mrb[15].mxu0  ;;  %v1470_v48 = vadd.f32 %v1210_v44, %v1038_v16  ;;  %1212 = vmatpush3.bf16.msra.mxu1 %v1259_v41 }
 0x111   :  { %v1464_v46 = vadd.f32 %v1038_v16, %v253_v45  ;;  %294 = vadd.xlane.f32.xlu0 %v1461_v43 }
 0x113   :  { %296 = vadd.xlane.f32.xlu1 %v1464_v46 }
 0x115   :  { %298 = vadd.xlane.f32.xlu0 %v1467_v47 }
 0x117   :  { %300 = vadd.xlane.f32.xlu1 %v1470_v48 }
 0x185   :  { %v275_v51 = vpop.xlane.xlu1 %274 }
 0x186   :  { %v304_v52 = vmul.f32 0.03125, %v275_v51  ;;  %v271_v53 = vpop.xlane.xlu0 %270 }
 0x187   :  { %v302_v54 = vmul.f32 0.03125, %v271_v53 }
 0x188   :  { %v320_v55 = vsub.f32 %v1432_v18, %v304_v52 }
 0x189   :  { %v318_v56 = vsub.f32 %v203_v20, %v302_v54  ;;  %v277_v57 = vpop.xlane.xlu1 %276 }
 0x18a   :  { %v305_v58 = vmul.f32 0.03125, %v277_v57  ;;  %v273_v59 = vpop.xlane.xlu0 %272  ;;  %v1487_v1 = vsel %vm269_vm0, %v320_v55, 0.0  ;;  %v1260_v55 = vld [vmem:[%s1905_s5 + $0x8] sm:$0xff]  }
 0x18b   :  { %v303_v60 = vmul.f32 0.03125, %v273_v59  ;;  %v1480_v61 = vsel %vm269_vm0, %v318_v56, 0.0  ;;  %v354_v6 = vmul.f32 %v1487_v1, %v1487_v1  ;;  %1213 = vmatprep.subr.bf16.mxu1 %v1260_v55 }
 0x18c   :  { %v352_v62 = vmul.f32 %v1480_v61, %v1480_v61  ;;  %v321_v63 = vsub.f32 %v1435_v23, %v305_v58  ;;  %1214 = vmatpush3.bf16.msra.mxu1 %v1260_v55 }
 0x18d   :  { %v319_v0 = vsub.f32 %v206_v24, %v303_v60 }
 0x18e   :  { %368 = vadd.xlane.f32.xlu0 %v352_v62  ;;  %v279_v2 = vpop.xlane.xlu0 %278  ;;  %v1500_v10 = vsel %vm269_vm0, %v321_v63, 0.0 }
 0x18f   :  { %v306_v3 = vmul.f32 0.03125, %v279_v2  ;;  %v1491_v4 = vsel %vm269_vm0, %v319_v0, 0.0  ;;  %v355_v16 = vmul.f32 %v1500_v10, %v1500_v10  ;;  %v1261_v2 = vld [vmem:[%s1905_s5 + $0x10] sm:$0xff]  }
 0x190   :  { %v281_v5 = vpop.xlane.xlu1 %280  ;;  %v353_v7 = vmul.f32 %v1491_v4, %v1491_v4  ;;  %1215 = vmatprep.subr.bf16.mxu1 %v1261_v2 }
 0x191   :  { %v322_v8 = vsub.f32 %v1438_v27, %v306_v3  ;;  %v307_v9 = vmul.f32 0.03125, %v281_v5  ;;  %1216 = vmatpush3.bf16.msra.mxu1 %v1261_v2 }
 0x192   :  { %372 = vadd.xlane.f32.xlu0 %v354_v6  ;;  %370 = vadd.xlane.f32.xlu1 %v353_v7  ;;  %v283_v11 = vpop.xlane.xlu0 %282 }
 0x193   :  { %v323_v12 = vsub.f32 %v1440_v30, %v307_v9  ;;  %v308_v13 = vmul.f32 0.03125, %v283_v11  ;;  %v1505_v14 = vsel %vm269_vm0, %v322_v8, 0.0  ;;  %v1262_v9 = vld [vmem:[%s1905_s5 + $0x18] sm:$0xff]  }
 0x194   :  { %v285_v15 = vpop.xlane.xlu1 %284  ;;  %v356_v17 = vmul.f32 %v1505_v14, %v1505_v14  ;;  %1217 = vmatprep.subr.bf16.mxu1 %v1262_v9 }
 0x195   :  { %v324_v18 = vsub.f32 %v1443_v31, %v308_v13  ;;  %v309_v19 = vmul.f32 0.03125, %v285_v15  ;;  %v1514_v20 = vsel %vm269_vm0, %v323_v12, 0.0  ;;  %1218 = vmatpush3.bf16.msra.mxu1 %v1262_v9  ;;  %v1263_v12 = vld [vmem:[%s1905_s5 + $0x20] sm:$0xff]   ;;  %v1264_v13 = vld [vmem:[%s1905_s5 + $0x28] sm:$0xff]   ;;  %v1265_v15 = vld [vmem:[%s1905_s5 + $0x30] sm:$0xff]  }
 0x196   :  { %374 = vadd.xlane.f32.xlu1 %v355_v16  ;;  %376 = vadd.xlane.f32.xlu0 %v356_v17  ;;  %v287_v21 = vpop.xlane.xlu0 %286  ;;  %v357_v26 = vmul.f32 %v1514_v20, %v1514_v20  ;;  %v1266_v16 = vld [vmem:[%s1905_s5 + $0x38] sm:$0xff]  }
 0x197   :  { %v325_v22 = vsub.f32 %v1446_v32, %v309_v19  ;;  %v310_v23 = vmul.f32 0.03125, %v287_v21  ;;  %v1519_v24 = vsel %vm269_vm0, %v324_v18, 0.0  ;;  %1219 = vmatprep.subr.bf16.mxu1 %v1263_v12 }
 0x198   :  { %v289_v25 = vpop.xlane.xlu1 %288  ;;  %v358_v27 = vmul.f32 %v1519_v24, %v1519_v24 }
 0x199   :  { %v326_v28 = vsub.f32 %v1449_v35, %v310_v23  ;;  %v311_v29 = vmul.f32 0.03125, %v289_v25  ;;  %v1528_v30 = vsel %vm269_vm0, %v325_v22, 0.0  ;;  %1220 = vmatpush3.bf16.msra.mxu1 %v1263_v12 }
 0x19a   :  { %378 = vadd.xlane.f32.xlu1 %v357_v26  ;;  %380 = vadd.xlane.f32.xlu0 %v358_v27  ;;  %v291_v31 = vpop.xlane.xlu0 %290  ;;  %v359_v37 = vmul.f32 %v1528_v30, %v1528_v30 }
 0x19b   :  { %v327_v32 = vsub.f32 %v1452_v38, %v311_v29  ;;  %v312_v33 = vmul.f32 0.03125, %v291_v31  ;;  %v1533_v34 = vsel %vm269_vm0, %v326_v28, 0.0  ;;  %1221 = vmatprep.subr.bf16.mxu1 %v1264_v13 }
 0x19c   :  { %v293_v36 = vpop.xlane.xlu1 %292  ;;  %v360_v35 = vmul.f32 %v1533_v34, %v1533_v34 }
 0x19d   :  { %v328_v42 = vsub.f32 %v1455_v39, %v312_v33  ;;  %v313_v44 = vmul.f32 0.03125, %v293_v36  ;;  %v1545_v38 = vsel %vm269_vm0, %v327_v32, 0.0  ;;  %1222 = vmatpush3.bf16.msra.mxu1 %v1264_v13 }
 0x19e   :  { %382 = vadd.xlane.f32.xlu1 %v359_v37  ;;  %384 = vadd.xlane.f32.xlu0 %v360_v35  ;;  %v295_v45 = vpop.xlane.xlu0 %294  ;;  %v361_v39 = vmul.f32 %v1545_v38, %v1545_v38 }
 0x19f   :  { %v329_v49 = vsub.f32 %v1458_v40, %v313_v44  ;;  %v314_v51 = vmul.f32 0.03125, %v295_v45  ;;  %v1550_v52 = vsel %vm269_vm0, %v328_v42, 0.0  ;;  %1223 = vmatprep.subr.bf16.mxu1 %v1265_v15 }
 0x1a0   :  { %v297_v53 = vpop.xlane.xlu1 %296  ;;  %v362_v54 = vmul.f32 %v1550_v52, %v1550_v52 }
 0x1a1   :  { %v330_v40 = vsub.f32 %v1461_v43, %v314_v51  ;;  %v315_v56 = vmul.f32 0.03125, %v297_v53  ;;  %v1562_v57 = vsel %vm269_vm0, %v329_v49, 0.0  ;;  %1224 = vmatpush3.bf16.msra.mxu1 %v1265_v15  ;;  %v1614_v51 = vld [vmem:[%s1906_s3] ss:$0 sm:$0xff] }
 0x1a2   :  { %386 = vadd.xlane.f32.xlu1 %v361_v39  ;;  %388 = vadd.xlane.f32.xlu0 %v362_v54  ;;  %v299_v58 = vpop.xlane.xlu0 %298  ;;  %v363_v43 = vmul.f32 %v1562_v57, %v1562_v57 }
 0x1a3   :  { %v331_v59 = vsub.f32 %v1464_v46, %v315_v56  ;;  %v316_v60 = vmul.f32 0.03125, %v299_v58  ;;  %v1567_v62 = vsel %vm269_vm0, %v330_v40, 0.0  ;;  %1225 = vmatprep.subr.bf16.mxu1 %v1266_v16  ;;  %v1620_v56 = vld [vmem:[%s1907_s4] ss:$0 sm:$0xff] }
 0x1a4   :  { %v301_v63 = vpop.xlane.xlu1 %300  ;;  %v364_v0 = vmul.f32 %v1567_v62, %v1567_v62 }
 0x1a5   :  { %v332_v46 = vsub.f32 %v1467_v47, %v316_v60  ;;  %v317_v3 = vmul.f32 0.03125, %v301_v63  ;;  %v1579_v5 = vsel %vm269_vm0, %v331_v59, 0.0  ;;  %1226 = vmatpush3.bf16.msra.mxu1 %v1266_v16 }
 0x1a6   :  { %390 = vadd.xlane.f32.xlu1 %v363_v43  ;;  %392 = vadd.xlane.f32.xlu0 %v364_v0  ;;  %v365_v8 = vmul.f32 %v1579_v5, %v1579_v5 }
 0x1a7   :  { %v333_v6 = vsub.f32 %v1470_v48, %v317_v3  ;;  %v1584_v7 = vsel %vm269_vm0, %v332_v46, 0.0 }
 0x1a8   :  { %v366_v47 = vmul.f32 %v1584_v7, %v1584_v7 }
 0x1a9   :  { %v1595_v11 = vsel %vm269_vm0, %v333_v6, 0.0 }
 0x1aa   :  { %394 = vadd.xlane.f32.xlu1 %v365_v8  ;;  %396 = vadd.xlane.f32.xlu0 %v366_v47  ;;  %v367_v48 = vmul.f32 %v1595_v11, %v1595_v11 }
 0x1ae   :  { %398 = vadd.xlane.f32.xlu1 %v367_v48 }
 0x21b   :  { %v369_v17 = vpop.xlane.xlu0 %368 }
 0x21c   :  { %v400_v18 = vmul.f32 0.03125, %v369_v17 }
 0x21e   :  { %v416_v19 = vadd.f32 1e-05, %v400_v18 }
 0x21f   :  { %v371_v21 = vpop.xlane.xlu1 %370  ;;  %v373_v22 = vpop.xlane.xlu0 %372 }
 0x220   :  { %1267 = vrsqrt.f32 %v416_v19  ;;  %v401_v23 = vmul.f32 0.03125, %v371_v21  ;;  %v402_v25 = vmul.f32 0.03125, %v373_v22 }
 0x222   :  { %v417_v26 = vadd.f32 1e-05, %v401_v23  ;;  %v418_v27 = vadd.f32 1e-05, %v402_v25 }
 0x223   :  { %v375_v28 = vpop.xlane.xlu1 %374  ;;  %v377_v29 = vpop.xlane.xlu0 %376 }
 0x224   :  { %1269 = vrsqrt.f32 %v417_v26  ;;  %v403_v31 = vmul.f32 0.03125, %v375_v28  ;;  %v404_v32 = vmul.f32 0.03125, %v377_v29 }
 0x225   :  { %1271 = vrsqrt.f32 %v418_v27 }
 0x226   :  { %v419_v33 = vadd.f32 1e-05, %v403_v31  ;;  %v420_v36 = vadd.f32 1e-05, %v404_v32 }
 0x227   :  { %v379_v37 = vpop.xlane.xlu1 %378  ;;  %v381_v35 = vpop.xlane.xlu0 %380 }
 0x228   :  { %1273 = vrsqrt.f32 %v419_v33  ;;  %v405_v41 = vmul.f32 0.03125, %v379_v37  ;;  %v406_v42 = vmul.f32 0.03125, %v381_v35 }
 0x229   :  { %1275 = vrsqrt.f32 %v420_v36 }
 0x22a   :  { %v1268_v44 = vpop.eup %1267  ;;  %v421_v45 = vadd.f32 1e-05, %v405_v41  ;;  %v422_v49 = vadd.f32 1e-05, %v406_v42 }
 0x22b   :  { %v383_v53 = vpop.xlane.xlu1 %382  ;;  %v385_v39 = vpop.xlane.xlu0 %384  ;;  %v448_v54 = vmul.f32 %v1268_v44, %v1480_v61 }
 0x22c   :  { %1277 = vrsqrt.f32 %v421_v45  ;;  %v407_v55 = vmul.f32 0.03125, %v383_v53  ;;  %v408_v40 = vmul.f32 0.03125, %v385_v39 }
 0x22d   :  { %1279 = vrsqrt.f32 %v422_v49  ;;  %v470_v58 = vmul.f32 %v1614_v51, %v448_v54 }
 0x22e   :  { %v1270_v59 = vpop.eup %1269  ;;  %v423_v60 = vadd.f32 1e-05, %v407_v55  ;;  %v424_v63 = vadd.f32 1e-05, %v408_v40 }
 0x22f   :  { %v1272_v43 = vpop.eup %1271  ;;  %v387_v0 = vpop.xlane.xlu1 %386  ;;  %v449_v46 = vmul.f32 %v1270_v59, %v1491_v4  ;;  %v492_v61 = vadd.f32 %v1620_v56, %v470_v58 }
 0x230   :  { %v389_v2 = vpop.xlane.xlu0 %388  ;;  %1281 = vrsqrt.f32 %v423_v60  ;;  %v409_v3 = vmul.f32 0.03125, %v387_v0  ;;  %v450_v8 = vmul.f32 %v1272_v43, %v1487_v1 }
 0x231   :  { %v410_v6 = vmul.f32 0.03125, %v389_v2  ;;  %1283 = vrsqrt.f32 %v424_v63  ;;  %v471_v47 = vmul.f32 %v1614_v51, %v449_v46  ;;  %v508_v18 = vmax.f32 %v492_v61, 0.0 }
 0x232   :  { %v1274_v9 = vpop.eup %1273  ;;  %v425_v48 = vadd.f32 1e-05, %v409_v3  ;;  %v472_v13 = vmul.f32 %v1614_v51, %v450_v8 }
 0x233   :  { %v426_v12 = vadd.f32 1e-05, %v410_v6  ;;  %v1276_v15 = vpop.eup %1275  ;;  %v391_v16 = vpop.xlane.xlu1 %390  ;;  %v493_v4 = vadd.f32 %v1620_v56, %v471_v47  ;;  %v451_v19 = vmul.f32 %v1274_v9, %v1500_v10 }
 0x234   :  { %v393_v17 = vpop.xlane.xlu0 %392  ;;  %1285 = vrsqrt.f32 %v425_v48  ;;  %v411_v21 = vmul.f32 0.03125, %v391_v16  ;;  %v494_v1 = vadd.f32 %v1620_v56, %v472_v13  ;;  %v452_v26 = vmul.f32 %v1276_v15, %v1505_v14 }
 0x235   :  { %v412_v22 = vmul.f32 0.03125, %v393_v17  ;;  %1287 = vrsqrt.f32 %v426_v12  ;;  %v509_v23 = vmax.f32 %v493_v4, 0.0  ;;  %v473_v25 = vmul.f32 %v1614_v51, %v451_v19 }
 0x236   :  { %v1278_v27 = vpop.eup %1277  ;;  %v427_v28 = vadd.f32 1e-05, %v411_v21  ;;  %v510_v31 = vmax.f32 %v494_v1, 0.0  ;;  %v474_v41 = vmul.f32 %v1614_v51, %v452_v26 }
 0x237   :  { %v428_v29 = vadd.f32 1e-05, %v412_v22  ;;  %v1280_v32 = vpop.eup %1279  ;;  %v395_v33 = vpop.xlane.xlu1 %394  ;;  %v524_v37 = vpack.c.bf16 %v509_v23, %v508_v18  ;;  %v495_v10 = vadd.f32 %v1620_v56, %v473_v25  ;;  %v453_v35 = vmul.f32 %v1278_v27, %v1514_v20 }
 0x238   :  { %v397_v36 = vpop.xlane.xlu0 %396  ;;  %1289 = vrsqrt.f32 %v427_v28  ;;  %v413_v42 = vmul.f32 0.03125, %v395_v33  ;;  %v454_v45 = vmul.f32 %v1280_v32, %v1519_v24  ;;  %v496_v53 = vadd.f32 %v1620_v56, %v474_v41 }
 0x239   :  { %v414_v44 = vmul.f32 0.03125, %v397_v36  ;;  %1291 = vrsqrt.f32 %v428_v29  ;;  %1227 = vmatprep.mubr.bf16.mxu1 %v524_v37  ;;  %v511_v14 = vmax.f32 %v495_v10, 0.0  ;;  %v475_v49 = vmul.f32 %v1614_v51, %v453_v35 }
 0x23a   :  { %v1282_v39 = vpop.eup %1281  ;;  %v429_v54 = vadd.f32 1e-05, %v413_v42  ;;  %v476_v40 = vmul.f32 %v1614_v51, %v454_v45  ;;  %v512_v43 = vmax.f32 %v496_v53, 0.0 }
 0x23b   :  { %v430_v55 = vadd.f32 1e-05, %v414_v44  ;;  %v1284_v20 = vpop.eup %1283  ;;  %v399_v58 = vpop.xlane.xlu1 %398  ;;  %v525_v59 = vpack.c.bf16 %v511_v14, %v510_v31  ;;  %v497_v60 = vadd.f32 %v1620_v56, %v475_v49  ;;  %v455_v63 = vmul.f32 %v1282_v39, %v1528_v30 }
 0x23c   :  { %1293 = vrsqrt.f32 %v429_v54  ;;  %v415_v24 = vmul.f32 0.03125, %v399_v58  ;;  %v456_v0 = vmul.f32 %v1284_v20, %v1533_v34  ;;  %v498_v61 = vadd.f32 %v1620_v56, %v476_v40  ;;  %v1057_v40 = vld [vmem:[%s1908_s6] ss:$0 sm:$0xff] }
 0x23d   :  { %1295 = vrsqrt.f32 %v430_v55  ;;  %1228 = vmatmul.mubr.bf16.vlgmr.msra.gmra.mrb[0].mxu1 %v525_v59  ;;  %v513_v2 = vmax.f32 %v497_v60, 0.0  ;;  %v477_v46 = vmul.f32 %v1614_v51, %v455_v63 }
 0x23e   :  { %v1286_v3 = vpop.eup %1285  ;;  %v431_v6 = vadd.f32 1e-05, %v415_v24  ;;  %v478_v8 = vmul.f32 %v1614_v51, %v456_v0  ;;  %v514_v12 = vmax.f32 %v498_v61, 0.0 }
 0x23f   :  { %v1288_v47 = vpop.eup %1287  ;;  %v526_v9 = vpack.c.bf16 %v513_v2, %v512_v43  ;;  %v499_v30 = vadd.f32 %v1620_v56, %v477_v46  ;;  %v457_v48 = vmul.f32 %v1286_v3, %v1545_v38 }
 0x240   :  { %1297 = vrsqrt.f32 %v431_v6  ;;  %v458_v34 = vmul.f32 %v1288_v47, %v1550_v52  ;;  %v500_v16 = vadd.f32 %v1620_v56, %v478_v8 }
 0x241   :  { %1231 = vmatprep.mubr.bf16.mxu1 %v526_v9  ;;  %v515_v13 = vmax.f32 %v499_v30, 0.0  ;;  %v479_v15 = vmul.f32 %v1614_v51, %v457_v48 }
 0x242   :  { %v1290_v17 = vpop.eup %1289  ;;  %v480_v4 = vmul.f32 %v1614_v51, %v458_v34  ;;  %v516_v52 = vmax.f32 %v500_v16, 0.0 }
 0x243   :  { %v1292_v18 = vpop.eup %1291  ;;  %v527_v19 = vpack.c.bf16 %v515_v13, %v514_v12  ;;  %v501_v21 = vadd.f32 %v1620_v56, %v479_v15  ;;  %v459_v22 = vmul.f32 %v1290_v17, %v1562_v57 }
 0x244   :  { %v460_v38 = vmul.f32 %v1292_v18, %v1567_v62  ;;  %v502_v25 = vadd.f32 %v1620_v56, %v480_v4 }
 0x245   :  { %1232 = vmatmul.mubr.bf16.gmra.mrb[4].mxu1 %v527_v19  ;;  %v517_v1 = vmax.f32 %v501_v21, 0.0  ;;  %v481_v23 = vmul.f32 %v1614_v51, %v459_v22 }
 0x246   :  { %v1294_v26 = vpop.eup %1293  ;;  %v482_v27 = vmul.f32 %v1614_v51, %v460_v38  ;;  %v518_v62 = vmax.f32 %v502_v25, 0.0 }
 0x247   :  { %v1296_v28 = vpop.eup %1295  ;;  %v528_v29 = vpack.c.bf16 %v517_v1, %v516_v52  ;;  %v503_v31 = vadd.f32 %v1620_v56, %v481_v23  ;;  %v461_v32 = vmul.f32 %v1294_v26, %v1579_v5 }
 0x248   :  { %v462_v57 = vmul.f32 %v1296_v28, %v1584_v7  ;;  %v504_v37 = vadd.f32 %v1620_v56, %v482_v27 }
 0x249   :  { %1235 = vmatprep.mubr.bf16.mxu1 %v528_v29  ;;  %v519_v33 = vmax.f32 %v503_v31, 0.0  ;;  %v483_v36 = vmul.f32 %v1614_v51, %v461_v32 }
 0x24a   :  { %v1298_v10 = vpop.eup %1297  ;;  %v484_v35 = vmul.f32 %v1614_v51, %v462_v57  ;;  %v520_v45 = vmax.f32 %v504_v37, 0.0 }
 0x24b   :  { %v529_v41 = vpack.c.bf16 %v519_v33, %v518_v62  ;;  %v505_v42 = vadd.f32 %v1620_v56, %v483_v36  ;;  %v463_v44 = vmul.f32 %v1298_v10, %v1595_v11 }
 0x24c   :  { %v506_v14 = vadd.f32 %v1620_v56, %v484_v35 }
 0x24d   :  { %1236 = vmatmul.mubr.bf16.gmra.mrb[8].mxu1 %v529_v41  ;;  %v521_v5 = vmax.f32 %v505_v42, 0.0  ;;  %v485_v7 = vmul.f32 %v1614_v51, %v463_v44 }
 0x24e   :  { %v522_v39 = vmax.f32 %v506_v14, 0.0 }
 0x24f   :  { %v530_v49 = vpack.c.bf16 %v521_v5, %v520_v45  ;;  %v507_v53 = vadd.f32 %v1620_v56, %v485_v7 }
 0x251   :  { %1239 = vmatprep.mubr.bf16.mxu1 %v530_v49  ;;  %v523_v54 = vmax.f32 %v507_v53, 0.0 }
 0x253   :  { %v531_v55 = vpack.c.bf16 %v523_v54, %v522_v39 }
 0x255   :  { %1240 = vmatmul.mubr.bf16.gmra.mrb[12].mxu1 %v531_v55 }
 0x310   :  { %v1229_v11 = vpop.f32.mrb[0].mxu1 }
 0x311   :  { %v646_v20 = vadd.f32 %v1229_v11, %v1057_v40  ;;  %v637_v58 = vpop.f32.mrb[1].mxu1 }
 0x312   :  { %v1230_v59 = vpop.f32.mrb[2].mxu1  ;;  %v638_v63 = vadd.f32 %v1057_v40, %v637_v58 }
 0x313   :  { %v649_v60 = vadd.f32 %v1230_v59, %v1057_v40  ;;  %706 = vadd.xlane.f32.xlu0 %v646_v20  ;;  %v640_v51 = vpop.f32.mrb[3].mxu1 }
 0x314   :  { %v1672_v24 = vadd.f32 %v1057_v40, %v640_v51 }
 0x315   :  { %708 = vadd.xlane.f32.xlu1 %v649_v60 }
 0x317   :  { %702 = vadd.xlane.f32.xlu0 %v638_v63 }
 0x318   :  { %v1233_v56 = vpop.f32.mrb[4].mxu1 }
 0x319   :  { %v1674_v43 = vadd.f32 %v1233_v56, %v1057_v40  ;;  %704 = vadd.xlane.f32.xlu1 %v1672_v24  ;;  %v653_v0 = vpop.f32.mrb[5].mxu1 }
 0x31a   :  { %v1234_v2 = vpop.f32.mrb[6].mxu1  ;;  %v1680_v3 = vadd.f32 %v1057_v40, %v653_v0 }
 0x31b   :  { %v1677_v46 = vadd.f32 %v1234_v2, %v1057_v40  ;;  %714 = vadd.xlane.f32.xlu0 %v1674_v43  ;;  %v656_v61 = vpop.f32.mrb[7].mxu1 }
 0x31c   :  { %v1683_v6 = vadd.f32 %v1057_v40, %v656_v61 }
 0x31d   :  { %716 = vadd.xlane.f32.xlu1 %v1677_v46 }
 0x31f   :  { %710 = vadd.xlane.f32.xlu0 %v1680_v3 }
 0x320   :  { %v1237_v8 = vpop.f32.mrb[8].mxu1 }
 0x321   :  { %v1686_v47 = vadd.f32 %v1237_v8, %v1057_v40  ;;  %712 = vadd.xlane.f32.xlu1 %v1683_v6  ;;  %v669_v9 = vpop.f32.mrb[9].mxu1 }
 0x322   :  { %v1238_v30 = vpop.f32.mrb[10].mxu1  ;;  %v1692_v12 = vadd.f32 %v1057_v40, %v669_v9 }
 0x323   :  { %v1689_v48 = vadd.f32 %v1238_v30, %v1057_v40  ;;  %722 = vadd.xlane.f32.xlu0 %v1686_v47  ;;  %v672_v34 = vpop.f32.mrb[11].mxu1 }
 0x324   :  { %v1695_v13 = vadd.f32 %v1057_v40, %v672_v34 }
 0x325   :  { %724 = vadd.xlane.f32.xlu1 %v1689_v48 }
 0x327   :  { %718 = vadd.xlane.f32.xlu0 %v1692_v12 }
 0x328   :  { %v1241_v15 = vpop.f32.mrb[12].mxu1 }
 0x329   :  { %720 = vadd.xlane.f32.xlu1 %v1695_v13  ;;  %v685_v16 = vpop.f32.mrb[13].mxu1  ;;  %v1704_v21 = vadd.f32 %v1241_v15, %v1057_v40 }
 0x32a   :  { %v1699_v17 = vadd.f32 %v1057_v40, %v685_v16  ;;  %v1242_v4 = vpop.f32.mrb[14].mxu1 }
 0x32b   :  { %v688_v18 = vpop.f32.mrb[15].mxu1  ;;  %v1707_v22 = vadd.f32 %v1242_v4, %v1057_v40 }
 0x32c   :  { %v1701_v19 = vadd.f32 %v1057_v40, %v688_v18  ;;  %726 = vadd.xlane.f32.xlu0 %v1699_v17 }
 0x32e   :  { %728 = vadd.xlane.f32.xlu1 %v1701_v19 }
 0x330   :  { %730 = vadd.xlane.f32.xlu0 %v1704_v21 }
 0x332   :  { %732 = vadd.xlane.f32.xlu1 %v1707_v22 }
 0x3a0   :  { %v707_v38 = vpop.xlane.xlu0 %706 }
 0x3a1   :  { %v736_v52 = vmul.f32 0.03125, %v707_v38 }
 0x3a2   :  { %v709_v1 = vpop.xlane.xlu1 %708 }
 0x3a3   :  { %v752_v23 = vsub.f32 %v646_v20, %v736_v52  ;;  %v737_v25 = vmul.f32 0.03125, %v709_v1 }
 0x3a4   :  { %v703_v26 = vpop.xlane.xlu0 %702 }
 0x3a5   :  { %v753_v27 = vsub.f32 %v649_v60, %v737_v25  ;;  %v734_v28 = vmul.f32 0.03125, %v703_v26  ;;  %v1713_v29 = vsel %vm269_vm0, %v752_v23, 0.0 }
 0x3a6   :  { %v705_v31 = vpop.xlane.xlu1 %704  ;;  %v784_v32 = vmul.f32 %v1713_v29, %v1713_v29 }
 0x3a7   :  { %v750_v57 = vsub.f32 %v638_v63, %v734_v28  ;;  %v735_v62 = vmul.f32 0.03125, %v705_v31  ;;  %v1719_v33 = vsel %vm269_vm0, %v753_v27, 0.0 }
 0x3a8   :  { %802 = vadd.xlane.f32.xlu0 %v784_v32  ;;  %v715_v36 = vpop.xlane.xlu0 %714  ;;  %v785_v37 = vmul.f32 %v1719_v33, %v1719_v33 }
 0x3a9   :  { %v751_v10 = vsub.f32 %v1672_v24, %v735_v62  ;;  %v740_v35 = vmul.f32 0.03125, %v715_v36  ;;  %v1726_v41 = vsel %vm269_vm0, %v750_v57, 0.0 }
 0x3aa   :  { %v717_v42 = vpop.xlane.xlu1 %716  ;;  %804 = vadd.xlane.f32.xlu1 %v785_v37  ;;  %v782_v44 = vmul.f32 %v1726_v41, %v1726_v41 }
 0x3ab   :  { %v756_v45 = vsub.f32 %v1674_v43, %v740_v35  ;;  %v741_v5 = vmul.f32 0.03125, %v717_v42  ;;  %v1733_v7 = vsel %vm269_vm0, %v751_v10, 0.0 }
 0x3ac   :  { %798 = vadd.xlane.f32.xlu0 %v782_v44  ;;  %v711_v14 = vpop.xlane.xlu0 %710  ;;  %v783_v49 = vmul.f32 %v1733_v7, %v1733_v7 }
 0x3ad   :  { %v757_v53 = vsub.f32 %v1677_v46, %v741_v5  ;;  %v738_v39 = vmul.f32 0.03125, %v711_v14  ;;  %v1740_v54 = vsel %vm269_vm0, %v756_v45, 0.0 }
 0x3ae   :  { %v713_v55 = vpop.xlane.xlu1 %712  ;;  %800 = vadd.xlane.f32.xlu1 %v783_v49  ;;  %v788_v40 = vmul.f32 %v1740_v54, %v1740_v54 }
 0x3af   :  { %v754_v11 = vsub.f32 %v1680_v3, %v738_v39  ;;  %v739_v20 = vmul.f32 0.03125, %v713_v55  ;;  %v1747_v58 = vsel %vm269_vm0, %v757_v53, 0.0 }
 0x3b0   :  { %810 = vadd.xlane.f32.xlu0 %v788_v40  ;;  %v723_v59 = vpop.xlane.xlu0 %722  ;;  %v789_v60 = vmul.f32 %v1747_v58, %v1747_v58 }
 0x3b1   :  { %v755_v51 = vsub.f32 %v1683_v6, %v739_v20  ;;  %v744_v63 = vmul.f32 0.03125, %v723_v59  ;;  %v1754_v24 = vsel %vm269_vm0, %v754_v11, 0.0 }
 0x3b2   :  { %v725_v56 = vpop.xlane.xlu1 %724  ;;  %812 = vadd.xlane.f32.xlu1 %v789_v60  ;;  %v786_v43 = vmul.f32 %v1754_v24, %v1754_v24 }
 0x3b3   :  { %v760_v0 = vsub.f32 %v1686_v47, %v744_v63  ;;  %v745_v2 = vmul.f32 0.03125, %v725_v56  ;;  %v1761_v46 = vsel %vm269_vm0, %v755_v51, 0.0 }
 0x3b4   :  { %806 = vadd.xlane.f32.xlu0 %v786_v43  ;;  %v719_v61 = vpop.xlane.xlu0 %718  ;;  %v787_v3 = vmul.f32 %v1761_v46, %v1761_v46 }
 0x3b5   :  { %v761_v6 = vsub.f32 %v1689_v48, %v745_v2  ;;  %v742_v8 = vmul.f32 0.03125, %v719_v61  ;;  %v1768_v9 = vsel %vm269_vm0, %v760_v0, 0.0 }
 0x3b6   :  { %v721_v30 = vpop.xlane.xlu1 %720  ;;  %808 = vadd.xlane.f32.xlu1 %v787_v3  ;;  %v792_v47 = vmul.f32 %v1768_v9, %v1768_v9 }
 0x3b7   :  { %v758_v34 = vsub.f32 %v1692_v12, %v742_v8  ;;  %v743_v15 = vmul.f32 0.03125, %v721_v30  ;;  %v1775_v16 = vsel %vm269_vm0, %v761_v6, 0.0  ;;  %v1823_v6 = vld [vmem:[%s1909_s7] ss:$0 sm:$0xff] }
 0x3b8   :  { %818 = vadd.xlane.f32.xlu0 %v792_v47  ;;  %v793_v48 = vmul.f32 %v1775_v16, %v1775_v16 }
 0x3b9   :  { %v759_v4 = vsub.f32 %v1695_v13, %v743_v15  ;;  %v727_v18 = vpop.xlane.xlu0 %726  ;;  %v1782_v38 = vsel %vm269_vm0, %v758_v34, 0.0 }
 0x3ba   :  { %v746_v52 = vmul.f32 0.03125, %v727_v18  ;;  %820 = vadd.xlane.f32.xlu1 %v793_v48  ;;  %v790_v12 = vmul.f32 %v1782_v38, %v1782_v38  ;;  %v1829_v48 = vld [vmem:[%s1910_s8] ss:$0 sm:$0xff] }
 0x3bb   :  { %v729_v1 = vpop.xlane.xlu1 %728  ;;  %v1788_v23 = vsel %vm269_vm0, %v759_v4, 0.0 }
 0x3bc   :  { %v762_v25 = vsub.f32 %v1699_v17, %v746_v52  ;;  %v747_v26 = vmul.f32 0.03125, %v729_v1  ;;  %814 = vadd.xlane.f32.xlu0 %v790_v12  ;;  %v791_v13 = vmul.f32 %v1788_v23, %v1788_v23 }
 0x3bd   :  { %v731_v27 = vpop.xlane.xlu0 %730 }
 0x3be   :  { %v763_v28 = vsub.f32 %v1701_v19, %v747_v26  ;;  %v748_v31 = vmul.f32 0.03125, %v731_v27  ;;  %816 = vadd.xlane.f32.xlu1 %v791_v13  ;;  %v1796_v32 = vsel %vm269_vm0, %v762_v25, 0.0 }
 0x3bf   :  { %v733_v57 = vpop.xlane.xlu1 %732  ;;  %v794_v62 = vmul.f32 %v1796_v32, %v1796_v32 }
 0x3c0   :  { %v764_v17 = vsub.f32 %v1704_v21, %v748_v31  ;;  %v749_v36 = vmul.f32 0.03125, %v733_v57  ;;  %v1803_v37 = vsel %vm269_vm0, %v763_v28, 0.0 }
 0x3c1   :  { %822 = vadd.xlane.f32.xlu0 %v794_v62  ;;  %v795_v19 = vmul.f32 %v1803_v37, %v1803_v37 }
 0x3c2   :  { %v765_v10 = vsub.f32 %v1707_v22, %v749_v36  ;;  %v1810_v35 = vsel %vm269_vm0, %v764_v17, 0.0 }
 0x3c3   :  { %824 = vadd.xlane.f32.xlu1 %v795_v19  ;;  %v796_v42 = vmul.f32 %v1810_v35, %v1810_v35 }
 0x3c4   :  { %v1816_v21 = vsel %vm269_vm0, %v765_v10, 0.0 }
 0x3c5   :  { %826 = vadd.xlane.f32.xlu0 %v796_v42  ;;  %v797_v44 = vmul.f32 %v1816_v21, %v1816_v21 }
 0x3c7   :  { %828 = vadd.xlane.f32.xlu1 %v797_v44 }
 0x435   :  { %v803_v45 = vpop.xlane.xlu0 %802 }
 0x436   :  { %v832_v5 = vmul.f32 0.03125, %v803_v45 }
 0x437   :  { %v805_v22 = vpop.xlane.xlu1 %804 }
 0x438   :  { %v848_v14 = vadd.f32 1e-05, %v832_v5  ;;  %v833_v49 = vmul.f32 0.03125, %v805_v22 }
 0x439   :  { %v799_v53 = vpop.xlane.xlu0 %798 }
 0x43a   :  { %1299 = vrsqrt.f32 %v848_v14  ;;  %v849_v39 = vadd.f32 1e-05, %v833_v49  ;;  %v830_v55 = vmul.f32 0.03125, %v799_v53 }
 0x43b   :  { %v801_v40 = vpop.xlane.xlu1 %800 }
 0x43c   :  { %1301 = vrsqrt.f32 %v849_v39  ;;  %v846_v11 = vadd.f32 1e-05, %v830_v55  ;;  %v831_v50 = vmul.f32 0.03125, %v801_v40 }
 0x43d   :  { %v811_v20 = vpop.xlane.xlu0 %810 }
 0x43e   :  { %1303 = vrsqrt.f32 %v846_v11  ;;  %v847_v59 = vadd.f32 1e-05, %v831_v50  ;;  %v836_v60 = vmul.f32 0.03125, %v811_v20 }
 0x43f   :  { %v813_v51 = vpop.xlane.xlu1 %812 }
 0x440   :  { %1305 = vrsqrt.f32 %v847_v59  ;;  %v852_v63 = vadd.f32 1e-05, %v836_v60  ;;  %v837_v56 = vmul.f32 0.03125, %v813_v51 }
 0x441   :  { %v807_v43 = vpop.xlane.xlu0 %806 }
 0x442   :  { %1307 = vrsqrt.f32 %v852_v63  ;;  %v853_v0 = vadd.f32 1e-05, %v837_v56  ;;  %v834_v2 = vmul.f32 0.03125, %v807_v43 }
 0x443   :  { %v809_v61 = vpop.xlane.xlu1 %808 }
 0x444   :  { %v1300_v3 = vpop.eup %1299  ;;  %1309 = vrsqrt.f32 %v853_v0  ;;  %v850_v8 = vadd.f32 1e-05, %v834_v2  ;;  %v835_v30 = vmul.f32 0.03125, %v809_v61 }
 0x445   :  { %v880_v47 = vmul.f32 %v1300_v3, %v1713_v29  ;;  %v819_v34 = vpop.xlane.xlu0 %818 }
 0x446   :  { %v1302_v15 = vpop.eup %1301  ;;  %1311 = vrsqrt.f32 %v850_v8  ;;  %v851_v4 = vadd.f32 1e-05, %v835_v30  ;;  %v840_v18 = vmul.f32 0.03125, %v819_v34 }
 0x447   :  { %v902_v52 = vmul.f32 %v1823_v6, %v880_v47  ;;  %v881_v12 = vmul.f32 %v1302_v15, %v1719_v33  ;;  %v821_v1 = vpop.xlane.xlu1 %820 }
 0x448   :  { %v1304_v25 = vpop.eup %1303  ;;  %1313 = vrsqrt.f32 %v851_v4  ;;  %v856_v26 = vadd.f32 1e-05, %v840_v18  ;;  %v841_v13 = vmul.f32 0.03125, %v821_v1 }
 0x449   :  { %v924_v29 = vadd.f32 %v1829_v48, %v902_v52  ;;  %v903_v27 = vmul.f32 %v1823_v6, %v881_v12  ;;  %v878_v28 = vmul.f32 %v1304_v25, %v1726_v41  ;;  %v815_v31 = vpop.xlane.xlu0 %814 }
 0x44a   :  { %v1306_v57 = vpop.eup %1305  ;;  %1315 = vrsqrt.f32 %v856_v26  ;;  %v857_v62 = vadd.f32 1e-05, %v841_v13  ;;  %v838_v17 = vmul.f32 0.03125, %v815_v31 }
 0x44b   :  { %v925_v36 = vadd.f32 %v1829_v48, %v903_v27  ;;  %v900_v33 = vmul.f32 %v1823_v6, %v878_v28  ;;  %v879_v19 = vmul.f32 %v1306_v57, %v1733_v7  ;;  %v817_v10 = vpop.xlane.xlu1 %816  ;;  %v940_v44 = vmax.f32 %v924_v29, 0.0 }
 0x44c   :  { %v1308_v42 = vpop.eup %1307  ;;  %1317 = vrsqrt.f32 %v857_v62  ;;  %v854_v45 = vadd.f32 1e-05, %v838_v17  ;;  %v839_v5 = vmul.f32 0.03125, %v817_v10 }
 0x44d   :  { %v941_v22 = vmax.f32 %v925_v36, 0.0  ;;  %v922_v41 = vadd.f32 %v1829_v48, %v900_v33  ;;  %v901_v14 = vmul.f32 %v1823_v6, %v879_v19  ;;  %v884_v49 = vmul.f32 %v1308_v42, %v1740_v54 }
 0x44e   :  { %v1310_v53 = vpop.eup %1309  ;;  %1319 = vrsqrt.f32 %v854_v45  ;;  %v855_v39 = vadd.f32 1e-05, %v839_v5  ;;  %v823_v55 = vpop.xlane.xlu0 %822 }
 0x44f   :  { %v1108_v40 = vpack.c.bf16 %v941_v22, %v940_v44  ;;  %v923_v7 = vadd.f32 %v1829_v48, %v901_v14  ;;  %v906_v11 = vmul.f32 %v1823_v6, %v884_v49  ;;  %v885_v20 = vmul.f32 %v1310_v53, %v1747_v58 }
 0x450   :  { %v1312_v50 = vpop.eup %1311  ;;  %1321 = vrsqrt.f32 %v855_v39  ;;  %v842_v59 = vmul.f32 0.03125, %v823_v55  ;;  %v825_v60 = vpop.xlane.xlu1 %824  ;;  %v938_v54 = vmax.f32 %v922_v41, 0.0 }
 0x451   :  { %1140 = vst [vmem:[%s1911_s9 + $0x8] sm:$0xff] %v1108_v40   ;;  %v939_v51 = vmax.f32 %v923_v7, 0.0  ;;  %v882_v63 = vmul.f32 %v1312_v50, %v1754_v24  ;;  %v843_v56 = vmul.f32 0.03125, %v825_v60  ;;  %v928_v0 = vadd.f32 %v1829_v48, %v906_v11 }
 0x452   :  { %v1314_v43 = vpop.eup %1313  ;;  %v907_v2 = vmul.f32 %v1823_v6, %v885_v20  ;;  %v858_v61 = vadd.f32 1e-05, %v842_v59  ;;  %v827_v3 = vpop.xlane.xlu0 %826 }
 0x453   :  { %v1103_v58 = vpack.c.bf16 %v939_v51, %v938_v54  ;;  %v904_v8 = vmul.f32 %v1823_v6, %v882_v63  ;;  %v883_v30 = vmul.f32 %v1314_v43, %v1761_v46  ;;  %v859_v15 = vadd.f32 1e-05, %v843_v56 }
 0x454   :  { %v1316_v47 = vpop.eup %1315  ;;  %v929_v34 = vadd.f32 %v1829_v48, %v907_v2  ;;  %1323 = vrsqrt.f32 %v858_v61  ;;  %v844_v4 = vmul.f32 0.03125, %v827_v3  ;;  %v829_v24 = vpop.xlane.xlu1 %828  ;;  %v944_v46 = vmax.f32 %v928_v0, 0.0 }
 0x455   :  { %1104 = vst [vmem:[%s1911_s9] sm:$0xff] %v1103_v58   ;;  %v926_v18 = vadd.f32 %v1829_v48, %v904_v8  ;;  %v905_v52 = vmul.f32 %v1823_v6, %v883_v30  ;;  %v888_v12 = vmul.f32 %v1316_v47, %v1768_v9  ;;  %v845_v1 = vmul.f32 0.03125, %v829_v24 }
 0x456   :  { %v1318_v25 = vpop.eup %1317  ;;  %v945_v26 = vmax.f32 %v929_v34, 0.0  ;;  %1325 = vrsqrt.f32 %v859_v15  ;;  %v860_v13 = vadd.f32 1e-05, %v844_v4 }
 0x457   :  { %v927_v29 = vadd.f32 %v1829_v48, %v905_v52  ;;  %v910_v27 = vmul.f32 %v1823_v6, %v888_v12  ;;  %v889_v28 = vmul.f32 %v1318_v25, %v1775_v16  ;;  %v942_v62 = vmax.f32 %v926_v18, 0.0 }
 0x458   :  { %v1320_v31 = vpop.eup %1319  ;;  %v1118_v57 = vpack.c.bf16 %v945_v26, %v944_v46  ;;  %1327 = vrsqrt.f32 %v860_v13  ;;  %v861_v17 = vadd.f32 1e-05, %v845_v1 }
 0x459   :  { %v943_v36 = vmax.f32 %v927_v29, 0.0  ;;  %v932_v9 = vadd.f32 %v1829_v48, %v910_v27  ;;  %v911_v33 = vmul.f32 %v1823_v6, %v889_v28  ;;  %v886_v19 = vmul.f32 %v1320_v31, %v1782_v38 }
 0x45a   :  { %v1322_v10 = vpop.eup %1321  ;;  %1142 = vst [vmem:[%s1911_s9 + $0x18] sm:$0xff] %v1118_v57   ;;  %1329 = vrsqrt.f32 %v861_v17 }
 0x45b   :  { %v1113_v42 = vpack.c.bf16 %v943_v36, %v942_v62  ;;  %v933_v16 = vadd.f32 %v1829_v48, %v911_v33  ;;  %v908_v44 = vmul.f32 %v1823_v6, %v886_v19  ;;  %v887_v45 = vmul.f32 %v1322_v10, %v1788_v23 }
 0x45c   :  { %v948_v5 = vmax.f32 %v932_v9, 0.0 }
 0x45d   :  { %1141 = vst [vmem:[%s1911_s9 + $0x10] sm:$0xff] %v1113_v42   ;;  %v949_v22 = vmax.f32 %v933_v16, 0.0  ;;  %v930_v41 = vadd.f32 %v1829_v48, %v908_v44  ;;  %v909_v14 = vmul.f32 %v1823_v6, %v887_v45 }
 0x45e   :  { %v1324_v38 = vpop.eup %1323 }
 0x45f   :  { %v1128_v49 = vpack.c.bf16 %v949_v22, %v948_v5  ;;  %v890_v53 = vmul.f32 %v1324_v38, %v1796_v32  ;;  %v931_v55 = vadd.f32 %v1829_v48, %v909_v14  ;;  %v946_v11 = vmax.f32 %v930_v41, 0.0 }
 0x460   :  { %v1326_v39 = vpop.eup %1325 }
 0x461   :  { %1144 = vst [vmem:[%s1911_s9 + $0x28] sm:$0xff] %v1128_v49   ;;  %v912_v23 = vmul.f32 %v1823_v6, %v890_v53  ;;  %v891_v40 = vmul.f32 %v1326_v39, %v1803_v37  ;;  %v947_v50 = vmax.f32 %v931_v55, 0.0 }
 0x462   :  { %v1328_v7 = vpop.eup %1327 }
 0x463   :  { %v934_v20 = vadd.f32 %v1829_v48, %v912_v23  ;;  %v913_v59 = vmul.f32 %v1823_v6, %v891_v40  ;;  %v892_v32 = vmul.f32 %v1328_v7, %v1810_v35  ;;  %v1123_v54 = vpack.c.bf16 %v947_v50, %v946_v11 }
 0x464   :  { %v1330_v60 = vpop.eup %1329 }
 0x465   :  { %v935_v51 = vadd.f32 %v1829_v48, %v913_v59  ;;  %v914_v63 = vmul.f32 %v1823_v6, %v892_v32  ;;  %v893_v56 = vmul.f32 %v1330_v60, %v1816_v21  ;;  %1143 = vst [vmem:[%s1911_s9 + $0x20] sm:$0xff] %v1123_v54   ;;  %v950_v37 = vmax.f32 %v934_v20, 0.0 }
 0x467   :  { %v951_v43 = vmax.f32 %v935_v51, 0.0  ;;  %v936_v0 = vadd.f32 %v1829_v48, %v914_v63  ;;  %v915_v2 = vmul.f32 %v1823_v6, %v893_v56 }
 0x469   :  { %v1133_v61 = vpack.c.bf16 %v951_v43, %v950_v37  ;;  %v937_v35 = vadd.f32 %v1829_v48, %v915_v2  ;;  %v952_v3 = vmax.f32 %v936_v0, 0.0 }
 0x46b   :  { %1145 = vst [vmem:[%s1911_s9 + $0x30] sm:$0xff] %v1133_v61   ;;  %v953_v58 = vmax.f32 %v937_v35, 0.0 }
 0x46d   :  { %v1138_v21 = vpack.c.bf16 %v953_v58, %v952_v3 }
 0x46f   :  { %1146 = vst [vmem:[%s1911_s9 + $0x38] sm:$0xff] %v1138_v21  }

// kernel: forward.58
= control target key start
LH: loop header
LB: loop body
LE: loop exit
PB: predicated region body
PF: predicated region fallthrough
CT: control target
= control target key end

     0   :  { %s970_s2 = inlined_call_operand.vmem [shape: bf16[128,128], index: 2, kind: input, shape index: {}]   ;;  %s971_s1 = inlined_call_operand.vmem [shape: bf16[128,128], index: 1, kind: input, shape index: {}]   ;;  %s972_s0 = inlined_call_operand.vmem [shape: bf16[128,128], index: 0, kind: input, shape index: {}]   ;;  %s973_s3 = inlined_call_operand.vmem [shape: f32[1,128], index: 3, kind: input, shape index: {}]   ;;  %s974_s4 = inlined_call_operand.vmem [shape: bf16[128,128], index: 4, kind: output, shape index: {}]  }
   0x1   :  { %v822_v0 = vld [vmem:[%s970_s2] sm:$0xff]   ;;  %v823_v1 = vld [vmem:[%s970_s2 + $0x8] sm:$0xff]   ;;  %v824_v2 = vld [vmem:[%s970_s2 + $0x10] sm:$0xff]  }
   0x2   :  { %758 = vmatprep.subr.bf16.mxu0 %v822_v0  ;;  %v825_v3 = vld [vmem:[%s970_s2 + $0x18] sm:$0xff]   ;;  %v830_v4 = vld [vmem:[%s971_s1] sm:$0xff]   ;;  %v827_v6 = vld [vmem:[%s970_s2 + $0x28] sm:$0xff]  }
   0x3   :  { %759 = vmatpush3.bf16.msra.mxu0 %v822_v0  ;;  %774 = vmatprep.mubr.bf16.mxu0 %v830_v4  ;;  %v826_v5 = vld [vmem:[%s970_s2 + $0x20] sm:$0xff]   ;;  %v828_v7 = vld [vmem:[%s970_s2 + $0x30] sm:$0xff]   ;;  %v829_v8 = vld [vmem:[%s970_s2 + $0x38] sm:$0xff]  }
   0x4   :  { %760 = vmatprep.subr.bf16.mxu0 %v823_v1  ;;  %v831_v9 = vld [vmem:[%s971_s1 + $0x8] sm:$0xff]   ;;  %v832_v10 = vld [vmem:[%s971_s1 + $0x10] sm:$0xff]   ;;  %v833_v11 = vld [vmem:[%s971_s1 + $0x18] sm:$0xff]  }
   0x5   :  { %v834_v12 = vld [vmem:[%s971_s1 + $0x20] sm:$0xff]   ;;  %v835_v13 = vld [vmem:[%s971_s1 + $0x28] sm:$0xff]   ;;  %v836_v14 = vld [vmem:[%s971_s1 + $0x30] sm:$0xff]  }
   0x6   :  { %v837_v15 = vld [vmem:[%s971_s1 + $0x38] sm:$0xff]   ;;  %v838_v16 = vld [vmem:[%s972_s0] sm:$0xff]   ;;  %v839_v41 = vld [vmem:[%s972_s0 + $0x8] sm:$0xff]  }
   0x7   :  { %761 = vmatpush3.bf16.msra.mxu0 %v823_v1  ;;  %806 = vmatprep.mubr.bf16.mxu1 %v838_v16  ;;  %v840_v42 = vld [vmem:[%s972_s0 + $0x10] sm:$0xff]   ;;  %v841_v43 = vld [vmem:[%s972_s0 + $0x18] sm:$0xff]   ;;  %v842_v44 = vld [vmem:[%s972_s0 + $0x20] sm:$0xff]  }
   0x8   :  { %762 = vmatprep.subr.bf16.mxu0 %v824_v2  ;;  %v843_v45 = vld [vmem:[%s972_s0 + $0x28] sm:$0xff]   ;;  %v844_v46 = vld [vmem:[%s972_s0 + $0x30] sm:$0xff]   ;;  %v845_v47 = vld [vmem:[%s972_s0 + $0x38] sm:$0xff]  }
   0x9   :  { %v646_v48 = vld [vmem:[%s973_s3] ss:$0 sm:$0xff] }
   0xb   :  { %763 = vmatpush3.bf16.msra.mxu0 %v824_v2 }
   0xc   :  { %764 = vmatprep.subr.bf16.mxu0 %v825_v3 }
   0xf   :  { %765 = vmatpush3.bf16.msra.mxu0 %v825_v3 }
  0x10   :  { %766 = vmatprep.subr.bf16.mxu0 %v826_v5 }
  0x13   :  { %767 = vmatpush3.bf16.msra.mxu0 %v826_v5 }
  0x14   :  { %768 = vmatprep.subr.bf16.mxu0 %v827_v6 }
  0x17   :  { %769 = vmatpush3.bf16.msra.mxu0 %v827_v6 }
  0x18   :  { %770 = vmatprep.subr.bf16.mxu0 %v828_v7 }
  0x1b   :  { %771 = vmatpush3.bf16.msra.mxu0 %v828_v7 }
  0x1c   :  { %772 = vmatprep.subr.bf16.mxu0 %v829_v8 }
  0x1f   :  { %773 = vmatpush3.bf16.msra.mxu0 %v829_v8 }
  0x22   :  { %775 = vmatmul.mubr.bf16.vlgmr.msra.gmra.mrb[0].mxu0 %v831_v9 }
  0x23   :  { %778 = vmatprep.mubr.bf16.mxu0 %v832_v10 }
  0x2a   :  { %779 = vmatmul.mubr.bf16.gmra.mrb[4].mxu0 %v833_v11 }
  0x2b   :  { %782 = vmatprep.mubr.bf16.mxu0 %v834_v12 }
  0x32   :  { %783 = vmatmul.mubr.bf16.gmra.mrb[8].mxu0 %v835_v13 }
  0x33   :  { %786 = vmatprep.mubr.bf16.mxu0 %v836_v14 }
  0x3a   :  { %787 = vmatmul.mubr.bf16.gmra.mrb[12].mxu0 %v837_v15 }
  0xf5   :  { %v776_v17 = vpop.f32.mrb[0].mxu0 }
  0xf6   :  { %v200_v18 = vpop.f32.mrb[1].mxu0 }
  0xf7   :  { %v777_v19 = vpop.f32.mrb[2].mxu0 }
  0xf8   :  { %v296_v20 = vpack.c.bf16 %v777_v19, %v776_v17  ;;  %v203_v21 = vpop.f32.mrb[3].mxu0 }
  0xf9   :  { %v295_v22 = vpack.c.bf16 %v203_v21, %v200_v18 }
  0xfb   :  { %790 = vmatprep.subr.bf16.mxu1 %v295_v22 }
  0xfc   :  { %791 = vmatpush3.bf16.msra.mxu1 %v295_v22 }
  0xfd   :  { %v780_v23 = vpop.f32.mrb[4].mxu0  ;;  %792 = vmatprep.subr.bf16.mxu1 %v296_v20 }
  0xfe   :  { %v216_v24 = vpop.f32.mrb[5].mxu0 }
  0xff   :  { %v781_v25 = vpop.f32.mrb[6].mxu0 }
 0x100   :  { %v298_v26 = vpack.c.bf16 %v781_v25, %v780_v23  ;;  %v219_v27 = vpop.f32.mrb[7].mxu0  ;;  %793 = vmatpush3.bf16.msra.mxu1 %v296_v20 }
 0x101   :  { %v297_v28 = vpack.c.bf16 %v219_v27, %v216_v24 }
 0x103   :  { %794 = vmatprep.subr.bf16.mxu1 %v297_v28 }
 0x104   :  { %795 = vmatpush3.bf16.msra.mxu1 %v297_v28 }
 0x105   :  { %v784_v29 = vpop.f32.mrb[8].mxu0  ;;  %796 = vmatprep.subr.bf16.mxu1 %v298_v26 }
 0x106   :  { %v232_v30 = vpop.f32.mrb[9].mxu0 }
 0x107   :  { %v785_v31 = vpop.f32.mrb[10].mxu0 }
 0x108   :  { %v300_v32 = vpack.c.bf16 %v785_v31, %v784_v29  ;;  %v235_v33 = vpop.f32.mrb[11].mxu0  ;;  %797 = vmatpush3.bf16.msra.mxu1 %v298_v26 }
 0x109   :  { %v299_v34 = vpack.c.bf16 %v235_v33, %v232_v30 }
 0x10b   :  { %798 = vmatprep.subr.bf16.mxu1 %v299_v34 }
 0x10c   :  { %799 = vmatpush3.bf16.msra.mxu1 %v299_v34 }
 0x10d   :  { %v788_v35 = vpop.f32.mrb[12].mxu0  ;;  %800 = vmatprep.subr.bf16.mxu1 %v300_v32 }
 0x10e   :  { %v248_v36 = vpop.f32.mrb[13].mxu0 }
 0x10f   :  { %v789_v37 = vpop.f32.mrb[14].mxu0 }
 0x110   :  { %v302_v38 = vpack.c.bf16 %v789_v37, %v788_v35  ;;  %v251_v39 = vpop.f32.mrb[15].mxu0  ;;  %801 = vmatpush3.bf16.msra.mxu1 %v300_v32 }
 0x111   :  { %v301_v40 = vpack.c.bf16 %v251_v39, %v248_v36 }
 0x113   :  { %802 = vmatprep.subr.bf16.mxu1 %v301_v40 }
 0x114   :  { %803 = vmatpush3.bf16.msra.mxu1 %v301_v40 }
 0x115   :  { %804 = vmatprep.subr.bf16.mxu1 %v302_v38 }
 0x118   :  { %805 = vmatpush3.bf16.msra.mxu1 %v302_v38 }
 0x11b   :  { %807 = vmatmul.mubr.bf16.vlgmr.msra.gmra.mrb[0].mxu1 %v839_v41 }
 0x11c   :  { %810 = vmatprep.mubr.bf16.mxu1 %v840_v42 }
 0x123   :  { %811 = vmatmul.mubr.bf16.gmra.mrb[4].mxu1 %v841_v43 }
 0x124   :  { %814 = vmatprep.mubr.bf16.mxu1 %v842_v44 }
 0x12b   :  { %815 = vmatmul.mubr.bf16.gmra.mrb[8].mxu1 %v843_v45 }
 0x12c   :  { %818 = vmatprep.mubr.bf16.mxu1 %v844_v46 }
 0x133   :  { %819 = vmatmul.mubr.bf16.gmra.mrb[12].mxu1 %v845_v47 }
 0x1ee   :  { %v808_v49 = vpop.f32.mrb[0].mxu1 }
 0x1ef   :  { %v508_v50 = vadd.f32 %v808_v49, %v646_v48  ;;  %v385_v51 = vpop.f32.mrb[1].mxu1 }
 0x1f0   :  { %v506_v52 = vadd.f32 %v646_v48, %v385_v51  ;;  %v809_v53 = vpop.f32.mrb[2].mxu1 }
 0x1f1   :  { %v509_v54 = vadd.f32 %v809_v53, %v646_v48  ;;  %v388_v55 = vpop.f32.mrb[3].mxu1  ;;  %v524_v57 = vmax.f32 %v508_v50, 0.0 }
 0x1f2   :  { %v507_v56 = vadd.f32 %v646_v48, %v388_v55  ;;  %v522_v59 = vmax.f32 %v506_v52, 0.0 }
 0x1f3   :  { %v525_v58 = vmax.f32 %v509_v54, 0.0 }
 0x1f4   :  { %v523_v60 = vmax.f32 %v507_v56, 0.0 }
 0x1f5   :  { %v687_v61 = vpack.c.bf16 %v525_v58, %v524_v57 }
 0x1f6   :  { %v682_v62 = vpack.c.bf16 %v523_v60, %v522_v59  ;;  %v812_v63 = vpop.f32.mrb[4].mxu1 }
 0x1f7   :  { %719 = vst [vmem:[%s974_s4 + $0x8] sm:$0xff] %v687_v61   ;;  %v512_v0 = vadd.f32 %v812_v63, %v646_v48  ;;  %v401_v1 = vpop.f32.mrb[5].mxu1 }
 0x1f8   :  { %683 = vst [vmem:[%s974_s4] sm:$0xff] %v682_v62   ;;  %v510_v2 = vadd.f32 %v646_v48, %v401_v1  ;;  %v813_v3 = vpop.f32.mrb[6].mxu1 }
 0x1f9   :  { %v513_v4 = vadd.f32 %v813_v3, %v646_v48  ;;  %v404_v5 = vpop.f32.mrb[7].mxu1  ;;  %v528_v7 = vmax.f32 %v512_v0, 0.0 }
 0x1fa   :  { %v511_v6 = vadd.f32 %v646_v48, %v404_v5  ;;  %v526_v9 = vmax.f32 %v510_v2, 0.0 }
 0x1fb   :  { %v529_v8 = vmax.f32 %v513_v4, 0.0 }
 0x1fc   :  { %v527_v10 = vmax.f32 %v511_v6, 0.0 }
 0x1fd   :  { %v697_v11 = vpack.c.bf16 %v529_v8, %v528_v7 }
 0x1fe   :  { %v692_v12 = vpack.c.bf16 %v527_v10, %v526_v9  ;;  %v816_v13 = vpop.f32.mrb[8].mxu1 }
 0x1ff   :  { %721 = vst [vmem:[%s974_s4 + $0x18] sm:$0xff] %v697_v11   ;;  %v516_v14 = vadd.f32 %v816_v13, %v646_v48  ;;  %v417_v15 = vpop.f32.mrb[9].mxu1 }
 0x200   :  { %720 = vst [vmem:[%s974_s4 + $0x10] sm:$0xff] %v692_v12   ;;  %v514_v16 = vadd.f32 %v646_v48, %v417_v15  ;;  %v817_v17 = vpop.f32.mrb[10].mxu1 }
 0x201   :  { %v517_v18 = vadd.f32 %v817_v17, %v646_v48  ;;  %v420_v19 = vpop.f32.mrb[11].mxu1  ;;  %v532_v21 = vmax.f32 %v516_v14, 0.0 }
 0x202   :  { %v515_v20 = vadd.f32 %v646_v48, %v420_v19  ;;  %v530_v23 = vmax.f32 %v514_v16, 0.0 }
 0x203   :  { %v533_v22 = vmax.f32 %v517_v18, 0.0 }
 0x204   :  { %v531_v24 = vmax.f32 %v515_v20, 0.0 }
 0x205   :  { %v707_v25 = vpack.c.bf16 %v533_v22, %v532_v21 }
 0x206   :  { %v702_v26 = vpack.c.bf16 %v531_v24, %v530_v23  ;;  %v820_v27 = vpop.f32.mrb[12].mxu1 }
 0x207   :  { %723 = vst [vmem:[%s974_s4 + $0x28] sm:$0xff] %v707_v25   ;;  %v520_v28 = vadd.f32 %v820_v27, %v646_v48  ;;  %v433_v29 = vpop.f32.mrb[13].mxu1 }
 0x208   :  { %722 = vst [vmem:[%s974_s4 + $0x20] sm:$0xff] %v702_v26   ;;  %v518_v30 = vadd.f32 %v646_v48, %v433_v29  ;;  %v821_v31 = vpop.f32.mrb[14].mxu1 }
 0x209   :  { %v521_v32 = vadd.f32 %v821_v31, %v646_v48  ;;  %v436_v33 = vpop.f32.mrb[15].mxu1  ;;  %v536_v35 = vmax.f32 %v520_v28, 0.0 }
 0x20a   :  { %v519_v34 = vadd.f32 %v646_v48, %v436_v33  ;;  %v534_v37 = vmax.f32 %v518_v30, 0.0 }
 0x20b   :  { %v537_v36 = vmax.f32 %v521_v32, 0.0 }
 0x20c   :  { %v535_v38 = vmax.f32 %v519_v34, 0.0 }
 0x20d   :  { %v717_v39 = vpack.c.bf16 %v537_v36, %v536_v35 }
 0x20e   :  { %v712_v40 = vpack.c.bf16 %v535_v38, %v534_v37 }
 0x20f   :  { %725 = vst [vmem:[%s974_s4 + $0x38] sm:$0xff] %v717_v39  }
 0x210   :  { %724 = vst [vmem:[%s974_s4 + $0x30] sm:$0xff] %v712_v40  }

// kernel: forward.57
= control target key start
LH: loop header
LB: loop body
LE: loop exit
PB: predicated region body
PF: predicated region fallthrough
CT: control target
= control target key end

     0   :  { %s954_s2 = inlined_call_operand.vmem [shape: bf16[128,128], index: 2, kind: input, shape index: {}]   ;;  %s955_s1 = inlined_call_operand.vmem [shape: bf16[128,128], index: 1, kind: input, shape index: {}]   ;;  %s956_s0 = inlined_call_operand.vmem [shape: bf16[128,128], index: 0, kind: input, shape index: {}]   ;;  %s957_s3 = inlined_call_operand.vmem [shape: f32[1,128], index: 3, kind: input, shape index: {}]   ;;  %s958_s4 = inlined_call_operand.vmem [shape: bf16[128,128], index: 4, kind: output, shape index: {}]  }
   0x1   :  { %v806_v0 = vld [vmem:[%s954_s2] sm:$0xff]   ;;  %v807_v1 = vld [vmem:[%s954_s2 + $0x8] sm:$0xff]   ;;  %v808_v2 = vld [vmem:[%s954_s2 + $0x10] sm:$0xff]  }
   0x2   :  { %742 = vmatprep.subr.bf16.mxu0 %v806_v0  ;;  %v809_v3 = vld [vmem:[%s954_s2 + $0x18] sm:$0xff]   ;;  %v814_v4 = vld [vmem:[%s955_s1] sm:$0xff]   ;;  %v811_v6 = vld [vmem:[%s954_s2 + $0x28] sm:$0xff]  }
   0x3   :  { %743 = vmatpush3.bf16.msra.mxu0 %v806_v0  ;;  %758 = vmatprep.mubr.bf16.mxu0 %v814_v4  ;;  %v810_v5 = vld [vmem:[%s954_s2 + $0x20] sm:$0xff]   ;;  %v812_v7 = vld [vmem:[%s954_s2 + $0x30] sm:$0xff]   ;;  %v813_v8 = vld [vmem:[%s954_s2 + $0x38] sm:$0xff]  }
   0x4   :  { %744 = vmatprep.subr.bf16.mxu0 %v807_v1  ;;  %v815_v9 = vld [vmem:[%s955_s1 + $0x8] sm:$0xff]   ;;  %v816_v10 = vld [vmem:[%s955_s1 + $0x10] sm:$0xff]   ;;  %v817_v11 = vld [vmem:[%s955_s1 + $0x18] sm:$0xff]  }
   0x5   :  { %v818_v12 = vld [vmem:[%s955_s1 + $0x20] sm:$0xff]   ;;  %v819_v13 = vld [vmem:[%s955_s1 + $0x28] sm:$0xff]   ;;  %v820_v14 = vld [vmem:[%s955_s1 + $0x30] sm:$0xff]  }
   0x6   :  { %v821_v15 = vld [vmem:[%s955_s1 + $0x38] sm:$0xff]   ;;  %v822_v16 = vld [vmem:[%s956_s0] sm:$0xff]   ;;  %v823_v41 = vld [vmem:[%s956_s0 + $0x8] sm:$0xff]  }
   0x7   :  { %745 = vmatpush3.bf16.msra.mxu0 %v807_v1  ;;  %790 = vmatprep.mubr.bf16.mxu1 %v822_v16  ;;  %v824_v42 = vld [vmem:[%s956_s0 + $0x10] sm:$0xff]   ;;  %v825_v43 = vld [vmem:[%s956_s0 + $0x18] sm:$0xff]   ;;  %v826_v44 = vld [vmem:[%s956_s0 + $0x20] sm:$0xff]  }
   0x8   :  { %746 = vmatprep.subr.bf16.mxu0 %v808_v2  ;;  %v827_v45 = vld [vmem:[%s956_s0 + $0x28] sm:$0xff]   ;;  %v828_v46 = vld [vmem:[%s956_s0 + $0x30] sm:$0xff]   ;;  %v829_v47 = vld [vmem:[%s956_s0 + $0x38] sm:$0xff]  }
   0x9   :  { %v630_v49 = vld [vmem:[%s957_s3] ss:$0 sm:$0xff] }
   0xb   :  { %747 = vmatpush3.bf16.msra.mxu0 %v808_v2 }
   0xc   :  { %748 = vmatprep.subr.bf16.mxu0 %v809_v3 }
   0xf   :  { %749 = vmatpush3.bf16.msra.mxu0 %v809_v3 }
  0x10   :  { %750 = vmatprep.subr.bf16.mxu0 %v810_v5 }
  0x13   :  { %751 = vmatpush3.bf16.msra.mxu0 %v810_v5 }
  0x14   :  { %752 = vmatprep.subr.bf16.mxu0 %v811_v6 }
  0x17   :  { %753 = vmatpush3.bf16.msra.mxu0 %v811_v6 }
  0x18   :  { %754 = vmatprep.subr.bf16.mxu0 %v812_v7 }
  0x1b   :  { %755 = vmatpush3.bf16.msra.mxu0 %v812_v7 }
  0x1c   :  { %756 = vmatprep.subr.bf16.mxu0 %v813_v8 }
  0x1f   :  { %757 = vmatpush3.bf16.msra.mxu0 %v813_v8 }
  0x22   :  { %759 = vmatmul.mubr.bf16.vlgmr.msra.gmra.mrb[0].mxu0 %v815_v9 }
  0x23   :  { %762 = vmatprep.mubr.bf16.mxu0 %v816_v10 }
  0x2a   :  { %763 = vmatmul.mubr.bf16.gmra.mrb[4].mxu0 %v817_v11 }
  0x2b   :  { %766 = vmatprep.mubr.bf16.mxu0 %v818_v12 }
  0x32   :  { %767 = vmatmul.mubr.bf16.gmra.mrb[8].mxu0 %v819_v13 }
  0x33   :  { %770 = vmatprep.mubr.bf16.mxu0 %v820_v14 }
  0x3a   :  { %771 = vmatmul.mubr.bf16.gmra.mrb[12].mxu0 %v821_v15 }
  0xf5   :  { %v760_v17 = vpop.f32.mrb[0].mxu0 }
  0xf6   :  { %v200_v18 = vpop.f32.mrb[1].mxu0 }
  0xf7   :  { %v761_v19 = vpop.f32.mrb[2].mxu0 }
  0xf8   :  { %v296_v20 = vpack.c.bf16 %v761_v19, %v760_v17  ;;  %v203_v21 = vpop.f32.mrb[3].mxu0 }
  0xf9   :  { %v295_v22 = vpack.c.bf16 %v203_v21, %v200_v18 }
  0xfb   :  { %774 = vmatprep.subr.bf16.mxu1 %v295_v22 }
  0xfc   :  { %775 = vmatpush3.bf16.msra.mxu1 %v295_v22 }
  0xfd   :  { %v764_v23 = vpop.f32.mrb[4].mxu0  ;;  %776 = vmatprep.subr.bf16.mxu1 %v296_v20 }
  0xfe   :  { %v216_v24 = vpop.f32.mrb[5].mxu0 }
  0xff   :  { %v765_v25 = vpop.f32.mrb[6].mxu0 }
 0x100   :  { %v298_v26 = vpack.c.bf16 %v765_v25, %v764_v23  ;;  %v219_v27 = vpop.f32.mrb[7].mxu0  ;;  %777 = vmatpush3.bf16.msra.mxu1 %v296_v20 }
 0x101   :  { %v297_v28 = vpack.c.bf16 %v219_v27, %v216_v24 }
 0x103   :  { %778 = vmatprep.subr.bf16.mxu1 %v297_v28 }
 0x104   :  { %779 = vmatpush3.bf16.msra.mxu1 %v297_v28 }
 0x105   :  { %v768_v29 = vpop.f32.mrb[8].mxu0  ;;  %780 = vmatprep.subr.bf16.mxu1 %v298_v26 }
 0x106   :  { %v232_v30 = vpop.f32.mrb[9].mxu0 }
 0x107   :  { %v769_v31 = vpop.f32.mrb[10].mxu0 }
 0x108   :  { %v300_v32 = vpack.c.bf16 %v769_v31, %v768_v29  ;;  %v235_v33 = vpop.f32.mrb[11].mxu0  ;;  %781 = vmatpush3.bf16.msra.mxu1 %v298_v26 }
 0x109   :  { %v299_v34 = vpack.c.bf16 %v235_v33, %v232_v30 }
 0x10b   :  { %782 = vmatprep.subr.bf16.mxu1 %v299_v34 }
 0x10c   :  { %783 = vmatpush3.bf16.msra.mxu1 %v299_v34 }
 0x10d   :  { %v772_v35 = vpop.f32.mrb[12].mxu0  ;;  %784 = vmatprep.subr.bf16.mxu1 %v300_v32 }
 0x10e   :  { %v248_v36 = vpop.f32.mrb[13].mxu0 }
 0x10f   :  { %v773_v37 = vpop.f32.mrb[14].mxu0 }
 0x110   :  { %v302_v38 = vpack.c.bf16 %v773_v37, %v772_v35  ;;  %v251_v39 = vpop.f32.mrb[15].mxu0  ;;  %785 = vmatpush3.bf16.msra.mxu1 %v300_v32 }
 0x111   :  { %v301_v40 = vpack.c.bf16 %v251_v39, %v248_v36 }
 0x113   :  { %786 = vmatprep.subr.bf16.mxu1 %v301_v40 }
 0x114   :  { %787 = vmatpush3.bf16.msra.mxu1 %v301_v40 }
 0x115   :  { %788 = vmatprep.subr.bf16.mxu1 %v302_v38 }
 0x118   :  { %789 = vmatpush3.bf16.msra.mxu1 %v302_v38 }
 0x11b   :  { %791 = vmatmul.mubr.bf16.vlgmr.msra.gmra.mrb[0].mxu1 %v823_v41 }
 0x11c   :  { %794 = vmatprep.mubr.bf16.mxu1 %v824_v42 }
 0x123   :  { %795 = vmatmul.mubr.bf16.gmra.mrb[4].mxu1 %v825_v43 }
 0x124   :  { %798 = vmatprep.mubr.bf16.mxu1 %v826_v44 }
 0x12b   :  { %799 = vmatmul.mubr.bf16.gmra.mrb[8].mxu1 %v827_v45 }
 0x12c   :  { %802 = vmatprep.mubr.bf16.mxu1 %v828_v46 }
 0x133   :  { %803 = vmatmul.mubr.bf16.gmra.mrb[12].mxu1 %v829_v47 }
 0x1ee   :  { %v792_v48 = vpop.f32.mrb[0].mxu1 }
 0x1ef   :  { %v385_v50 = vpop.f32.mrb[1].mxu1  ;;  %v508_v52 = vadd.f32 %v792_v48, %v630_v49 }
 0x1f0   :  { %v793_v51 = vpop.f32.mrb[2].mxu1  ;;  %v506_v55 = vadd.f32 %v630_v49, %v385_v50 }
 0x1f1   :  { %v509_v53 = vadd.f32 %v793_v51, %v630_v49  ;;  %v388_v54 = vpop.f32.mrb[3].mxu1 }
 0x1f2   :  { %v507_v56 = vadd.f32 %v630_v49, %v388_v54 }
 0x1f3   :  { %v671_v57 = vpack.c.bf16 %v509_v53, %v508_v52 }
 0x1f4   :  { %v666_v58 = vpack.c.bf16 %v507_v56, %v506_v55 }
 0x1f5   :  { %703 = vst [vmem:[%s958_s4 + $0x8] sm:$0xff] %v671_v57  }
 0x1f6   :  { %667 = vst [vmem:[%s958_s4] sm:$0xff] %v666_v58   ;;  %v796_v59 = vpop.f32.mrb[4].mxu1 }
 0x1f7   :  { %v401_v60 = vpop.f32.mrb[5].mxu1  ;;  %v512_v62 = vadd.f32 %v796_v59, %v630_v49 }
 0x1f8   :  { %v797_v61 = vpop.f32.mrb[6].mxu1  ;;  %v510_v1 = vadd.f32 %v630_v49, %v401_v60 }
 0x1f9   :  { %v513_v63 = vadd.f32 %v797_v61, %v630_v49  ;;  %v404_v0 = vpop.f32.mrb[7].mxu1 }
 0x1fa   :  { %v511_v2 = vadd.f32 %v630_v49, %v404_v0 }
 0x1fb   :  { %v681_v3 = vpack.c.bf16 %v513_v63, %v512_v62 }
 0x1fc   :  { %v676_v4 = vpack.c.bf16 %v511_v2, %v510_v1 }
 0x1fd   :  { %705 = vst [vmem:[%s958_s4 + $0x18] sm:$0xff] %v681_v3  }
 0x1fe   :  { %704 = vst [vmem:[%s958_s4 + $0x10] sm:$0xff] %v676_v4   ;;  %v800_v5 = vpop.f32.mrb[8].mxu1 }
 0x1ff   :  { %v417_v6 = vpop.f32.mrb[9].mxu1  ;;  %v516_v8 = vadd.f32 %v800_v5, %v630_v49 }
 0x200   :  { %v801_v7 = vpop.f32.mrb[10].mxu1  ;;  %v514_v11 = vadd.f32 %v630_v49, %v417_v6 }
 0x201   :  { %v517_v9 = vadd.f32 %v801_v7, %v630_v49  ;;  %v420_v10 = vpop.f32.mrb[11].mxu1 }
 0x202   :  { %v515_v12 = vadd.f32 %v630_v49, %v420_v10 }
 0x203   :  { %v691_v13 = vpack.c.bf16 %v517_v9, %v516_v8 }
 0x204   :  { %v686_v14 = vpack.c.bf16 %v515_v12, %v514_v11 }
 0x205   :  { %707 = vst [vmem:[%s958_s4 + $0x28] sm:$0xff] %v691_v13  }
 0x206   :  { %706 = vst [vmem:[%s958_s4 + $0x20] sm:$0xff] %v686_v14   ;;  %v804_v15 = vpop.f32.mrb[12].mxu1 }
 0x207   :  { %v433_v16 = vpop.f32.mrb[13].mxu1  ;;  %v520_v18 = vadd.f32 %v804_v15, %v630_v49 }
 0x208   :  { %v805_v17 = vpop.f32.mrb[14].mxu1  ;;  %v518_v21 = vadd.f32 %v630_v49, %v433_v16 }
 0x209   :  { %v521_v19 = vadd.f32 %v805_v17, %v630_v49  ;;  %v436_v20 = vpop.f32.mrb[15].mxu1 }
 0x20a   :  { %v519_v22 = vadd.f32 %v630_v49, %v436_v20 }
 0x20b   :  { %v701_v23 = vpack.c.bf16 %v521_v19, %v520_v18 }
 0x20c   :  { %v696_v24 = vpack.c.bf16 %v519_v22, %v518_v21 }
 0x20d   :  { %709 = vst [vmem:[%s958_s4 + $0x38] sm:$0xff] %v701_v23  }
 0x20e   :  { %708 = vst [vmem:[%s958_s4 + $0x30] sm:$0xff] %v696_v24  }

// kernel: forward.59
= control target key start
LH: loop header
LB: loop body
LE: loop exit
PB: predicated region body
PF: predicated region fallthrough
CT: control target
= control target key end

     0   :  { %s1123_s2 = inlined_call_operand.vmem [shape: bf16[128,128], index: 2, kind: input, shape index: {}]   ;;  %s1124_s1 = inlined_call_operand.vmem [shape: bf16[128,128], index: 1, kind: input, shape index: {}]   ;;  %s1125_s0 = inlined_call_operand.vmem [shape: bf16[128,128], index: 0, kind: input, shape index: {}]   ;;  %s1126_s3 = inlined_call_operand.vmem [shape: f32[1,128], index: 3, kind: input, shape index: {}]   ;;  %s1127_s4 = inlined_call_operand.vmem [shape: bf16[128,128], index: 4, kind: input, shape index: {}]   ;;  %s1128_s5 = inlined_call_operand.vmem [shape: bf16[128,128], index: 5, kind: output, shape index: {}]  }
   0x1   :  { %v928_v0 = vld [vmem:[%s1123_s2] sm:$0xff]   ;;  %v929_v1 = vld [vmem:[%s1123_s2 + $0x8] sm:$0xff]   ;;  %v930_v2 = vld [vmem:[%s1123_s2 + $0x10] sm:$0xff]  }
   0x2   :  { %864 = vmatprep.subr.bf16.mxu0 %v928_v0  ;;  %v931_v3 = vld [vmem:[%s1123_s2 + $0x18] sm:$0xff]   ;;  %v936_v4 = vld [vmem:[%s1124_s1] sm:$0xff]   ;;  %v933_v6 = vld [vmem:[%s1123_s2 + $0x28] sm:$0xff]  }
   0x3   :  { %865 = vmatpush3.bf16.msra.mxu0 %v928_v0  ;;  %880 = vmatprep.mubr.bf16.mxu0 %v936_v4  ;;  %v932_v5 = vld [vmem:[%s1123_s2 + $0x20] sm:$0xff]   ;;  %v934_v7 = vld [vmem:[%s1123_s2 + $0x30] sm:$0xff]   ;;  %v935_v8 = vld [vmem:[%s1123_s2 + $0x38] sm:$0xff]  }
   0x4   :  { %866 = vmatprep.subr.bf16.mxu0 %v929_v1  ;;  %v937_v9 = vld [vmem:[%s1124_s1 + $0x8] sm:$0xff]   ;;  %v938_v10 = vld [vmem:[%s1124_s1 + $0x10] sm:$0xff]   ;;  %v939_v11 = vld [vmem:[%s1124_s1 + $0x18] sm:$0xff]  }
   0x5   :  { %v940_v12 = vld [vmem:[%s1124_s1 + $0x20] sm:$0xff]   ;;  %v941_v13 = vld [vmem:[%s1124_s1 + $0x28] sm:$0xff]   ;;  %v942_v14 = vld [vmem:[%s1124_s1 + $0x30] sm:$0xff]  }
   0x6   :  { %v943_v15 = vld [vmem:[%s1124_s1 + $0x38] sm:$0xff]   ;;  %v944_v16 = vld [vmem:[%s1125_s0] sm:$0xff]   ;;  %v945_v41 = vld [vmem:[%s1125_s0 + $0x8] sm:$0xff]  }
   0x7   :  { %867 = vmatpush3.bf16.msra.mxu0 %v929_v1  ;;  %912 = vmatprep.mubr.bf16.mxu1 %v944_v16  ;;  %v946_v42 = vld [vmem:[%s1125_s0 + $0x10] sm:$0xff]   ;;  %v947_v43 = vld [vmem:[%s1125_s0 + $0x18] sm:$0xff]   ;;  %v948_v44 = vld [vmem:[%s1125_s0 + $0x20] sm:$0xff]  }
   0x8   :  { %868 = vmatprep.subr.bf16.mxu0 %v930_v2  ;;  %v949_v45 = vld [vmem:[%s1125_s0 + $0x28] sm:$0xff]   ;;  %v950_v46 = vld [vmem:[%s1125_s0 + $0x30] sm:$0xff]   ;;  %v951_v47 = vld [vmem:[%s1125_s0 + $0x38] sm:$0xff]  }
   0x9   :  { %v1057_v48 = vld [vmem:[%s1126_s3] ss:$0 sm:$0xff]  ;;  %v818_v49 = vld [vmem:[%s1127_s4 + $0x8] sm:$0xff]  }
   0xa   :  { %v747_v50 = vld [vmem:[%s1127_s4] sm:$0xff]   ;;  %v752_v53 = vunpack.c.l.bf16 %v818_v49  ;;  %v753_v60 = vunpack.c.h.bf16 %v818_v49 }
   0xb   :  { %869 = vmatpush3.bf16.msra.mxu0 %v930_v2  ;;  %v748_v56 = vunpack.c.l.bf16 %v747_v50  ;;  %v749_v0 = vunpack.c.h.bf16 %v747_v50 }
   0xc   :  { %870 = vmatprep.subr.bf16.mxu0 %v931_v3 }
   0xf   :  { %871 = vmatpush3.bf16.msra.mxu0 %v931_v3 }
  0x10   :  { %872 = vmatprep.subr.bf16.mxu0 %v932_v5 }
  0x13   :  { %873 = vmatpush3.bf16.msra.mxu0 %v932_v5  ;;  %v820_v5 = vld [vmem:[%s1127_s4 + $0x18] sm:$0xff]  }
  0x14   :  { %874 = vmatprep.subr.bf16.mxu0 %v933_v6 }
  0x17   :  { %875 = vmatpush3.bf16.msra.mxu0 %v933_v6 }
  0x18   :  { %876 = vmatprep.subr.bf16.mxu0 %v934_v7 }
  0x1b   :  { %877 = vmatpush3.bf16.msra.mxu0 %v934_v7  ;;  %v819_v7 = vld [vmem:[%s1127_s4 + $0x10] sm:$0xff]  }
  0x1c   :  { %878 = vmatprep.subr.bf16.mxu0 %v935_v8 }
  0x1f   :  { %879 = vmatpush3.bf16.msra.mxu0 %v935_v8 }
  0x22   :  { %881 = vmatmul.mubr.bf16.vlgmr.msra.gmra.mrb[0].mxu0 %v937_v9 }
  0x23   :  { %884 = vmatprep.mubr.bf16.mxu0 %v938_v10 }
  0x2a   :  { %885 = vmatmul.mubr.bf16.gmra.mrb[4].mxu0 %v939_v11 }
  0x2b   :  { %888 = vmatprep.mubr.bf16.mxu0 %v940_v12 }
  0x32   :  { %889 = vmatmul.mubr.bf16.gmra.mrb[8].mxu0 %v941_v13  ;;  %v760_v13 = vunpack.c.l.bf16 %v820_v5 }
  0x33   :  { %892 = vmatprep.mubr.bf16.mxu0 %v942_v14 }
  0x3a   :  { %893 = vmatmul.mubr.bf16.gmra.mrb[12].mxu0 %v943_v15 }
  0xf5   :  { %v882_v17 = vpop.f32.mrb[0].mxu0 }
  0xf6   :  { %v203_v18 = vpop.f32.mrb[1].mxu0 }
  0xf7   :  { %v883_v19 = vpop.f32.mrb[2].mxu0 }
  0xf8   :  { %v299_v20 = vpack.c.bf16 %v883_v19, %v882_v17  ;;  %v206_v21 = vpop.f32.mrb[3].mxu0 }
  0xf9   :  { %v298_v22 = vpack.c.bf16 %v206_v21, %v203_v18  ;;  %v756_v18 = vunpack.c.l.bf16 %v819_v7 }
  0xfb   :  { %896 = vmatprep.subr.bf16.mxu1 %v298_v22 }
  0xfc   :  { %897 = vmatpush3.bf16.msra.mxu1 %v298_v22 }
  0xfd   :  { %v886_v23 = vpop.f32.mrb[4].mxu0  ;;  %898 = vmatprep.subr.bf16.mxu1 %v299_v20 }
  0xfe   :  { %v219_v24 = vpop.f32.mrb[5].mxu0 }
  0xff   :  { %v887_v25 = vpop.f32.mrb[6].mxu0 }
 0x100   :  { %v301_v26 = vpack.c.bf16 %v887_v25, %v886_v23  ;;  %v222_v27 = vpop.f32.mrb[7].mxu0  ;;  %899 = vmatpush3.bf16.msra.mxu1 %v299_v20  ;;  %v761_v23 = vunpack.c.h.bf16 %v820_v5 }
 0x101   :  { %v300_v28 = vpack.c.bf16 %v222_v27, %v219_v24 }
 0x103   :  { %900 = vmatprep.subr.bf16.mxu1 %v300_v28 }
 0x104   :  { %901 = vmatpush3.bf16.msra.mxu1 %v300_v28  ;;  %v757_v28 = vunpack.c.h.bf16 %v819_v7 }
 0x105   :  { %v890_v29 = vpop.f32.mrb[8].mxu0  ;;  %902 = vmatprep.subr.bf16.mxu1 %v301_v26 }
 0x106   :  { %v235_v30 = vpop.f32.mrb[9].mxu0 }
 0x107   :  { %v891_v31 = vpop.f32.mrb[10].mxu0 }
 0x108   :  { %v303_v32 = vpack.c.bf16 %v891_v31, %v890_v29  ;;  %v238_v33 = vpop.f32.mrb[11].mxu0  ;;  %903 = vmatpush3.bf16.msra.mxu1 %v301_v26 }
 0x109   :  { %v302_v34 = vpack.c.bf16 %v238_v33, %v235_v30  ;;  %v822_v33 = vld [vmem:[%s1127_s4 + $0x28] sm:$0xff]  }
 0x10b   :  { %904 = vmatprep.subr.bf16.mxu1 %v302_v34 }
 0x10c   :  { %905 = vmatpush3.bf16.msra.mxu1 %v302_v34 }
 0x10d   :  { %v894_v35 = vpop.f32.mrb[12].mxu0  ;;  %906 = vmatprep.subr.bf16.mxu1 %v303_v32 }
 0x10e   :  { %v251_v36 = vpop.f32.mrb[13].mxu0 }
 0x10f   :  { %v895_v37 = vpop.f32.mrb[14].mxu0 }
 0x110   :  { %v305_v38 = vpack.c.bf16 %v895_v37, %v894_v35  ;;  %v254_v39 = vpop.f32.mrb[15].mxu0  ;;  %907 = vmatpush3.bf16.msra.mxu1 %v303_v32  ;;  %v821_v35 = vld [vmem:[%s1127_s4 + $0x20] sm:$0xff]  }
 0x111   :  { %v304_v40 = vpack.c.bf16 %v254_v39, %v251_v36 }
 0x113   :  { %908 = vmatprep.subr.bf16.mxu1 %v304_v40 }
 0x114   :  { %909 = vmatpush3.bf16.msra.mxu1 %v304_v40 }
 0x115   :  { %910 = vmatprep.subr.bf16.mxu1 %v305_v38 }
 0x118   :  { %911 = vmatpush3.bf16.msra.mxu1 %v305_v38 }
 0x11b   :  { %913 = vmatmul.mubr.bf16.vlgmr.msra.gmra.mrb[0].mxu1 %v945_v41  ;;  %v768_v41 = vunpack.c.l.bf16 %v822_v33 }
 0x11c   :  { %916 = vmatprep.mubr.bf16.mxu1 %v946_v42 }
 0x123   :  { %917 = vmatmul.mubr.bf16.gmra.mrb[4].mxu1 %v947_v43 }
 0x124   :  { %920 = vmatprep.mubr.bf16.mxu1 %v948_v44 }
 0x12b   :  { %921 = vmatmul.mubr.bf16.gmra.mrb[8].mxu1 %v949_v45 }
 0x12c   :  { %924 = vmatprep.mubr.bf16.mxu1 %v950_v46  ;;  %v764_v46 = vunpack.c.l.bf16 %v821_v35 }
 0x133   :  { %925 = vmatmul.mubr.bf16.gmra.mrb[12].mxu1 %v951_v47 }
 0x1ee   :  { %v914_v51 = vpop.f32.mrb[0].mxu1 }
 0x1ef   :  { %v511_v52 = vadd.f32 %v914_v51, %v1057_v48  ;;  %v388_v54 = vpop.f32.mrb[1].mxu1 }
 0x1f0   :  { %v509_v55 = vadd.f32 %v1057_v48, %v388_v54  ;;  %v915_v57 = vpop.f32.mrb[2].mxu1 }
 0x1f1   :  { %v527_v58 = vmax.f32 %v511_v52, 0.0  ;;  %v512_v59 = vadd.f32 %v915_v57, %v1057_v48  ;;  %v391_v61 = vpop.f32.mrb[3].mxu1  ;;  %v769_v52 = vunpack.c.h.bf16 %v822_v33  ;;  %v765_v57 = vunpack.c.h.bf16 %v821_v35 }
 0x1f2   :  { %v525_v62 = vmax.f32 %v509_v55, 0.0  ;;  %v510_v63 = vadd.f32 %v1057_v48, %v391_v61 }
 0x1f3   :  { %v575_v1 = vadd.f32 %v752_v53, %v527_v58  ;;  %v528_v2 = vmax.f32 %v512_v59, 0.0 }
 0x1f4   :  { %v573_v3 = vadd.f32 %v748_v56, %v525_v62  ;;  %v526_v4 = vmax.f32 %v510_v63, 0.0  ;;  %v824_v62 = vld [vmem:[%s1127_s4 + $0x38] sm:$0xff]  }
 0x1f5   :  { %v576_v6 = vadd.f32 %v753_v60, %v528_v2  ;;  %v591_v10 = vmax.f32 %v575_v1, 0.0 }
 0x1f6   :  { %v574_v8 = vadd.f32 %v749_v0, %v526_v4  ;;  %v918_v9 = vpop.f32.mrb[4].mxu1  ;;  %v589_v15 = vmax.f32 %v573_v3, 0.0  ;;  %v823_v0 = vld [vmem:[%s1127_s4 + $0x30] sm:$0xff]  }
 0x1f7   :  { %v592_v11 = vmax.f32 %v576_v6, 0.0  ;;  %v515_v12 = vadd.f32 %v918_v9, %v1057_v48  ;;  %v404_v14 = vpop.f32.mrb[5].mxu1  ;;  %v776_v6 = vunpack.c.l.bf16 %v824_v62 }
 0x1f8   :  { %v590_v16 = vmax.f32 %v574_v8, 0.0  ;;  %v513_v17 = vadd.f32 %v1057_v48, %v404_v14  ;;  %v919_v19 = vpop.f32.mrb[6].mxu1 }
 0x1f9   :  { %v786_v20 = vpack.c.bf16 %v592_v11, %v591_v10  ;;  %v531_v21 = vmax.f32 %v515_v12, 0.0  ;;  %v516_v22 = vadd.f32 %v919_v19, %v1057_v48  ;;  %v407_v24 = vpop.f32.mrb[7].mxu1  ;;  %v772_v11 = vunpack.c.l.bf16 %v823_v0 }
 0x1fa   :  { %v781_v25 = vpack.c.bf16 %v590_v16, %v589_v15  ;;  %v529_v26 = vmax.f32 %v513_v17, 0.0  ;;  %v514_v27 = vadd.f32 %v1057_v48, %v407_v24  ;;  %v777_v16 = vunpack.c.h.bf16 %v824_v62 }
 0x1fb   :  { %825 = vst [vmem:[%s1128_s5 + $0x8] sm:$0xff] %v786_v20   ;;  %v579_v29 = vadd.f32 %v760_v13, %v531_v21  ;;  %v532_v30 = vmax.f32 %v516_v22, 0.0  ;;  %v773_v21 = vunpack.c.h.bf16 %v823_v0 }
 0x1fc   :  { %782 = vst [vmem:[%s1128_s5] sm:$0xff] %v781_v25   ;;  %v577_v31 = vadd.f32 %v756_v18, %v529_v26  ;;  %v530_v32 = vmax.f32 %v514_v27, 0.0 }
 0x1fd   :  { %v580_v34 = vadd.f32 %v761_v23, %v532_v30  ;;  %v595_v38 = vmax.f32 %v579_v29, 0.0 }
 0x1fe   :  { %v578_v36 = vadd.f32 %v757_v28, %v530_v32  ;;  %v922_v37 = vpop.f32.mrb[8].mxu1  ;;  %v593_v43 = vmax.f32 %v577_v31, 0.0 }
 0x1ff   :  { %v596_v39 = vmax.f32 %v580_v34, 0.0  ;;  %v519_v40 = vadd.f32 %v922_v37, %v1057_v48  ;;  %v420_v42 = vpop.f32.mrb[9].mxu1 }
 0x200   :  { %v594_v44 = vmax.f32 %v578_v36, 0.0  ;;  %v517_v45 = vadd.f32 %v1057_v48, %v420_v42  ;;  %v923_v47 = vpop.f32.mrb[10].mxu1 }
 0x201   :  { %v796_v49 = vpack.c.bf16 %v596_v39, %v595_v38  ;;  %v535_v50 = vmax.f32 %v519_v40, 0.0  ;;  %v520_v51 = vadd.f32 %v923_v47, %v1057_v48  ;;  %v423_v53 = vpop.f32.mrb[11].mxu1 }
 0x202   :  { %v791_v54 = vpack.c.bf16 %v594_v44, %v593_v43  ;;  %v533_v55 = vmax.f32 %v517_v45, 0.0  ;;  %v518_v56 = vadd.f32 %v1057_v48, %v423_v53 }
 0x203   :  { %827 = vst [vmem:[%s1128_s5 + $0x18] sm:$0xff] %v796_v49   ;;  %v583_v58 = vadd.f32 %v768_v41, %v535_v50  ;;  %v536_v59 = vmax.f32 %v520_v51, 0.0 }
 0x204   :  { %826 = vst [vmem:[%s1128_s5 + $0x10] sm:$0xff] %v791_v54   ;;  %v581_v60 = vadd.f32 %v764_v46, %v533_v55  ;;  %v534_v61 = vmax.f32 %v518_v56, 0.0 }
 0x205   :  { %v584_v63 = vadd.f32 %v769_v52, %v536_v59  ;;  %v599_v3 = vmax.f32 %v583_v58, 0.0 }
 0x206   :  { %v582_v1 = vadd.f32 %v765_v57, %v534_v61  ;;  %v926_v2 = vpop.f32.mrb[12].mxu1  ;;  %v597_v8 = vmax.f32 %v581_v60, 0.0 }
 0x207   :  { %v600_v4 = vmax.f32 %v584_v63, 0.0  ;;  %v523_v5 = vadd.f32 %v926_v2, %v1057_v48  ;;  %v436_v7 = vpop.f32.mrb[13].mxu1 }
 0x208   :  { %v598_v9 = vmax.f32 %v582_v1, 0.0  ;;  %v521_v10 = vadd.f32 %v1057_v48, %v436_v7  ;;  %v927_v12 = vpop.f32.mrb[14].mxu1 }
 0x209   :  { %v806_v13 = vpack.c.bf16 %v600_v4, %v599_v3  ;;  %v539_v14 = vmax.f32 %v523_v5, 0.0  ;;  %v524_v15 = vadd.f32 %v927_v12, %v1057_v48  ;;  %v439_v17 = vpop.f32.mrb[15].mxu1 }
 0x20a   :  { %v801_v18 = vpack.c.bf16 %v598_v9, %v597_v8  ;;  %v537_v19 = vmax.f32 %v521_v10, 0.0  ;;  %v522_v20 = vadd.f32 %v1057_v48, %v439_v17 }
 0x20b   :  { %829 = vst [vmem:[%s1128_s5 + $0x28] sm:$0xff] %v806_v13   ;;  %v587_v22 = vadd.f32 %v776_v6, %v539_v14  ;;  %v540_v23 = vmax.f32 %v524_v15, 0.0 }
 0x20c   :  { %828 = vst [vmem:[%s1128_s5 + $0x20] sm:$0xff] %v801_v18   ;;  %v585_v24 = vadd.f32 %v772_v11, %v537_v19  ;;  %v538_v25 = vmax.f32 %v522_v20, 0.0 }
 0x20d   :  { %v588_v26 = vadd.f32 %v777_v16, %v540_v23  ;;  %v603_v28 = vmax.f32 %v587_v22, 0.0 }
 0x20e   :  { %v586_v27 = vadd.f32 %v773_v21, %v538_v25  ;;  %v601_v30 = vmax.f32 %v585_v24, 0.0 }
 0x20f   :  { %v604_v29 = vmax.f32 %v588_v26, 0.0 }
 0x210   :  { %v602_v31 = vmax.f32 %v586_v27, 0.0 }
 0x211   :  { %v816_v48 = vpack.c.bf16 %v604_v29, %v603_v28 }
 0x212   :  { %v811_v32 = vpack.c.bf16 %v602_v31, %v601_v30 }
 0x213   :  { %831 = vst [vmem:[%s1128_s5 + $0x38] sm:$0xff] %v816_v48  }
 0x214   :  { %830 = vst [vmem:[%s1128_s5 + $0x30] sm:$0xff] %v811_v32  }

// kernel: forward.55
= control target key start
LH: loop header
LB: loop body
LE: loop exit
PB: predicated region body
PF: predicated region fallthrough
CT: control target
= control target key end

     0   :  { %s835_s2 = inlined_call_operand.vmem [shape: bf16[128,128], index: 2, kind: input, shape index: {}]   ;;  %s836_s1 = inlined_call_operand.vmem [shape: bf16[128,128], index: 1, kind: input, shape index: {}]   ;;  %s837_s0 = inlined_call_operand.vmem [shape: bf16[128,128], index: 0, kind: input, shape index: {}]   ;;  %s838_s3 = inlined_call_operand.vmem [shape: f32[1,128], index: 3, kind: input, shape index: {}]   ;;  %s839_s4 = inlined_call_operand.vmem [shape: f32[128,128], index: 4, kind: output, shape index: {}]  }
   0x1   :  { %v663_v0 = vld [vmem:[%s835_s2] sm:$0xff]   ;;  %v664_v1 = vld [vmem:[%s835_s2 + $0x8] sm:$0xff]   ;;  %v665_v2 = vld [vmem:[%s835_s2 + $0x10] sm:$0xff]  }
   0x2   :  { %599 = vmatprep.subr.bf16.mxu0 %v663_v0  ;;  %v666_v3 = vld [vmem:[%s835_s2 + $0x18] sm:$0xff]   ;;  %v671_v4 = vld [vmem:[%s836_s1] sm:$0xff]   ;;  %v668_v6 = vld [vmem:[%s835_s2 + $0x28] sm:$0xff]  }
   0x3   :  { %600 = vmatpush3.bf16.msra.mxu0 %v663_v0  ;;  %615 = vmatprep.mubr.bf16.mxu0 %v671_v4  ;;  %v667_v5 = vld [vmem:[%s835_s2 + $0x20] sm:$0xff]   ;;  %v669_v7 = vld [vmem:[%s835_s2 + $0x30] sm:$0xff]   ;;  %v670_v8 = vld [vmem:[%s835_s2 + $0x38] sm:$0xff]  }
   0x4   :  { %601 = vmatprep.subr.bf16.mxu0 %v664_v1  ;;  %v672_v9 = vld [vmem:[%s836_s1 + $0x8] sm:$0xff]   ;;  %v673_v10 = vld [vmem:[%s836_s1 + $0x10] sm:$0xff]   ;;  %v674_v11 = vld [vmem:[%s836_s1 + $0x18] sm:$0xff]  }
   0x5   :  { %v675_v12 = vld [vmem:[%s836_s1 + $0x20] sm:$0xff]   ;;  %v676_v13 = vld [vmem:[%s836_s1 + $0x28] sm:$0xff]   ;;  %v677_v14 = vld [vmem:[%s836_s1 + $0x30] sm:$0xff]  }
   0x6   :  { %v678_v15 = vld [vmem:[%s836_s1 + $0x38] sm:$0xff]   ;;  %v679_v16 = vld [vmem:[%s837_s0] sm:$0xff]   ;;  %v680_v41 = vld [vmem:[%s837_s0 + $0x8] sm:$0xff]  }
   0x7   :  { %602 = vmatpush3.bf16.msra.mxu0 %v664_v1  ;;  %647 = vmatprep.mubr.bf16.mxu1 %v679_v16  ;;  %v681_v42 = vld [vmem:[%s837_s0 + $0x10] sm:$0xff]   ;;  %v682_v43 = vld [vmem:[%s837_s0 + $0x18] sm:$0xff]   ;;  %v683_v44 = vld [vmem:[%s837_s0 + $0x20] sm:$0xff]  }
   0x8   :  { %603 = vmatprep.subr.bf16.mxu0 %v665_v2  ;;  %v684_v45 = vld [vmem:[%s837_s0 + $0x28] sm:$0xff]   ;;  %v685_v46 = vld [vmem:[%s837_s0 + $0x30] sm:$0xff]   ;;  %v686_v47 = vld [vmem:[%s837_s0 + $0x38] sm:$0xff]  }
   0x9   :  { %v566_v48 = vld [vmem:[%s838_s3] ss:$0 sm:$0xff] }
   0xb   :  { %604 = vmatpush3.bf16.msra.mxu0 %v665_v2 }
   0xc   :  { %605 = vmatprep.subr.bf16.mxu0 %v666_v3 }
   0xf   :  { %606 = vmatpush3.bf16.msra.mxu0 %v666_v3 }
  0x10   :  { %607 = vmatprep.subr.bf16.mxu0 %v667_v5 }
  0x13   :  { %608 = vmatpush3.bf16.msra.mxu0 %v667_v5 }
  0x14   :  { %609 = vmatprep.subr.bf16.mxu0 %v668_v6 }
  0x17   :  { %610 = vmatpush3.bf16.msra.mxu0 %v668_v6 }
  0x18   :  { %611 = vmatprep.subr.bf16.mxu0 %v669_v7 }
  0x1b   :  { %612 = vmatpush3.bf16.msra.mxu0 %v669_v7 }
  0x1c   :  { %613 = vmatprep.subr.bf16.mxu0 %v670_v8 }
  0x1f   :  { %614 = vmatpush3.bf16.msra.mxu0 %v670_v8 }
  0x22   :  { %616 = vmatmul.mubr.bf16.vlgmr.msra.gmra.mrb[0].mxu0 %v672_v9 }
  0x23   :  { %619 = vmatprep.mubr.bf16.mxu0 %v673_v10 }
  0x2a   :  { %620 = vmatmul.mubr.bf16.gmra.mrb[4].mxu0 %v674_v11 }
  0x2b   :  { %623 = vmatprep.mubr.bf16.mxu0 %v675_v12 }
  0x32   :  { %624 = vmatmul.mubr.bf16.gmra.mrb[8].mxu0 %v676_v13 }
  0x33   :  { %627 = vmatprep.mubr.bf16.mxu0 %v677_v14 }
  0x3a   :  { %628 = vmatmul.mubr.bf16.gmra.mrb[12].mxu0 %v678_v15 }
  0xf5   :  { %v617_v17 = vpop.f32.mrb[0].mxu0 }
  0xf6   :  { %v200_v18 = vpop.f32.mrb[1].mxu0 }
  0xf7   :  { %v618_v19 = vpop.f32.mrb[2].mxu0 }
  0xf8   :  { %v296_v20 = vpack.c.bf16 %v618_v19, %v617_v17  ;;  %v203_v21 = vpop.f32.mrb[3].mxu0 }
  0xf9   :  { %v295_v22 = vpack.c.bf16 %v203_v21, %v200_v18 }
  0xfb   :  { %631 = vmatprep.subr.bf16.mxu1 %v295_v22 }
  0xfc   :  { %632 = vmatpush3.bf16.msra.mxu1 %v295_v22 }
  0xfd   :  { %v621_v23 = vpop.f32.mrb[4].mxu0  ;;  %633 = vmatprep.subr.bf16.mxu1 %v296_v20 }
  0xfe   :  { %v216_v24 = vpop.f32.mrb[5].mxu0 }
  0xff   :  { %v622_v25 = vpop.f32.mrb[6].mxu0 }
 0x100   :  { %v298_v26 = vpack.c.bf16 %v622_v25, %v621_v23  ;;  %v219_v27 = vpop.f32.mrb[7].mxu0  ;;  %634 = vmatpush3.bf16.msra.mxu1 %v296_v20 }
 0x101   :  { %v297_v28 = vpack.c.bf16 %v219_v27, %v216_v24 }
 0x103   :  { %635 = vmatprep.subr.bf16.mxu1 %v297_v28 }
 0x104   :  { %636 = vmatpush3.bf16.msra.mxu1 %v297_v28 }
 0x105   :  { %v625_v29 = vpop.f32.mrb[8].mxu0  ;;  %637 = vmatprep.subr.bf16.mxu1 %v298_v26 }
 0x106   :  { %v232_v30 = vpop.f32.mrb[9].mxu0 }
 0x107   :  { %v626_v31 = vpop.f32.mrb[10].mxu0 }
 0x108   :  { %v300_v32 = vpack.c.bf16 %v626_v31, %v625_v29  ;;  %v235_v33 = vpop.f32.mrb[11].mxu0  ;;  %638 = vmatpush3.bf16.msra.mxu1 %v298_v26 }
 0x109   :  { %v299_v34 = vpack.c.bf16 %v235_v33, %v232_v30 }
 0x10b   :  { %639 = vmatprep.subr.bf16.mxu1 %v299_v34 }
 0x10c   :  { %640 = vmatpush3.bf16.msra.mxu1 %v299_v34 }
 0x10d   :  { %v629_v35 = vpop.f32.mrb[12].mxu0  ;;  %641 = vmatprep.subr.bf16.mxu1 %v300_v32 }
 0x10e   :  { %v248_v36 = vpop.f32.mrb[13].mxu0 }
 0x10f   :  { %v630_v37 = vpop.f32.mrb[14].mxu0 }
 0x110   :  { %v302_v38 = vpack.c.bf16 %v630_v37, %v629_v35  ;;  %v251_v39 = vpop.f32.mrb[15].mxu0  ;;  %642 = vmatpush3.bf16.msra.mxu1 %v300_v32 }
 0x111   :  { %v301_v40 = vpack.c.bf16 %v251_v39, %v248_v36 }
 0x113   :  { %643 = vmatprep.subr.bf16.mxu1 %v301_v40 }
 0x114   :  { %644 = vmatpush3.bf16.msra.mxu1 %v301_v40 }
 0x115   :  { %645 = vmatprep.subr.bf16.mxu1 %v302_v38 }
 0x118   :  { %646 = vmatpush3.bf16.msra.mxu1 %v302_v38 }
 0x11b   :  { %648 = vmatmul.mubr.bf16.vlgmr.msra.gmra.mrb[0].mxu1 %v680_v41 }
 0x11c   :  { %651 = vmatprep.mubr.bf16.mxu1 %v681_v42 }
 0x123   :  { %652 = vmatmul.mubr.bf16.gmra.mrb[4].mxu1 %v682_v43 }
 0x124   :  { %655 = vmatprep.mubr.bf16.mxu1 %v683_v44 }
 0x12b   :  { %656 = vmatmul.mubr.bf16.gmra.mrb[8].mxu1 %v684_v45 }
 0x12c   :  { %659 = vmatprep.mubr.bf16.mxu1 %v685_v46 }
 0x133   :  { %660 = vmatmul.mubr.bf16.gmra.mrb[12].mxu1 %v686_v47 }
 0x1ee   :  { %v649_v49 = vpop.f32.mrb[0].mxu1 }
 0x1ef   :  { %v508_v50 = vadd.f32 %v649_v49, %v566_v48  ;;  %v385_v51 = vpop.f32.mrb[1].mxu1 }
 0x1f0   :  { %v506_v52 = vadd.f32 %v566_v48, %v385_v51  ;;  %v650_v53 = vpop.f32.mrb[2].mxu1 }
 0x1f1   :  { %524 = vst [vmem:[%s839_s4 + $0x10] sm:$0xff] %v508_v50  ;;  %v509_v54 = vadd.f32 %v650_v53, %v566_v48  ;;  %v388_v55 = vpop.f32.mrb[3].mxu1 }
 0x1f2   :  { %522 = vst [vmem:[%s839_s4] sm:$0xff] %v506_v52  ;;  %v507_v56 = vadd.f32 %v566_v48, %v388_v55 }
 0x1f3   :  { %525 = vst [vmem:[%s839_s4 + $0x18] sm:$0xff] %v509_v54 }
 0x1f4   :  { %523 = vst [vmem:[%s839_s4 + $0x8] sm:$0xff] %v507_v56 }
 0x1f6   :  { %v653_v57 = vpop.f32.mrb[4].mxu1 }
 0x1f7   :  { %v512_v58 = vadd.f32 %v653_v57, %v566_v48  ;;  %v401_v59 = vpop.f32.mrb[5].mxu1 }
 0x1f8   :  { %v510_v60 = vadd.f32 %v566_v48, %v401_v59  ;;  %v654_v61 = vpop.f32.mrb[6].mxu1 }
 0x1f9   :  { %528 = vst [vmem:[%s839_s4 + $0x30] sm:$0xff] %v512_v58  ;;  %v513_v62 = vadd.f32 %v654_v61, %v566_v48  ;;  %v404_v63 = vpop.f32.mrb[7].mxu1 }
 0x1fa   :  { %526 = vst [vmem:[%s839_s4 + $0x20] sm:$0xff] %v510_v60  ;;  %v511_v0 = vadd.f32 %v566_v48, %v404_v63 }
 0x1fb   :  { %529 = vst [vmem:[%s839_s4 + $0x38] sm:$0xff] %v513_v62 }
 0x1fc   :  { %527 = vst [vmem:[%s839_s4 + $0x28] sm:$0xff] %v511_v0 }
 0x1fe   :  { %v657_v1 = vpop.f32.mrb[8].mxu1 }
 0x1ff   :  { %v516_v2 = vadd.f32 %v657_v1, %v566_v48  ;;  %v417_v3 = vpop.f32.mrb[9].mxu1 }
 0x200   :  { %v514_v4 = vadd.f32 %v566_v48, %v417_v3  ;;  %v658_v5 = vpop.f32.mrb[10].mxu1 }
 0x201   :  { %532 = vst [vmem:[%s839_s4 + $0x50] sm:$0xff] %v516_v2  ;;  %v517_v6 = vadd.f32 %v658_v5, %v566_v48  ;;  %v420_v7 = vpop.f32.mrb[11].mxu1 }
 0x202   :  { %530 = vst [vmem:[%s839_s4 + $0x40] sm:$0xff] %v514_v4  ;;  %v515_v8 = vadd.f32 %v566_v48, %v420_v7 }
 0x203   :  { %533 = vst [vmem:[%s839_s4 + $0x58] sm:$0xff] %v517_v6 }
 0x204   :  { %531 = vst [vmem:[%s839_s4 + $0x48] sm:$0xff] %v515_v8 }
 0x206   :  { %v661_v9 = vpop.f32.mrb[12].mxu1 }
 0x207   :  { %v520_v10 = vadd.f32 %v661_v9, %v566_v48  ;;  %v433_v11 = vpop.f32.mrb[13].mxu1 }
 0x208   :  { %v518_v12 = vadd.f32 %v566_v48, %v433_v11  ;;  %v662_v13 = vpop.f32.mrb[14].mxu1 }
 0x209   :  { %536 = vst [vmem:[%s839_s4 + $0x70] sm:$0xff] %v520_v10  ;;  %v521_v14 = vadd.f32 %v662_v13, %v566_v48  ;;  %v436_v15 = vpop.f32.mrb[15].mxu1 }
 0x20a   :  { %534 = vst [vmem:[%s839_s4 + $0x60] sm:$0xff] %v518_v12  ;;  %v519_v16 = vadd.f32 %v566_v48, %v436_v15 }
 0x20b   :  { %537 = vst [vmem:[%s839_s4 + $0x78] sm:$0xff] %v521_v14 }
 0x20c   :  { %535 = vst [vmem:[%s839_s4 + $0x68] sm:$0xff] %v519_v16 }

// kernel: forward.65
= control target key start
LH: loop header
LB: loop body
LE: loop exit
PB: predicated region body
PF: predicated region fallthrough
CT: control target
= control target key end

     0   :  { %s1004_s2 = inlined_call_operand.vmem [shape: bf16[128,128], index: 2, kind: input, shape index: {}]   ;;  %s1005_s1 = inlined_call_operand.vmem [shape: bf16[128,128], index: 1, kind: input, shape index: {}]   ;;  %s1006_s0 = inlined_call_operand.vmem [shape: bf16[128,128], index: 0, kind: input, shape index: {}]   ;;  %s1007_s3 = inlined_call_operand.vmem [shape: f32[1,128], index: 3, kind: input, shape index: {}]   ;;  %s1008_s4 = inlined_call_operand.vmem [shape: bf16[128,128], index: 4, kind: output, shape index: {}]  }
   0x1   :  { %v838_v0 = vld [vmem:[%s1004_s2] sm:$0xff]   ;;  %v839_v1 = vld [vmem:[%s1004_s2 + $0x8] sm:$0xff]   ;;  %v840_v2 = vld [vmem:[%s1004_s2 + $0x10] sm:$0xff]  }
   0x2   :  { %774 = vmatprep.subr.bf16.mxu0 %v838_v0  ;;  %v841_v3 = vld [vmem:[%s1004_s2 + $0x18] sm:$0xff]   ;;  %v846_v4 = vld [vmem:[%s1005_s1] sm:$0xff]   ;;  %v843_v6 = vld [vmem:[%s1004_s2 + $0x28] sm:$0xff]  }
   0x3   :  { %775 = vmatpush3.bf16.msra.mxu0 %v838_v0  ;;  %790 = vmatprep.mubr.bf16.mxu0 %v846_v4  ;;  %v842_v5 = vld [vmem:[%s1004_s2 + $0x20] sm:$0xff]   ;;  %v844_v7 = vld [vmem:[%s1004_s2 + $0x30] sm:$0xff]   ;;  %v845_v8 = vld [vmem:[%s1004_s2 + $0x38] sm:$0xff]  }
   0x4   :  { %776 = vmatprep.subr.bf16.mxu0 %v839_v1  ;;  %v847_v9 = vld [vmem:[%s1005_s1 + $0x8] sm:$0xff]   ;;  %v848_v10 = vld [vmem:[%s1005_s1 + $0x10] sm:$0xff]   ;;  %v849_v11 = vld [vmem:[%s1005_s1 + $0x18] sm:$0xff]  }
   0x5   :  { %v850_v12 = vld [vmem:[%s1005_s1 + $0x20] sm:$0xff]   ;;  %v851_v13 = vld [vmem:[%s1005_s1 + $0x28] sm:$0xff]   ;;  %v852_v14 = vld [vmem:[%s1005_s1 + $0x30] sm:$0xff]  }
   0x6   :  { %v853_v15 = vld [vmem:[%s1005_s1 + $0x38] sm:$0xff]   ;;  %v854_v16 = vld [vmem:[%s1006_s0] sm:$0xff]   ;;  %v855_v41 = vld [vmem:[%s1006_s0 + $0x8] sm:$0xff]  }
   0x7   :  { %777 = vmatpush3.bf16.msra.mxu0 %v839_v1  ;;  %822 = vmatprep.mubr.bf16.mxu1 %v854_v16  ;;  %v856_v42 = vld [vmem:[%s1006_s0 + $0x10] sm:$0xff]   ;;  %v857_v43 = vld [vmem:[%s1006_s0 + $0x18] sm:$0xff]   ;;  %v858_v44 = vld [vmem:[%s1006_s0 + $0x20] sm:$0xff]  }
   0x8   :  { %778 = vmatprep.subr.bf16.mxu0 %v840_v2  ;;  %v859_v45 = vld [vmem:[%s1006_s0 + $0x28] sm:$0xff]   ;;  %v860_v46 = vld [vmem:[%s1006_s0 + $0x30] sm:$0xff]   ;;  %v861_v47 = vld [vmem:[%s1006_s0 + $0x38] sm:$0xff]  }
   0x9   :  { %v962_v48 = vld [vmem:[%s1007_s3] ss:$0 sm:$0xff] }
   0xb   :  { %779 = vmatpush3.bf16.msra.mxu0 %v840_v2 }
   0xc   :  { %780 = vmatprep.subr.bf16.mxu0 %v841_v3 }
   0xf   :  { %781 = vmatpush3.bf16.msra.mxu0 %v841_v3 }
  0x10   :  { %782 = vmatprep.subr.bf16.mxu0 %v842_v5 }
  0x13   :  { %783 = vmatpush3.bf16.msra.mxu0 %v842_v5 }
  0x14   :  { %784 = vmatprep.subr.bf16.mxu0 %v843_v6 }
  0x17   :  { %785 = vmatpush3.bf16.msra.mxu0 %v843_v6 }
  0x18   :  { %786 = vmatprep.subr.bf16.mxu0 %v844_v7 }
  0x1b   :  { %787 = vmatpush3.bf16.msra.mxu0 %v844_v7 }
  0x1c   :  { %788 = vmatprep.subr.bf16.mxu0 %v845_v8 }
  0x1f   :  { %789 = vmatpush3.bf16.msra.mxu0 %v845_v8 }
  0x22   :  { %791 = vmatmul.mubr.bf16.vlgmr.msra.gmra.mrb[0].mxu0 %v847_v9 }
  0x23   :  { %794 = vmatprep.mubr.bf16.mxu0 %v848_v10 }
  0x2a   :  { %795 = vmatmul.mubr.bf16.gmra.mrb[4].mxu0 %v849_v11 }
  0x2b   :  { %798 = vmatprep.mubr.bf16.mxu0 %v850_v12 }
  0x32   :  { %799 = vmatmul.mubr.bf16.gmra.mrb[8].mxu0 %v851_v13 }
  0x33   :  { %802 = vmatprep.mubr.bf16.mxu0 %v852_v14 }
  0x3a   :  { %803 = vmatmul.mubr.bf16.gmra.mrb[12].mxu0 %v853_v15 }
  0xf5   :  { %v792_v17 = vpop.f32.mrb[0].mxu0 }
  0xf6   :  { %v200_v18 = vpop.f32.mrb[1].mxu0 }
  0xf7   :  { %v793_v19 = vpop.f32.mrb[2].mxu0 }
  0xf8   :  { %v296_v20 = vpack.c.bf16 %v793_v19, %v792_v17  ;;  %v203_v21 = vpop.f32.mrb[3].mxu0 }
  0xf9   :  { %v295_v22 = vpack.c.bf16 %v203_v21, %v200_v18 }
  0xfb   :  { %806 = vmatprep.subr.bf16.mxu1 %v295_v22 }
  0xfc   :  { %807 = vmatpush3.bf16.msra.mxu1 %v295_v22 }
  0xfd   :  { %v796_v23 = vpop.f32.mrb[4].mxu0  ;;  %808 = vmatprep.subr.bf16.mxu1 %v296_v20 }
  0xfe   :  { %v216_v24 = vpop.f32.mrb[5].mxu0 }
  0xff   :  { %v797_v25 = vpop.f32.mrb[6].mxu0 }
 0x100   :  { %v298_v26 = vpack.c.bf16 %v797_v25, %v796_v23  ;;  %v219_v27 = vpop.f32.mrb[7].mxu0  ;;  %809 = vmatpush3.bf16.msra.mxu1 %v296_v20 }
 0x101   :  { %v297_v28 = vpack.c.bf16 %v219_v27, %v216_v24 }
 0x103   :  { %810 = vmatprep.subr.bf16.mxu1 %v297_v28 }
 0x104   :  { %811 = vmatpush3.bf16.msra.mxu1 %v297_v28 }
 0x105   :  { %v800_v29 = vpop.f32.mrb[8].mxu0  ;;  %812 = vmatprep.subr.bf16.mxu1 %v298_v26 }
 0x106   :  { %v232_v30 = vpop.f32.mrb[9].mxu0 }
 0x107   :  { %v801_v31 = vpop.f32.mrb[10].mxu0 }
 0x108   :  { %v300_v32 = vpack.c.bf16 %v801_v31, %v800_v29  ;;  %v235_v33 = vpop.f32.mrb[11].mxu0  ;;  %813 = vmatpush3.bf16.msra.mxu1 %v298_v26 }
 0x109   :  { %v299_v34 = vpack.c.bf16 %v235_v33, %v232_v30 }
 0x10b   :  { %814 = vmatprep.subr.bf16.mxu1 %v299_v34 }
 0x10c   :  { %815 = vmatpush3.bf16.msra.mxu1 %v299_v34 }
 0x10d   :  { %v804_v35 = vpop.f32.mrb[12].mxu0  ;;  %816 = vmatprep.subr.bf16.mxu1 %v300_v32 }
 0x10e   :  { %v248_v36 = vpop.f32.mrb[13].mxu0 }
 0x10f   :  { %v805_v37 = vpop.f32.mrb[14].mxu0 }
 0x110   :  { %v302_v38 = vpack.c.bf16 %v805_v37, %v804_v35  ;;  %v251_v39 = vpop.f32.mrb[15].mxu0  ;;  %817 = vmatpush3.bf16.msra.mxu1 %v300_v32 }
 0x111   :  { %v301_v40 = vpack.c.bf16 %v251_v39, %v248_v36 }
 0x113   :  { %818 = vmatprep.subr.bf16.mxu1 %v301_v40 }
 0x114   :  { %819 = vmatpush3.bf16.msra.mxu1 %v301_v40 }
 0x115   :  { %820 = vmatprep.subr.bf16.mxu1 %v302_v38 }
 0x118   :  { %821 = vmatpush3.bf16.msra.mxu1 %v302_v38 }
 0x11b   :  { %823 = vmatmul.mubr.bf16.vlgmr.msra.gmra.mrb[0].mxu1 %v855_v41 }
 0x11c   :  { %826 = vmatprep.mubr.bf16.mxu1 %v856_v42 }
 0x123   :  { %827 = vmatmul.mubr.bf16.gmra.mrb[4].mxu1 %v857_v43 }
 0x124   :  { %830 = vmatprep.mubr.bf16.mxu1 %v858_v44 }
 0x12b   :  { %831 = vmatmul.mubr.bf16.gmra.mrb[8].mxu1 %v859_v45 }
 0x12c   :  { %834 = vmatprep.mubr.bf16.mxu1 %v860_v46 }
 0x133   :  { %835 = vmatmul.mubr.bf16.gmra.mrb[12].mxu1 %v861_v47 }
 0x1ee   :  { %v824_v49 = vpop.f32.mrb[0].mxu1 }
 0x1ef   :  { %v508_v50 = vadd.f32 %v824_v49, %v962_v48  ;;  %v385_v51 = vpop.f32.mrb[1].mxu1 }
 0x1f0   :  { %v506_v52 = vadd.f32 %v962_v48, %v385_v51  ;;  %v825_v53 = vpop.f32.mrb[2].mxu1 }
 0x1f1   :  { %v524_v54 = vmax.f32 %v508_v50, 0.0  ;;  %v509_v55 = vadd.f32 %v825_v53, %v962_v48  ;;  %v388_v56 = vpop.f32.mrb[3].mxu1 }
 0x1f2   :  { %v522_v57 = vmax.f32 %v506_v52, 0.0  ;;  %v507_v58 = vadd.f32 %v962_v48, %v388_v56 }
 0x1f3   :  { %v525_v59 = vmax.f32 %v509_v55, 0.0  ;;  %v540_v61 = vmax.f32 %v524_v54, 0.0 }
 0x1f4   :  { %v523_v60 = vmax.f32 %v507_v58, 0.0  ;;  %v538_v63 = vmax.f32 %v522_v57, 0.0 }
 0x1f5   :  { %v541_v62 = vmax.f32 %v525_v59, 0.0 }
 0x1f6   :  { %v539_v0 = vmax.f32 %v523_v60, 0.0  ;;  %v828_v1 = vpop.f32.mrb[4].mxu1 }
 0x1f7   :  { %v703_v2 = vpack.c.bf16 %v541_v62, %v540_v61  ;;  %v512_v3 = vadd.f32 %v828_v1, %v962_v48  ;;  %v401_v4 = vpop.f32.mrb[5].mxu1 }
 0x1f8   :  { %v698_v5 = vpack.c.bf16 %v539_v0, %v538_v63  ;;  %v510_v6 = vadd.f32 %v962_v48, %v401_v4  ;;  %v829_v7 = vpop.f32.mrb[6].mxu1 }
 0x1f9   :  { %735 = vst [vmem:[%s1008_s4 + $0x8] sm:$0xff] %v703_v2   ;;  %v528_v8 = vmax.f32 %v512_v3, 0.0  ;;  %v513_v9 = vadd.f32 %v829_v7, %v962_v48  ;;  %v404_v10 = vpop.f32.mrb[7].mxu1 }
 0x1fa   :  { %699 = vst [vmem:[%s1008_s4] sm:$0xff] %v698_v5   ;;  %v526_v11 = vmax.f32 %v510_v6, 0.0  ;;  %v511_v12 = vadd.f32 %v962_v48, %v404_v10 }
 0x1fb   :  { %v529_v13 = vmax.f32 %v513_v9, 0.0  ;;  %v544_v15 = vmax.f32 %v528_v8, 0.0 }
 0x1fc   :  { %v527_v14 = vmax.f32 %v511_v12, 0.0  ;;  %v542_v17 = vmax.f32 %v526_v11, 0.0 }
 0x1fd   :  { %v545_v16 = vmax.f32 %v529_v13, 0.0 }
 0x1fe   :  { %v543_v18 = vmax.f32 %v527_v14, 0.0  ;;  %v832_v19 = vpop.f32.mrb[8].mxu1 }
 0x1ff   :  { %v713_v20 = vpack.c.bf16 %v545_v16, %v544_v15  ;;  %v516_v21 = vadd.f32 %v832_v19, %v962_v48  ;;  %v417_v22 = vpop.f32.mrb[9].mxu1 }
 0x200   :  { %v708_v23 = vpack.c.bf16 %v543_v18, %v542_v17  ;;  %v514_v24 = vadd.f32 %v962_v48, %v417_v22  ;;  %v833_v25 = vpop.f32.mrb[10].mxu1 }
 0x201   :  { %737 = vst [vmem:[%s1008_s4 + $0x18] sm:$0xff] %v713_v20   ;;  %v532_v26 = vmax.f32 %v516_v21, 0.0  ;;  %v517_v27 = vadd.f32 %v833_v25, %v962_v48  ;;  %v420_v28 = vpop.f32.mrb[11].mxu1 }
 0x202   :  { %736 = vst [vmem:[%s1008_s4 + $0x10] sm:$0xff] %v708_v23   ;;  %v530_v29 = vmax.f32 %v514_v24, 0.0  ;;  %v515_v30 = vadd.f32 %v962_v48, %v420_v28 }
 0x203   :  { %v533_v31 = vmax.f32 %v517_v27, 0.0  ;;  %v548_v33 = vmax.f32 %v532_v26, 0.0 }
 0x204   :  { %v531_v32 = vmax.f32 %v515_v30, 0.0  ;;  %v546_v35 = vmax.f32 %v530_v29, 0.0 }
 0x205   :  { %v549_v34 = vmax.f32 %v533_v31, 0.0 }
 0x206   :  { %v547_v36 = vmax.f32 %v531_v32, 0.0  ;;  %v836_v37 = vpop.f32.mrb[12].mxu1 }
 0x207   :  { %v723_v38 = vpack.c.bf16 %v549_v34, %v548_v33  ;;  %v520_v39 = vadd.f32 %v836_v37, %v962_v48  ;;  %v433_v40 = vpop.f32.mrb[13].mxu1 }
 0x208   :  { %v718_v41 = vpack.c.bf16 %v547_v36, %v546_v35  ;;  %v518_v42 = vadd.f32 %v962_v48, %v433_v40  ;;  %v837_v43 = vpop.f32.mrb[14].mxu1 }
 0x209   :  { %739 = vst [vmem:[%s1008_s4 + $0x28] sm:$0xff] %v723_v38   ;;  %v536_v44 = vmax.f32 %v520_v39, 0.0  ;;  %v521_v45 = vadd.f32 %v837_v43, %v962_v48  ;;  %v436_v46 = vpop.f32.mrb[15].mxu1 }
 0x20a   :  { %738 = vst [vmem:[%s1008_s4 + $0x20] sm:$0xff] %v718_v41   ;;  %v534_v47 = vmax.f32 %v518_v42, 0.0  ;;  %v519_v49 = vadd.f32 %v962_v48, %v436_v46 }
 0x20b   :  { %v537_v50 = vmax.f32 %v521_v45, 0.0  ;;  %v552_v52 = vmax.f32 %v536_v44, 0.0 }
 0x20c   :  { %v535_v51 = vmax.f32 %v519_v49, 0.0  ;;  %v550_v54 = vmax.f32 %v534_v47, 0.0 }
 0x20d   :  { %v553_v53 = vmax.f32 %v537_v50, 0.0 }
 0x20e   :  { %v551_v55 = vmax.f32 %v535_v51, 0.0 }
 0x20f   :  { %v733_v56 = vpack.c.bf16 %v553_v53, %v552_v52 }
 0x210   :  { %v728_v57 = vpack.c.bf16 %v551_v55, %v550_v54 }
 0x211   :  { %741 = vst [vmem:[%s1008_s4 + $0x38] sm:$0xff] %v733_v56  }
 0x212   :  { %740 = vst [vmem:[%s1008_s4 + $0x30] sm:$0xff] %v728_v57  }

// kernel: forward.66
= control target key start
LH: loop header
LB: loop body
LE: loop exit
PB: predicated region body
PF: predicated region fallthrough
CT: control target
= control target key end

     0   :  { %s939_s2 = inlined_call_operand.vmem [shape: bf16[128,128], index: 2, kind: input, shape index: {}]   ;;  %s940_s1 = inlined_call_operand.vmem [shape: bf16[128,128], index: 1, kind: input, shape index: {}]   ;;  %s941_s4 = inlined_call_operand.vmem [shape: bf16[128,128], index: 4, kind: input, shape index: {}]   ;;  %s942_s0 = inlined_call_operand.vmem [shape: bf16[128,128], index: 0, kind: input, shape index: {}]   ;;  %s943_s3 = inlined_call_operand.vmem [shape: f32[1,128], index: 3, kind: input, shape index: {}]   ;;  %s944_s5 = inlined_call_operand.vmem [shape: f32[128,128], index: 5, kind: output, shape index: {}]  }
   0x1   :  { %v698_v0 = vld [vmem:[%s939_s2] sm:$0xff]   ;;  %v699_v1 = vld [vmem:[%s939_s2 + $0x8] sm:$0xff]   ;;  %v700_v2 = vld [vmem:[%s939_s2 + $0x10] sm:$0xff]  }
   0x2   :  { %634 = vmatprep.subr.bf16.mxu0 %v698_v0  ;;  %v701_v3 = vld [vmem:[%s939_s2 + $0x18] sm:$0xff]   ;;  %v41_v4 = vld [vmem:[%s940_s1] sm:$0xf]  ;;  %v42_v5 = vld [vmem:[%s940_s1 + $0x4] sm:$0xf] }
   0x3   :  { %635 = vmatpush3.bf16.msra.mxu0 %v698_v0  ;;  %v57_v6 = vld [vmem:[%s941_s4] sm:$0xf]  ;;  %v58_v7 = vld [vmem:[%s941_s4 + $0x4] sm:$0xf]  ;;  %v703_v12 = vld [vmem:[%s939_s2 + $0x28] sm:$0xff]  }
   0x4   :  { %636 = vmatprep.subr.bf16.mxu0 %v699_v1  ;;  %v73_v8 = vmul.bf16 %v57_v6, %v41_v4  ;;  %v74_v9 = vmul.bf16 %v58_v7, %v42_v5  ;;  %v702_v10 = vld [vmem:[%s939_s2 + $0x20] sm:$0xff]   ;;  %v704_v13 = vld [vmem:[%s939_s2 + $0x30] sm:$0xff]   ;;  %v705_v14 = vld [vmem:[%s939_s2 + $0x38] sm:$0xff]  }
   0x5   :  { %v43_v15 = vld [vmem:[%s940_s1 + $0x8] sm:$0xf]  ;;  %v44_v16 = vld [vmem:[%s940_s1 + $0xc] sm:$0xf]  ;;  %v45_v19 = vld [vmem:[%s940_s1 + $0x10] sm:$0xf] }
   0x6   :  { %v577_v11 = vcombine.low %v73_v8, %v74_v9  ;;  %v59_v17 = vld [vmem:[%s941_s4 + $0x8] sm:$0xf]  ;;  %v60_v18 = vld [vmem:[%s941_s4 + $0xc] sm:$0xf]  ;;  %v46_v20 = vld [vmem:[%s940_s1 + $0x14] sm:$0xf] }
   0x7   :  { %637 = vmatpush3.bf16.msra.mxu0 %v699_v1  ;;  %v61_v21 = vld [vmem:[%s941_s4 + $0x10] sm:$0xf]  ;;  %v62_v22 = vld [vmem:[%s941_s4 + $0x14] sm:$0xf]  ;;  %v75_v23 = vmul.bf16 %v59_v17, %v43_v15  ;;  %v76_v24 = vmul.bf16 %v60_v18, %v44_v16  ;;  %v47_v28 = vld [vmem:[%s940_s1 + $0x18] sm:$0xf] }
   0x8   :  { %638 = vmatprep.subr.bf16.mxu0 %v700_v2  ;;  %650 = vmatprep.mubr.bf16.mxu0 %v577_v11  ;;  %v77_v25 = vmul.bf16 %v61_v21, %v45_v19  ;;  %v78_v26 = vmul.bf16 %v62_v22, %v46_v20  ;;  %v48_v29 = vld [vmem:[%s940_s1 + $0x1c] sm:$0xf]  ;;  %v63_v31 = vld [vmem:[%s941_s4 + $0x18] sm:$0xf]  ;;  %v49_v33 = vld [vmem:[%s940_s1 + $0x20] sm:$0xf] }
   0x9   :  { %v578_v27 = vcombine.low %v75_v23, %v76_v24  ;;  %v64_v32 = vld [vmem:[%s941_s4 + $0x1c] sm:$0xf]  ;;  %v50_v34 = vld [vmem:[%s940_s1 + $0x24] sm:$0xf]  ;;  %v65_v35 = vld [vmem:[%s941_s4 + $0x20] sm:$0xf]  ;;  %v79_v37 = vmul.bf16 %v63_v31, %v47_v28 }
   0xa   :  { %v579_v30 = vcombine.low %v77_v25, %v78_v26  ;;  %v66_v36 = vld [vmem:[%s941_s4 + $0x24] sm:$0xf]  ;;  %v80_v38 = vmul.bf16 %v64_v32, %v48_v29  ;;  %v81_v39 = vmul.bf16 %v65_v35, %v49_v33  ;;  %v51_v42 = vld [vmem:[%s940_s1 + $0x28] sm:$0xf]  ;;  %v52_v43 = vld [vmem:[%s940_s1 + $0x2c] sm:$0xf] }
   0xb   :  { %639 = vmatpush3.bf16.msra.mxu0 %v700_v2  ;;  %v82_v40 = vmul.bf16 %v66_v36, %v50_v34  ;;  %v67_v45 = vld [vmem:[%s941_s4 + $0x28] sm:$0xf]  ;;  %v68_v46 = vld [vmem:[%s941_s4 + $0x2c] sm:$0xf]  ;;  %v53_v47 = vld [vmem:[%s940_s1 + $0x30] sm:$0xf] }
   0xc   :  { %640 = vmatprep.subr.bf16.mxu0 %v701_v3  ;;  %v580_v41 = vcombine.low %v79_v37, %v80_v38  ;;  %v54_v48 = vld [vmem:[%s940_s1 + $0x34] sm:$0xf]  ;;  %v69_v49 = vld [vmem:[%s941_s4 + $0x30] sm:$0xf]  ;;  %v83_v51 = vmul.bf16 %v67_v45, %v51_v42  ;;  %v84_v52 = vmul.bf16 %v68_v46, %v52_v43  ;;  %v55_v56 = vld [vmem:[%s940_s1 + $0x38] sm:$0xf] }
   0xd   :  { %v581_v44 = vcombine.low %v81_v39, %v82_v40  ;;  %v70_v50 = vld [vmem:[%s941_s4 + $0x34] sm:$0xf]  ;;  %v85_v53 = vmul.bf16 %v69_v49, %v53_v47  ;;  %v56_v58 = vld [vmem:[%s940_s1 + $0x3c] sm:$0xf]  ;;  %v71_v59 = vld [vmem:[%s941_s4 + $0x38] sm:$0xf] }
   0xe   :  { %v86_v54 = vmul.bf16 %v70_v50, %v54_v48  ;;  %v582_v55 = vcombine.low %v83_v51, %v84_v52  ;;  %v72_v60 = vld [vmem:[%s941_s4 + $0x3c] sm:$0xf]  ;;  %v87_v61 = vmul.bf16 %v71_v59, %v55_v56  ;;  %v706_v0 = vld [vmem:[%s942_s0] sm:$0xff]   ;;  %v707_v25 = vld [vmem:[%s942_s0 + $0x8] sm:$0xff]  }
   0xf   :  { %641 = vmatpush3.bf16.msra.mxu0 %v701_v3  ;;  %v88_v62 = vmul.bf16 %v72_v60, %v56_v58  ;;  %682 = vmatprep.mubr.bf16.mxu1 %v706_v0  ;;  %v708_v26 = vld [vmem:[%s942_s0 + $0x10] sm:$0xff]   ;;  %v710_v28 = vld [vmem:[%s942_s0 + $0x20] sm:$0xff]   ;;  %v711_v29 = vld [vmem:[%s942_s0 + $0x28] sm:$0xff]  }
  0x10   :  { %642 = vmatprep.subr.bf16.mxu0 %v702_v10  ;;  %v583_v57 = vcombine.low %v85_v53, %v86_v54  ;;  %v713_v31 = vld [vmem:[%s942_s0 + $0x38] sm:$0xff]   ;;  %v601_v32 = vld [vmem:[%s943_s3] ss:$0 sm:$0xff] }
  0x11   :  { %v584_v63 = vcombine.low %v87_v61, %v88_v62 }
  0x13   :  { %643 = vmatpush3.bf16.msra.mxu0 %v702_v10 }
  0x14   :  { %644 = vmatprep.subr.bf16.mxu0 %v703_v12 }
  0x17   :  { %645 = vmatpush3.bf16.msra.mxu0 %v703_v12 }
  0x18   :  { %646 = vmatprep.subr.bf16.mxu0 %v704_v13 }
  0x1b   :  { %647 = vmatpush3.bf16.msra.mxu0 %v704_v13 }
  0x1c   :  { %648 = vmatprep.subr.bf16.mxu0 %v705_v14 }
  0x1f   :  { %649 = vmatpush3.bf16.msra.mxu0 %v705_v14 }
  0x22   :  { %651 = vmatmul.mubr.bf16.vlgmr.msra.gmra.mrb[0].mxu0 %v578_v27  ;;  %v709_v27 = vld [vmem:[%s942_s0 + $0x18] sm:$0xff]  }
  0x23   :  { %654 = vmatprep.mubr.bf16.mxu0 %v579_v30  ;;  %v712_v30 = vld [vmem:[%s942_s0 + $0x30] sm:$0xff]  }
  0x2a   :  { %655 = vmatmul.mubr.bf16.gmra.mrb[4].mxu0 %v580_v41 }
  0x2b   :  { %658 = vmatprep.mubr.bf16.mxu0 %v581_v44 }
  0x32   :  { %659 = vmatmul.mubr.bf16.gmra.mrb[8].mxu0 %v582_v55 }
  0x33   :  { %662 = vmatprep.mubr.bf16.mxu0 %v583_v57 }
  0x3a   :  { %663 = vmatmul.mubr.bf16.gmra.mrb[12].mxu0 %v584_v63 }
  0xf5   :  { %v652_v1 = vpop.f32.mrb[0].mxu0 }
  0xf6   :  { %v235_v2 = vpop.f32.mrb[1].mxu0 }
  0xf7   :  { %v653_v3 = vpop.f32.mrb[2].mxu0 }
  0xf8   :  { %v331_v4 = vpack.c.bf16 %v653_v3, %v652_v1  ;;  %v238_v5 = vpop.f32.mrb[3].mxu0 }
  0xf9   :  { %v330_v6 = vpack.c.bf16 %v238_v5, %v235_v2 }
  0xfb   :  { %666 = vmatprep.subr.bf16.mxu1 %v330_v6 }
  0xfc   :  { %667 = vmatpush3.bf16.msra.mxu1 %v330_v6 }
  0xfd   :  { %v656_v7 = vpop.f32.mrb[4].mxu0  ;;  %668 = vmatprep.subr.bf16.mxu1 %v331_v4 }
  0xfe   :  { %v251_v8 = vpop.f32.mrb[5].mxu0 }
  0xff   :  { %v657_v9 = vpop.f32.mrb[6].mxu0 }
 0x100   :  { %v333_v10 = vpack.c.bf16 %v657_v9, %v656_v7  ;;  %v254_v11 = vpop.f32.mrb[7].mxu0  ;;  %669 = vmatpush3.bf16.msra.mxu1 %v331_v4 }
 0x101   :  { %v332_v12 = vpack.c.bf16 %v254_v11, %v251_v8 }
 0x103   :  { %670 = vmatprep.subr.bf16.mxu1 %v332_v12 }
 0x104   :  { %671 = vmatpush3.bf16.msra.mxu1 %v332_v12 }
 0x105   :  { %v660_v13 = vpop.f32.mrb[8].mxu0  ;;  %672 = vmatprep.subr.bf16.mxu1 %v333_v10 }
 0x106   :  { %v267_v14 = vpop.f32.mrb[9].mxu0 }
 0x107   :  { %v661_v15 = vpop.f32.mrb[10].mxu0 }
 0x108   :  { %v335_v16 = vpack.c.bf16 %v661_v15, %v660_v13  ;;  %v270_v17 = vpop.f32.mrb[11].mxu0  ;;  %673 = vmatpush3.bf16.msra.mxu1 %v333_v10 }
 0x109   :  { %v334_v18 = vpack.c.bf16 %v270_v17, %v267_v14 }
 0x10b   :  { %674 = vmatprep.subr.bf16.mxu1 %v334_v18 }
 0x10c   :  { %675 = vmatpush3.bf16.msra.mxu1 %v334_v18 }
 0x10d   :  { %v664_v19 = vpop.f32.mrb[12].mxu0  ;;  %676 = vmatprep.subr.bf16.mxu1 %v335_v16 }
 0x10e   :  { %v283_v20 = vpop.f32.mrb[13].mxu0 }
 0x10f   :  { %v665_v21 = vpop.f32.mrb[14].mxu0 }
 0x110   :  { %v337_v22 = vpack.c.bf16 %v665_v21, %v664_v19  ;;  %v286_v23 = vpop.f32.mrb[15].mxu0  ;;  %677 = vmatpush3.bf16.msra.mxu1 %v335_v16 }
 0x111   :  { %v336_v24 = vpack.c.bf16 %v286_v23, %v283_v20 }
 0x113   :  { %678 = vmatprep.subr.bf16.mxu1 %v336_v24 }
 0x114   :  { %679 = vmatpush3.bf16.msra.mxu1 %v336_v24 }
 0x115   :  { %680 = vmatprep.subr.bf16.mxu1 %v337_v22 }
 0x118   :  { %681 = vmatpush3.bf16.msra.mxu1 %v337_v22 }
 0x11b   :  { %683 = vmatmul.mubr.bf16.vlgmr.msra.gmra.mrb[0].mxu1 %v707_v25 }
 0x11c   :  { %686 = vmatprep.mubr.bf16.mxu1 %v708_v26 }
 0x123   :  { %687 = vmatmul.mubr.bf16.gmra.mrb[4].mxu1 %v709_v27 }
 0x124   :  { %690 = vmatprep.mubr.bf16.mxu1 %v710_v28 }
 0x12b   :  { %691 = vmatmul.mubr.bf16.gmra.mrb[8].mxu1 %v711_v29 }
 0x12c   :  { %694 = vmatprep.mubr.bf16.mxu1 %v712_v30 }
 0x133   :  { %695 = vmatmul.mubr.bf16.gmra.mrb[12].mxu1 %v713_v31 }
 0x1ee   :  { %v684_v33 = vpop.f32.mrb[0].mxu1 }
 0x1ef   :  { %v543_v34 = vadd.f32 %v684_v33, %v601_v32  ;;  %v420_v35 = vpop.f32.mrb[1].mxu1 }
 0x1f0   :  { %v541_v36 = vadd.f32 %v601_v32, %v420_v35  ;;  %v685_v37 = vpop.f32.mrb[2].mxu1 }
 0x1f1   :  { %559 = vst [vmem:[%s944_s5 + $0x10] sm:$0xff] %v543_v34  ;;  %v544_v38 = vadd.f32 %v685_v37, %v601_v32  ;;  %v423_v39 = vpop.f32.mrb[3].mxu1 }
 0x1f2   :  { %557 = vst [vmem:[%s944_s5] sm:$0xff] %v541_v36  ;;  %v542_v40 = vadd.f32 %v601_v32, %v423_v39 }
 0x1f3   :  { %560 = vst [vmem:[%s944_s5 + $0x18] sm:$0xff] %v544_v38 }
 0x1f4   :  { %558 = vst [vmem:[%s944_s5 + $0x8] sm:$0xff] %v542_v40 }
 0x1f6   :  { %v688_v41 = vpop.f32.mrb[4].mxu1 }
 0x1f7   :  { %v547_v42 = vadd.f32 %v688_v41, %v601_v32  ;;  %v436_v43 = vpop.f32.mrb[5].mxu1 }
 0x1f8   :  { %v545_v44 = vadd.f32 %v601_v32, %v436_v43  ;;  %v689_v45 = vpop.f32.mrb[6].mxu1 }
 0x1f9   :  { %563 = vst [vmem:[%s944_s5 + $0x30] sm:$0xff] %v547_v42  ;;  %v548_v46 = vadd.f32 %v689_v45, %v601_v32  ;;  %v439_v47 = vpop.f32.mrb[7].mxu1 }
 0x1fa   :  { %561 = vst [vmem:[%s944_s5 + $0x20] sm:$0xff] %v545_v44  ;;  %v546_v48 = vadd.f32 %v601_v32, %v439_v47 }
 0x1fb   :  { %564 = vst [vmem:[%s944_s5 + $0x38] sm:$0xff] %v548_v46 }
 0x1fc   :  { %562 = vst [vmem:[%s944_s5 + $0x28] sm:$0xff] %v546_v48 }
 0x1fe   :  { %v692_v49 = vpop.f32.mrb[8].mxu1 }
 0x1ff   :  { %v551_v50 = vadd.f32 %v692_v49, %v601_v32  ;;  %v452_v51 = vpop.f32.mrb[9].mxu1 }
 0x200   :  { %v549_v52 = vadd.f32 %v601_v32, %v452_v51  ;;  %v693_v53 = vpop.f32.mrb[10].mxu1 }
 0x201   :  { %567 = vst [vmem:[%s944_s5 + $0x50] sm:$0xff] %v551_v50  ;;  %v552_v54 = vadd.f32 %v693_v53, %v601_v32  ;;  %v455_v55 = vpop.f32.mrb[11].mxu1 }
 0x202   :  { %565 = vst [vmem:[%s944_s5 + $0x40] sm:$0xff] %v549_v52  ;;  %v550_v56 = vadd.f32 %v601_v32, %v455_v55 }
 0x203   :  { %568 = vst [vmem:[%s944_s5 + $0x58] sm:$0xff] %v552_v54 }
 0x204   :  { %566 = vst [vmem:[%s944_s5 + $0x48] sm:$0xff] %v550_v56 }
 0x206   :  { %v696_v57 = vpop.f32.mrb[12].mxu1 }
 0x207   :  { %v555_v58 = vadd.f32 %v696_v57, %v601_v32  ;;  %v468_v59 = vpop.f32.mrb[13].mxu1 }
 0x208   :  { %v553_v60 = vadd.f32 %v601_v32, %v468_v59  ;;  %v697_v61 = vpop.f32.mrb[14].mxu1 }
 0x209   :  { %571 = vst [vmem:[%s944_s5 + $0x70] sm:$0xff] %v555_v58  ;;  %v556_v62 = vadd.f32 %v697_v61, %v601_v32  ;;  %v471_v63 = vpop.f32.mrb[15].mxu1 }
 0x20a   :  { %569 = vst [vmem:[%s944_s5 + $0x60] sm:$0xff] %v553_v60  ;;  %v554_v0 = vadd.f32 %v601_v32, %v471_v63 }
 0x20b   :  { %572 = vst [vmem:[%s944_s5 + $0x78] sm:$0xff] %v556_v62 }
 0x20c   :  { %570 = vst [vmem:[%s944_s5 + $0x68] sm:$0xff] %v554_v0 }

</bundles_post_ra>
